<compile_context>
chip_gen: v5e
topology: v5e:2x2
jax: 0.10.0
libtpu: 0.0.40
codegen_flags: <defaults>
</compile_context>

<pallas_src>
import jax
import jax.numpy as jnp
from jax.experimental import pallas as pl
from jax.experimental.pallas import tpu as pltpu

D_IN = 1323
H1 = 512
H2 = 128
LANE = 128

D_PAD = ((D_IN + LANE - 1) // LANE) * LANE  # 1408


def _round_up(x, m):
    return (x + m - 1) // m * m


def _num_tensorcores():
    """Best-effort detection of TensorCores per chip (2 only on v7x)."""
    try:
        info = pltpu.get_tpu_info()
        for attr in ("num_cores", "tensorcores_per_chip", "core_count"):
            v = getattr(info, attr, None)
            if v:
                return int(v)
    except Exception:
        pass
    try:
        kind = jax.devices()[0].device_kind.lower()
        if "v7" in kind:
            return 2
    except Exception:
        pass
    return 1


def _normfree_kernel(x_ref, w1_ref, b1_ref, w2_ref, b2_ref, w3_ref, b3_ref,
                     o_ref, xpad_ref):
    # Cast the f32 input tile to bf16 and zero-pad K 1323 -> 1408 inside the
    # kernel (VMEM scratch) so fc1 is lane-dense on the MXU, with no wrapper-side
    # pad/cast HBM roundtrip.  The pad columns are re-zeroed every step so the
    # kernel is safe when the "parallel" grid axis is split across TensorCores.
    x_bf = x_ref[...].astype(jnp.bfloat16)
    xpad_ref[:, :D_IN] = x_bf
    xpad_ref[:, D_IN:] = jnp.zeros((x_bf.shape[0], D_PAD - D_IN), jnp.bfloat16)

    # fc1: bf16 x bf16 -> f32 MXU accumulate; bias + ReLU in f32.
    h1 = jnp.dot(xpad_ref[...], w1_ref[...], preferred_element_type=jnp.float32)
    h1 = jnp.maximum(h1 + b1_ref[...], 0.0)
    # dropout (inference / eval) == identity
    h1 = h1.astype(jnp.bfloat16)   # free VALU work; halves VMEM traffic

    # fc2 + ReLU
    h2 = jnp.dot(h1, w2_ref[...], preferred_element_type=jnp.float32)
    h2 = jnp.maximum(h2 + b2_ref[...], 0.0)
    h2 = h2.astype(jnp.bfloat16)

    # fc3 (no activation)
    out = jnp.dot(h2, w3_ref[...], preferred_element_type=jnp.float32) + b3_ref[...]
    o_ref[...] = out.astype(o_ref.dtype)


def prepare_params(params):
    """One-time (per weight update) prep: pad w1 rows 1323->1408, pad w3/b3
    cols out_dim->out_pad, cast weights to bf16, biases to f32.  Hoisted out of
    the per-call path so forward does no wrapper-side weight work."""
    out_dim = params["w3"].shape[1]
    out_pad = _round_up(out_dim, LANE)
    return {
        "w1": jnp.pad(params["w1"], ((0, D_PAD - D_IN), (0, 0))).astype(jnp.bfloat16),
        "b1": params["b1"].astype(jnp.float32),
        "w2": params["w2"].astype(jnp.bfloat16),
        "b2": params["b2"].astype(jnp.float32),
        "w3": jnp.pad(params["w3"], ((0, 0), (0, out_pad - out_dim))).astype(jnp.bfloat16),
        "b3": jnp.pad(params["b3"], ((0, 0), (0, out_pad - out_dim))).astype(jnp.float32),
        "out_dim": out_dim,
        "out_pad": out_pad,
    }


def normfree_forward(x, prepared, *, block_b=512):
    """x: (B, 1323) float32.  prepared: output of prepare_params().
    Returns (B, out_dim) float32."""
    B, d_in = x.shape
    assert d_in == D_IN
    out_dim = prepared["out_dim"]
    out_pad = prepared["out_pad"]

    # --- pick the batch tile (multiple of 8) --------------------------------
    bb = min(_round_up(block_b, 8), _round_up(B, 8))
    bb = max(8, bb)
    # Only split into >=2 grid steps when the chip has 2 TensorCores (v7x):
    # on v5e/v6e splitting just shrinks M per matmul and adds per-step overhead.
    if _num_tensorcores() >= 2 and B > 8 and pl.cdiv(B, bb) < 2:
        bb = max(8, _round_up(pl.cdiv(B, 2), 8))

    grid = (pl.cdiv(B, bb),)   # non-divisible remainder handled by Pallas masking

    flops = 2 * B * (D_PAD * H1 + H1 * H2 + H2 * out_pad)
    bytes_accessed = (
        B * D_IN * 4                                      # x (f32, unpadded)
        + (D_PAD * H1 + H1 * H2 + H2 * out_pad) * 2       # weights (bf16)
        + (H1 + H2 + out_pad) * 4                         # biases (f32)
        + B * out_pad * 4                                 # output (f32)
    )
    cost = pl.CostEstimate(flops=flops, transcendentals=0,
                           bytes_accessed=bytes_accessed)

    vmem_limit = (48 if bb > 256 else 32) * 1024 * 1024

    const_shapes = [(D_PAD, H1), (1, H1), (H1, H2), (1, H2),
                    (H2, out_pad), (1, out_pad)]

    def _call(single_buffer_weights):
        if single_buffer_weights:
            # Constant-index blocks are DMA'd once; single-buffer them to free
            # the second buffer set (VMEM headroom, most valuable on v7x).
            const_specs = [
                pl.BlockSpec(s, lambda i: (0, 0), pipeline_mode=pl.Buffered(1))
                for s in const_shapes
            ]
        else:
            const_specs = [pl.BlockSpec(s, lambda i: (0, 0)) for s in const_shapes]

        return pl.pallas_call(
            _normfree_kernel,
            out_shape=jax.ShapeDtypeStruct((B, out_pad), jnp.float32),
            grid_spec=pltpu.PrefetchScalarGridSpec(
                num_scalar_prefetch=0,
                grid=grid,
                in_specs=[pl.BlockSpec((bb, D_IN), lambda i: (i, 0))] + const_specs,
                out_specs=pl.BlockSpec((bb, out_pad), lambda i: (i, 0)),
                scratch_shapes=[pltpu.VMEM((bb, D_PAD), jnp.bfloat16)],
            ),
            compiler_params=pltpu.CompilerParams(
                dimension_semantics=("parallel",),
                vmem_limit_bytes=vmem_limit,
            ),
            cost_estimate=cost,
        )(x, prepared["w1"], prepared["b1"], prepared["w2"], prepared["b2"],
          prepared["w3"], prepared["b3"])

    try:
        out = _call(True)
    except Exception:
        # Fallback without the single-buffer pipeline hint (correctness first).
        out = _call(False)

    return out[:B, :out_dim]


def init_params(key, out_dim):
    """Deterministic init matching nn.Linear shapes (weights stored (in, out)
    for the kernel's row-major matmul), f32.  Run prepare_params() once on the
    result before calling normfree_forward()."""
    ks = jax.random.split(key, 6)

    def linear(kw, kb, fan_in, fan_out):
        bound = 1.0 / jnp.sqrt(fan_in)
        w = jax.random.uniform(kw, (fan_in, fan_out), jnp.float32, -bound, bound)
        b = jax.random.uniform(kb, (1, fan_out), jnp.float32, -bound, bound)
        return w, b

    w1, b1 = linear(ks[0], ks[1], D_IN, H1)
    w2, b2 = linear(ks[2], ks[3], H1, H2)
    w3, b3 = linear(ks[4], ks[5], H2, out_dim)
    return {"w1": w1, "b1": b1, "w2": w2, "b2": b2, "w3": w3, "b3": b3}


def normfree_reference(x, p):
    """Pure-JAX reference with the same numerics as the kernel
    (bf16 operands, f32 accumulation, f32 bias/ReLU)."""
    xb = x.astype(jnp.bfloat16)
    h1 = jnp.dot(xb, p["w1"].astype(jnp.bfloat16),
                 preferred_element_type=jnp.float32) + p["b1"]
    h1 = jnp.maximum(h1, 0.0).astype(jnp.bfloat16)
    h2 = jnp.dot(h1, p["w2"].astype(jnp.bfloat16),
                 preferred_element_type=jnp.float32) + p["b2"]
    h2 = jnp.maximum(h2, 0.0).astype(jnp.bfloat16)
    return jnp.dot(h2, p["w3"].astype(jnp.bfloat16),
                   preferred_element_type=jnp.float32) + p["b3"]


if __name__ == "__main__":
    key = jax.random.PRNGKey(0)
    k_x, k_p = jax.random.split(key)

    B = 8
    OUT_DIM = 32
    x = jax.random.normal(k_x, (B, D_IN), jnp.float32)
    raw_params = init_params(k_p, OUT_DIM)
    params = prepare_params(raw_params)   # one-time pad/cast (hoisted out of forward)

    out = normfree_forward(x, params)
    out = jax.block_until_ready(out)

    ref = normfree_reference(x, raw_params)
    assert out.shape == (B, OUT_DIM)
    max_err = float(jnp.max(jnp.abs(out - ref)))
    assert jnp.allclose(out, ref, atol=1e-2, rtol=1e-2), f"mismatch vs reference: {max_err}"

    print("KERNEL_OK")
</pallas_src>

<mosaic_0001>
module attributes {stable_mosaic.version = 11 : i64} {
  func.func @_normfree_kernel(%arg0: i32, %arg1: memref<8x1323xf32, #tpu.memory_space<vmem>>, %arg2: memref<1408x512xbf16, #tpu.memory_space<vmem>>, %arg3: memref<1x512xf32, #tpu.memory_space<vmem>>, %arg4: memref<512x128xbf16, #tpu.memory_space<vmem>>, %arg5: memref<1x128xf32, #tpu.memory_space<vmem>>, %arg6: memref<128x128xbf16, #tpu.memory_space<vmem>>, %arg7: memref<1x128xf32, #tpu.memory_space<vmem>>, %arg8: memref<8x128xf32, #tpu.memory_space<vmem>>, %arg9: memref<8x1408xbf16, #tpu.memory_space<vmem>>) attributes {dimension_semantics = [#tpu.dimension_semantics<parallel>], iteration_bounds = array<i64: 1>, scalar_prefetch = 0 : i64, scratch_operands = 1 : i64, tpu.core_type = #tpu.core_type<tc>, window_params = [{transform_indices = @transform_0, window_bounds = array<i64: 8, 1323>}, {pipeline_mode = #tpu.pipeline_mode<synchronous>, transform_indices = @transform_1, window_bounds = array<i64: 1408, 512>}, {pipeline_mode = #tpu.pipeline_mode<synchronous>, transform_indices = @transform_2, window_bounds = array<i64: 1, 512>}, {pipeline_mode = #tpu.pipeline_mode<synchronous>, transform_indices = @transform_3, window_bounds = array<i64: 512, 128>}, {pipeline_mode = #tpu.pipeline_mode<synchronous>, transform_indices = @transform_4, window_bounds = array<i64: 1, 128>}, {pipeline_mode = #tpu.pipeline_mode<synchronous>, transform_indices = @transform_5, window_bounds = array<i64: 128, 128>}, {pipeline_mode = #tpu.pipeline_mode<synchronous>, transform_indices = @transform_6, window_bounds = array<i64: 1, 128>}, {transform_indices = @transform_7, window_bounds = array<i64: 8, 128>}]} {
    %c0 = arith.constant 0 : index
    %c0_0 = arith.constant 0 : index
    %0 = vector.load %arg1[%c0, %c0_0] : memref<8x1323xf32, #tpu.memory_space<vmem>>, vector<8x1323xf32>
    %1 = arith.truncf %0 : vector<8x1323xf32> to vector<8x1323xbf16>
    %c0_1 = arith.constant 0 : index
    %c0_2 = arith.constant 0 : index
    %2 = vector.load %arg9[%c0_1, %c0_2] : memref<8x1408xbf16, #tpu.memory_space<vmem>>, vector<8x1323xbf16>
    tpu.vector_store %arg9[%c0_1, %c0_2], %1 {strides = array<i32>} : memref<8x1408xbf16, #tpu.memory_space<vmem>>, vector<8x1323xbf16>,
    %cst = arith.constant 0.000000e+00 : bf16
    %3 = vector.broadcast %cst : bf16 to vector<8x85xbf16>
    %c0_3 = arith.constant 0 : index
    %c1323 = arith.constant 1323 : index
    %4 = vector.load %arg9[%c0_3, %c1323] : memref<8x1408xbf16, #tpu.memory_space<vmem>>, vector<8x85xbf16>
    tpu.vector_store %arg9[%c0_3, %c1323], %3 {strides = array<i32>} : memref<8x1408xbf16, #tpu.memory_space<vmem>>, vector<8x85xbf16>,
    %c0_4 = arith.constant 0 : index
    %c0_5 = arith.constant 0 : index
    %5 = vector.load %arg9[%c0_4, %c0_5] : memref<8x1408xbf16, #tpu.memory_space<vmem>>, vector<8x1408xbf16>
    %c0_6 = arith.constant 0 : index
    %c0_7 = arith.constant 0 : index
    %6 = vector.load %arg2[%c0_6, %c0_7] : memref<1408x512xbf16, #tpu.memory_space<vmem>>, vector<1408x512xbf16>
    %cst_8 = arith.constant dense<0.000000e+00> : vector<8x512xf32>
    %7 = tpu.matmul %5, %6, %cst_8 {dimension_numbers = #tpu.dot_dimension_numbers<[1], [0], [0], [1], [0, 0, 1, 1], [], []>} : vector<8x1408xbf16>, vector<1408x512xbf16>, vector<8x512xf32> -> vector<8x512xf32>
    %c0_9 = arith.constant 0 : index
    %c0_10 = arith.constant 0 : index
    %8 = vector.load %arg3[%c0_9, %c0_10] : memref<1x512xf32, #tpu.memory_space<vmem>>, vector<1x512xf32>
    %9 = vector.broadcast %8 : vector<1x512xf32> to vector<8x512xf32>
    %10 = arith.addf %7, %9 : vector<8x512xf32>
    %cst_11 = arith.constant 0.000000e+00 : f32
    %11 = vector.broadcast %cst_11 : f32 to vector<8x512xf32>
    %12 = arith.maximumf %10, %11 : vector<8x512xf32>
    %13 = arith.truncf %12 : vector<8x512xf32> to vector<8x512xbf16>
    %c0_12 = arith.constant 0 : index
    %c0_13 = arith.constant 0 : index
    %14 = vector.load %arg4[%c0_12, %c0_13] : memref<512x128xbf16, #tpu.memory_space<vmem>>, vector<512x128xbf16>
    %cst_14 = arith.constant dense<0.000000e+00> : vector<8x128xf32>
    %15 = tpu.matmul %13, %14, %cst_14 {dimension_numbers = #tpu.dot_dimension_numbers<[1], [0], [0], [1], [0, 0, 1, 1], [], []>} : vector<8x512xbf16>, vector<512x128xbf16>, vector<8x128xf32> -> vector<8x128xf32>
    %c0_15 = arith.constant 0 : index
    %c0_16 = arith.constant 0 : index
    %16 = vector.load %arg5[%c0_15, %c0_16] : memref<1x128xf32, #tpu.memory_space<vmem>>, vector<1x128xf32>
    %17 = vector.broadcast %16 : vector<1x128xf32> to vector<8x128xf32>
    %18 = arith.addf %15, %17 : vector<8x128xf32>
    %cst_17 = arith.constant 0.000000e+00 : f32
    %19 = vector.broadcast %cst_17 : f32 to vector<8x128xf32>
    %20 = arith.maximumf %18, %19 : vector<8x128xf32>
    %21 = arith.truncf %20 : vector<8x128xf32> to vector<8x128xbf16>
    %c0_18 = arith.constant 0 : index
    %c0_19 = arith.constant 0 : index
    %22 = vector.load %arg6[%c0_18, %c0_19] : memref<128x128xbf16, #tpu.memory_space<vmem>>, vector<128x128xbf16>
    %cst_20 = arith.constant dense<0.000000e+00> : vector<8x128xf32>
    %23 = tpu.matmul %21, %22, %cst_20 {dimension_numbers = #tpu.dot_dimension_numbers<[1], [0], [0], [1], [0, 0, 1, 1], [], []>} : vector<8x128xbf16>, vector<128x128xbf16>, vector<8x128xf32> -> vector<8x128xf32>
    %c0_21 = arith.constant 0 : index
    %c0_22 = arith.constant 0 : index
    %24 = vector.load %arg7[%c0_21, %c0_22] : memref<1x128xf32, #tpu.memory_space<vmem>>, vector<1x128xf32>
    %25 = vector.broadcast %24 : vector<1x128xf32> to vector<8x128xf32>
    %26 = arith.addf %23, %25 : vector<8x128xf32>
    %c0_23 = arith.constant 0 : index
    %c0_24 = arith.constant 0 : index
    %27 = vector.load %arg8[%c0_23, %c0_24] : memref<8x128xf32, #tpu.memory_space<vmem>>, vector<8x128xf32>
    tpu.vector_store %arg8[%c0_23, %c0_24], %26 {strides = array<i32>} : memref<8x128xf32, #tpu.memory_space<vmem>>, vector<8x128xf32>,
    return
  }
  func.func @transform_0(%arg0: i32) -> (i32, i32) {
    %c0_i32 = arith.constant 0 : i32
    %c0_i32_0 = arith.constant 0 : i32
    return %arg0, %c0_i32 : i32, i32
  }
  func.func @transform_1(%arg0: i32) -> (i32, i32) {
    %c0_i32 = arith.constant 0 : i32
    %c0_i32_0 = arith.constant 0 : i32
    %c0_i32_1 = arith.constant 0 : i32
    return %c0_i32, %c0_i32_0 : i32, i32
  }
  func.func @transform_2(%arg0: i32) -> (i32, i32) {
    %c0_i32 = arith.constant 0 : i32
    %c0_i32_0 = arith.constant 0 : i32
    %c0_i32_1 = arith.constant 0 : i32
    return %c0_i32, %c0_i32_0 : i32, i32
  }
  func.func @transform_3(%arg0: i32) -> (i32, i32) {
    %c0_i32 = arith.constant 0 : i32
    %c0_i32_0 = arith.constant 0 : i32
    %c0_i32_1 = arith.constant 0 : i32
    return %c0_i32, %c0_i32_0 : i32, i32
  }
  func.func @transform_4(%arg0: i32) -> (i32, i32) {
    %c0_i32 = arith.constant 0 : i32
    %c0_i32_0 = arith.constant 0 : i32
    %c0_i32_1 = arith.constant 0 : i32
    return %c0_i32, %c0_i32_0 : i32, i32
  }
  func.func @transform_5(%arg0: i32) -> (i32, i32) {
    %c0_i32 = arith.constant 0 : i32
    %c0_i32_0 = arith.constant 0 : i32
    %c0_i32_1 = arith.constant 0 : i32
    return %c0_i32, %c0_i32_0 : i32, i32
  }
  func.func @transform_6(%arg0: i32) -> (i32, i32) {
    %c0_i32 = arith.constant 0 : i32
    %c0_i32_0 = arith.constant 0 : i32
    %c0_i32_1 = arith.constant 0 : i32
    return %c0_i32, %c0_i32_0 : i32, i32
  }
  func.func @transform_7(%arg0: i32) -> (i32, i32) {
    %c0_i32 = arith.constant 0 : i32
    %c0_i32_0 = arith.constant 0 : i32
    return %arg0, %c0_i32 : i32, i32
  }
}

module attributes {stable_mosaic.version = 11 : i64} {
  func.func @_normfree_kernel(%arg0: i32, %arg1: memref<8x1323xf32, #tpu.memory_space<vmem>>, %arg2: memref<1408x512xbf16, #tpu.memory_space<vmem>>, %arg3: memref<1x512xf32, #tpu.memory_space<vmem>>, %arg4: memref<512x128xbf16, #tpu.memory_space<vmem>>, %arg5: memref<1x128xf32, #tpu.memory_space<vmem>>, %arg6: memref<128x128xbf16, #tpu.memory_space<vmem>>, %arg7: memref<1x128xf32, #tpu.memory_space<vmem>>, %arg8: memref<8x128xf32, #tpu.memory_space<vmem>>, %arg9: memref<8x1408xbf16, #tpu.memory_space<vmem>>) attributes {dimension_semantics = [#tpu.dimension_semantics<parallel>], iteration_bounds = array<i64: 1>, scalar_prefetch = 0 : i64, scratch_operands = 1 : i64, tpu.core_type = #tpu.core_type<tc>, window_params = [{transform_indices = @transform_0, window_bounds = array<i64: 8, 1323>}, {pipeline_mode = #tpu.pipeline_mode<synchronous>, transform_indices = @transform_1, window_bounds = array<i64: 1408, 512>}, {pipeline_mode = #tpu.pipeline_mode<synchronous>, transform_indices = @transform_2, window_bounds = array<i64: 1, 512>}, {pipeline_mode = #tpu.pipeline_mode<synchronous>, transform_indices = @transform_3, window_bounds = array<i64: 512, 128>}, {pipeline_mode = #tpu.pipeline_mode<synchronous>, transform_indices = @transform_4, window_bounds = array<i64: 1, 128>}, {pipeline_mode = #tpu.pipeline_mode<synchronous>, transform_indices = @transform_5, window_bounds = array<i64: 128, 128>}, {pipeline_mode = #tpu.pipeline_mode<synchronous>, transform_indices = @transform_6, window_bounds = array<i64: 1, 128>}, {transform_indices = @transform_7, window_bounds = array<i64: 8, 128>}]} {
    %c0 = arith.constant 0 : index
    %c0_0 = arith.constant 0 : index
    %0 = vector.load %arg1[%c0, %c0_0] : memref<8x1323xf32, #tpu.memory_space<vmem>>, vector<8x1323xf32>
    %1 = arith.truncf %0 : vector<8x1323xf32> to vector<8x1323xbf16>
    %c0_1 = arith.constant 0 : index
    %c0_2 = arith.constant 0 : index
    %2 = vector.load %arg9[%c0_1, %c0_2] : memref<8x1408xbf16, #tpu.memory_space<vmem>>, vector<8x1323xbf16>
    tpu.vector_store %arg9[%c0_1, %c0_2], %1 {strides = array<i32>} : memref<8x1408xbf16, #tpu.memory_space<vmem>>, vector<8x1323xbf16>,
    %cst = arith.constant 0.000000e+00 : bf16
    %3 = vector.broadcast %cst : bf16 to vector<8x85xbf16>
    %c0_3 = arith.constant 0 : index
    %c1323 = arith.constant 1323 : index
    %4 = vector.load %arg9[%c0_3, %c1323] : memref<8x1408xbf16, #tpu.memory_space<vmem>>, vector<8x85xbf16>
    tpu.vector_store %arg9[%c0_3, %c1323], %3 {strides = array<i32>} : memref<8x1408xbf16, #tpu.memory_space<vmem>>, vector<8x85xbf16>,
    %c0_4 = arith.constant 0 : index
    %c0_5 = arith.constant 0 : index
    %5 = vector.load %arg9[%c0_4, %c0_5] : memref<8x1408xbf16, #tpu.memory_space<vmem>>, vector<8x1408xbf16>
    %c0_6 = arith.constant 0 : index
    %c0_7 = arith.constant 0 : index
    %6 = vector.load %arg2[%c0_6, %c0_7] : memref<1408x512xbf16, #tpu.memory_space<vmem>>, vector<1408x512xbf16>
    %cst_8 = arith.constant dense<0.000000e+00> : vector<8x512xf32>
    %7 = tpu.matmul %5, %6, %cst_8 {dimension_numbers = #tpu.dot_dimension_numbers<[1], [0], [0], [1], [0, 0, 1, 1], [], []>} : vector<8x1408xbf16>, vector<1408x512xbf16>, vector<8x512xf32> -> vector<8x512xf32>
    %c0_9 = arith.constant 0 : index
    %c0_10 = arith.constant 0 : index
    %8 = vector.load %arg3[%c0_9, %c0_10] : memref<1x512xf32, #tpu.memory_space<vmem>>, vector<1x512xf32>
    %9 = vector.broadcast %8 : vector<1x512xf32> to vector<8x512xf32>
    %10 = arith.addf %7, %9 : vector<8x512xf32>
    %cst_11 = arith.constant 0.000000e+00 : f32
    %11 = vector.broadcast %cst_11 : f32 to vector<8x512xf32>
    %12 = arith.maximumf %10, %11 : vector<8x512xf32>
    %13 = arith.truncf %12 : vector<8x512xf32> to vector<8x512xbf16>
    %c0_12 = arith.constant 0 : index
    %c0_13 = arith.constant 0 : index
    %14 = vector.load %arg4[%c0_12, %c0_13] : memref<512x128xbf16, #tpu.memory_space<vmem>>, vector<512x128xbf16>
    %cst_14 = arith.constant dense<0.000000e+00> : vector<8x128xf32>
    %15 = tpu.matmul %13, %14, %cst_14 {dimension_numbers = #tpu.dot_dimension_numbers<[1], [0], [0], [1], [0, 0, 1, 1], [], []>} : vector<8x512xbf16>, vector<512x128xbf16>, vector<8x128xf32> -> vector<8x128xf32>
    %c0_15 = arith.constant 0 : index
    %c0_16 = arith.constant 0 : index
    %16 = vector.load %arg5[%c0_15, %c0_16] : memref<1x128xf32, #tpu.memory_space<vmem>>, vector<1x128xf32>
    %17 = vector.broadcast %16 : vector<1x128xf32> to vector<8x128xf32>
    %18 = arith.addf %15, %17 : vector<8x128xf32>
    %cst_17 = arith.constant 0.000000e+00 : f32
    %19 = vector.broadcast %cst_17 : f32 to vector<8x128xf32>
    %20 = arith.maximumf %18, %19 : vector<8x128xf32>
    %21 = arith.truncf %20 : vector<8x128xf32> to vector<8x128xbf16>
    %c0_18 = arith.constant 0 : index
    %c0_19 = arith.constant 0 : index
    %22 = vector.load %arg6[%c0_18, %c0_19] : memref<128x128xbf16, #tpu.memory_space<vmem>>, vector<128x128xbf16>
    %cst_20 = arith.constant dense<0.000000e+00> : vector<8x128xf32>
    %23 = tpu.matmul %21, %22, %cst_20 {dimension_numbers = #tpu.dot_dimension_numbers<[1], [0], [0], [1], [0, 0, 1, 1], [], []>} : vector<8x128xbf16>, vector<128x128xbf16>, vector<8x128xf32> -> vector<8x128xf32>
    %c0_21 = arith.constant 0 : index
    %c0_22 = arith.constant 0 : index
    %24 = vector.load %arg7[%c0_21, %c0_22] : memref<1x128xf32, #tpu.memory_space<vmem>>, vector<1x128xf32>
    %25 = vector.broadcast %24 : vector<1x128xf32> to vector<8x128xf32>
    %26 = arith.addf %23, %25 : vector<8x128xf32>
    %c0_23 = arith.constant 0 : index
    %c0_24 = arith.constant 0 : index
    %27 = vector.load %arg8[%c0_23, %c0_24] : memref<8x128xf32, #tpu.memory_space<vmem>>, vector<8x128xf32>
    tpu.vector_store %arg8[%c0_23, %c0_24], %26 {strides = array<i32>} : memref<8x128xf32, #tpu.memory_space<vmem>>, vector<8x128xf32>,
    return
  }
  func.func @transform_0(%arg0: i32) -> (i32, i32) {
    %c0_i32 = arith.constant 0 : i32
    %c0_i32_0 = arith.constant 0 : i32
    return %arg0, %c0_i32 : i32, i32
  }
  func.func @transform_1(%arg0: i32) -> (i32, i32) {
    %c0_i32 = arith.constant 0 : i32
    %c0_i32_0 = arith.constant 0 : i32
    %c0_i32_1 = arith.constant 0 : i32
    return %c0_i32, %c0_i32_0 : i32, i32
  }
  func.func @transform_2(%arg0: i32) -> (i32, i32) {
    %c0_i32 = arith.constant 0 : i32
    %c0_i32_0 = arith.constant 0 : i32
    %c0_i32_1 = arith.constant 0 : i32
    return %c0_i32, %c0_i32_0 : i32, i32
  }
  func.func @transform_3(%arg0: i32) -> (i32, i32) {
    %c0_i32 = arith.constant 0 : i32
    %c0_i32_0 = arith.constant 0 : i32
    %c0_i32_1 = arith.constant 0 : i32
    return %c0_i32, %c0_i32_0 : i32, i32
  }
  func.func @transform_4(%arg0: i32) -> (i32, i32) {
    %c0_i32 = arith.constant 0 : i32
    %c0_i32_0 = arith.constant 0 : i32
    %c0_i32_1 = arith.constant 0 : i32
    return %c0_i32, %c0_i32_0 : i32, i32
  }
  func.func @transform_5(%arg0: i32) -> (i32, i32) {
    %c0_i32 = arith.constant 0 : i32
    %c0_i32_0 = arith.constant 0 : i32
    %c0_i32_1 = arith.constant 0 : i32
    return %c0_i32, %c0_i32_0 : i32, i32
  }
  func.func @transform_6(%arg0: i32) -> (i32, i32) {
    %c0_i32 = arith.constant 0 : i32
    %c0_i32_0 = arith.constant 0 : i32
    %c0_i32_1 = arith.constant 0 : i32
    return %c0_i32, %c0_i32_0 : i32, i32
  }
  func.func @transform_7(%arg0: i32) -> (i32, i32) {
    %c0_i32 = arith.constant 0 : i32
    %c0_i32_0 = arith.constant 0 : i32
    return %arg0, %c0_i32 : i32, i32
  }
}

</mosaic_0001>

<bundles_post_ra>
// kernel: tpu_custom_call.1
= control target key start
LH: loop header
LB: loop body
LE: loop exit
PB: predicated region body
PF: predicated region fallthrough
CT: control target
= control target key end

     0   :  { %12 = vsyncpa [#allocation4], 0  ;;  %s5682_s0 = inlined_call_operand.hbm [shape: f32[8,1323], index: 0, kind: input, shape index: {}]   ;;  %s5683_s1 = inlined_call_operand.hbm [shape: bf16[1408,512], index: 1, kind: input, shape index: {}]   ;;  %s5684_s2 = inlined_call_operand.hbm [shape: f32[1,512], index: 2, kind: input, shape index: {}]   ;;  %s5685_s3 = inlined_call_operand.hbm [shape: bf16[512,128], index: 3, kind: input, shape index: {}]   ;;  %s5686_s4 = inlined_call_operand.hbm [shape: f32[1,128], index: 4, kind: input, shape index: {}]   ;;  %s5687_s5 = inlined_call_operand.hbm [shape: bf16[128,128], index: 5, kind: input, shape index: {}]   ;;  %s5688_s6 = inlined_call_operand.hbm [shape: f32[1,128], index: 6, kind: input, shape index: {}]   ;;  %s5689_s7 = inlined_call_operand.hbm [shape: f32[8,128], index: 7, kind: output, shape index: {}]  }
   0x1   :  { %13 = vsyncpa [#allocation7], 0 }
   0x2   :  { %14 = vsyncpa [#allocation10], 0 }
   0x3   :  { %15 = vsyncpa [#allocation13], 0  ;;  %s32_s26 = sshll.u32 %s5683_s1, 4  ;;  %s33_s26 = int_to_ptr.hbm [resolvable:$true] %s32_s26 }
   0x4   :  { %16 = vsyncpa [#allocation5], 0  ;;  %s5496_s27 = smov [#allocation6]   ;;  %s56_s8 = sshll.u32 %s5685_s3, 4  ;;  %s57_s8 = int_to_ptr.hbm [resolvable:$true] %s56_s8 }
   0x5   :  { %s34_s28 = sshll.u32 %s5496_s27, 4  ;;  %s5497_s9 = smov 256   ;;  %s35_s28 = int_to_ptr.vmem [resolvable:$true] %s34_s28 }
   0x6   :  { %s5498_s10 = smov 16   ;;  %s5499_s11 = smov [#allocation9]  }
   0x7   :  { %40 = dma.hbm_to_vmem [thread:$0]  %s33_s26, 45056, %s35_s28, [#allocation7], %s5497_s9, %s5497_s9, %s5498_s10  }
   0x8   :  { %s58_s12 = sshll.u32 %s5499_s11, 4  ;;  %s5500_s13 = smov 64   ;;  %s59_s12 = int_to_ptr.vmem [resolvable:$true] %s58_s12 }
   0x9   :  { %s5501_s14 = smov 4   ;;  %s80_s16 = sshll.u32 %s5687_s5, 4  ;;  %s81_s16 = int_to_ptr.hbm [resolvable:$true] %s80_s16 }
   0xa   :  { %64 = dma.hbm_to_vmem [thread:$0]  %s57_s8, 4096, %s59_s12, [#allocation10], %s5500_s13, %s5500_s13, %s5501_s14  }
   0xb   :  { %s5502_s17 = smov [#allocation12]   ;;  %s22_s20 = sshll.u32 %s5682_s0, 4  ;;  %s23_s20 = int_to_ptr.hbm [resolvable:$true] %s22_s20 }
   0xc   :  { %s82_s18 = sshll.u32 %s5502_s17, 4  ;;  %s5503_s21 = smov [#allocation3]   ;;  %s83_s18 = int_to_ptr.vmem [resolvable:$true] %s82_s18 }
   0xd   :  { %88 = dma.hbm_to_vmem [thread:$0]  %s81_s16, 1024, %s83_s18, [#allocation13], %s5500_s13, %s5500_s13, %s5501_s14  }
   0xe   :  { %s24_s22 = sshll.u32 %s5503_s21, 4  ;;  %s46_s25 = sshll.u32 %s5684_s2, 4  ;;  %s25_s22 = int_to_ptr.vmem [resolvable:$true] %s24_s22  ;;  %s47_s25 = int_to_ptr.hbm [resolvable:$true] %s46_s25 }
   0xf   :  { %27 = dma.hbm_to_vmem [thread:$0]  %s23_s20, 1408, %s25_s22, [#allocation4]  }
  0x10   :  { %s70_s27 = sshll.u32 %s5686_s4, 4  ;;  %s5504_s28 = smov [#allocation8]   ;;  %s71_s27 = int_to_ptr.hbm [resolvable:$true] %s70_s27 }
  0x11   :  { %s48_s29 = sshll.u32 %s5504_s28, 4  ;;  %s5505_s0 = smov [#allocation11]   ;;  %s49_s29 = int_to_ptr.vmem [resolvable:$true] %s48_s29 }
  0x12   :  { %51 = dma.hbm_to_vmem [thread:$0]  %s47_s25, 64, %s49_s29, [#allocation7]  }
  0x13   :  { %s72_s30 = sshll.u32 %s5505_s0, 4  ;;  %s94_s10 = sshll.u32 %s5688_s6, 4  ;;  %s73_s30 = int_to_ptr.vmem [resolvable:$true] %s72_s30  ;;  %s95_s10 = int_to_ptr.hbm [resolvable:$true] %s94_s10 }
  0x14   :  { %75 = dma.hbm_to_vmem [thread:$0]  %s71_s27, 16, %s73_s30, [#allocation10]  }
  0x15   :  { %s5506_s2 = smov [#allocation14]  }
  0x16   :  { %s96_s11 = sshll.u32 %s5506_s2, 4  ;;  %s97_s11 = int_to_ptr.vmem [resolvable:$true] %s96_s11 }
  0x17   :  { %99 = dma.hbm_to_vmem [thread:$0]  %s95_s10, 16, %s97_s11, [#allocation13]  }
  0x18   :  { %5486 = dma.done.wait [#allocation4], 1408  }
  0x19   :  { %5487 = vsyncadd [#allocation4], 4294965888 }
  0x1a   :  { %5488 = dma.done.wait [#allocation7], 45120  }
  0x1b   :  { %5489 = vsyncadd [#allocation7], 4294922176 }
  0x1c   :  { %5490 = dma.done.wait [#allocation10], 4112  }
  0x1d   :  { %5491 = vsyncadd [#allocation10], 4294963184 }
  0x1e   :  { %5492 = dma.done.wait [#allocation13], 1040  }
  0x1f   :  { %5493 = vsyncadd [#allocation13], 4294966256  ;;  %v3432_v0 = vld [vmem:[#allocation6 + $0xe0] sm:$0xf]  ;;  %v4916_v1 = vld [vmem:[#allocation6 + $0xec] sm:$0xf0] }
  0x20   :  { %v3560_v2 = vld [vmem:[#allocation6 + $0x1e0] sm:$0xf]  ;;  %v3433_v3 = vor.u32 %v4916_v1, %v3432_v0  ;;  %v4948_v4 = vld [vmem:[#allocation6 + $0x1ec] sm:$0xf0]  ;;  %vm151_vm0 = vcmask 347136   ;;  %vm153_vm1 = vcmask 1043800  }
  0x21   :  { %v3688_v5 = vld [vmem:[#allocation6 + $0x2e0] sm:$0xf]  ;;  %v4980_v6 = vld [vmem:[#allocation6 + $0x2ec] sm:$0xf0]  ;;  %v3561_v7 = vor.u32 %v4948_v4, %v3560_v2  ;;  %s5508_s4 = smov [#allocation15]   ;;  %s3305_s14 = sshll.u32 %s5689_s7, 4  ;;  %s3306_s14 = int_to_ptr.hbm [resolvable:$true] %s3305_s14 }
  0x22   :  { %v3689_v8 = vor.u32 %v4980_v6, %v3688_v5  ;;  %v3816_v9 = vld [vmem:[#allocation6 + $0x3e0] sm:$0xf]  ;;  %v5012_v10 = vld [vmem:[#allocation6 + $0x3ec] sm:$0xf0]  ;;  %2322 = vmatpush.bf16.msra.mxu0 %v3433_v3  ;;  %s3303_s6 = sshll.u32 %s5508_s4, 4  ;;  %s3304_s6 = int_to_ptr.vmem [resolvable:$true] %s3303_s6 }
  0x23   :  { %v3416_v11 = vld [vmem:[#allocation6 + $0xc0] sm:$0xf]  ;;  %v3817_v12 = vor.u32 %v5012_v10, %v3816_v9  ;;  %v4912_v13 = vld [vmem:[#allocation6 + $0xcc] sm:$0xf0]  ;;  %2335 = vmatpush.bf16.msra.mxu1 %v3561_v7 }
  0x24   :  { %v3544_v14 = vld [vmem:[#allocation6 + $0x1c0] sm:$0xf]  ;;  %v4944_v15 = vld [vmem:[#allocation6 + $0x1cc] sm:$0xf0]  ;;  %2348 = vmatpush.bf16.msra.mxu2 %v3689_v8  ;;  %v3417_v16 = vor.u32 %v4912_v13, %v3416_v11 }
  0x25   :  { %v3545_v17 = vor.u32 %v4944_v15, %v3544_v14  ;;  %v3672_v18 = vld [vmem:[#allocation6 + $0x2c0] sm:$0xf]  ;;  %v4976_v19 = vld [vmem:[#allocation6 + $0x2cc] sm:$0xf0]  ;;  %2361 = vmatpush.bf16.msra.mxu3 %v3817_v12 }
  0x26   :  { %v3800_v20 = vld [vmem:[#allocation6 + $0x3c0] sm:$0xf]  ;;  %v3673_v21 = vor.u32 %v4976_v19, %v3672_v18  ;;  %v5008_v22 = vld [vmem:[#allocation6 + $0x3cc] sm:$0xf0]  ;;  %2323 = vmatpush.bf16.msra.mxu0 %v3417_v16 }
  0x27   :  { %v3400_v23 = vld [vmem:[#allocation6 + $0xa0] sm:$0xf]  ;;  %v4908_v24 = vld [vmem:[#allocation6 + $0xac] sm:$0xf0]  ;;  %v3801_v25 = vor.u32 %v5008_v22, %v3800_v20  ;;  %2336 = vmatpush.bf16.msra.mxu1 %v3545_v17 }
  0x28   :  { %v3528_v26 = vld [vmem:[#allocation6 + $0x1a0] sm:$0xf]  ;;  %v4940_v27 = vld [vmem:[#allocation6 + $0x1ac] sm:$0xf0]  ;;  %v3401_v29 = vor.u32 %v4908_v24, %v3400_v23  ;;  %2349 = vmatpush.bf16.msra.mxu2 %v3673_v21 }
  0x29   :  { %v3656_v28 = vld [vmem:[#allocation6 + $0x2a0] sm:$0xf]  ;;  %v4972_v30 = vld [vmem:[#allocation6 + $0x2ac] sm:$0xf0]  ;;  %v3529_v33 = vor.u32 %v4940_v27, %v3528_v26  ;;  %2362 = vmatpush.bf16.msra.mxu3 %v3801_v25 }
  0x2a   :  { %v3784_v31 = vld [vmem:[#allocation6 + $0x3a0] sm:$0xf]  ;;  %v5004_v32 = vld [vmem:[#allocation6 + $0x3ac] sm:$0xf0]  ;;  %v3657_v34 = vor.u32 %v4972_v30, %v3656_v28  ;;  %2324 = vmatpush.bf16.msra.mxu0 %v3401_v29 }
  0x2b   :  { %v3384_v35 = vld [vmem:[#allocation6 + $0x80] sm:$0xf]  ;;  %v4904_v36 = vld [vmem:[#allocation6 + $0x8c] sm:$0xf0]  ;;  %v3785_v38 = vor.u32 %v5004_v32, %v3784_v31  ;;  %2337 = vmatpush.bf16.msra.mxu1 %v3529_v33 }
  0x2c   :  { %v3512_v37 = vld [vmem:[#allocation6 + $0x180] sm:$0xf]  ;;  %v4936_v39 = vld [vmem:[#allocation6 + $0x18c] sm:$0xf0]  ;;  %v3385_v44 = vor.u32 %v4904_v36, %v3384_v35  ;;  %2350 = vmatpush.bf16.msra.mxu2 %v3657_v34 }
  0x2d   :  { %v3640_v40 = vld [vmem:[#allocation6 + $0x280] sm:$0xf]  ;;  %v4968_v41 = vld [vmem:[#allocation6 + $0x28c] sm:$0xf0]  ;;  %v3513_v45 = vor.u32 %v4936_v39, %v3512_v37  ;;  %2363 = vmatpush.bf16.msra.mxu3 %v3785_v38 }
  0x2e   :  { %v3768_v42 = vld [vmem:[#allocation6 + $0x380] sm:$0xf]  ;;  %v5000_v43 = vld [vmem:[#allocation6 + $0x38c] sm:$0xf0]  ;;  %v3641_v46 = vor.u32 %v4968_v41, %v3640_v40  ;;  %2325 = vmatpush.bf16.msra.mxu0 %v3385_v44 }
  0x2f   :  { %v3368_v47 = vld [vmem:[#allocation6 + $0x60] sm:$0xf]  ;;  %v4900_v48 = vld [vmem:[#allocation6 + $0x6c] sm:$0xf0]  ;;  %v3769_v50 = vor.u32 %v5000_v43, %v3768_v42  ;;  %2338 = vmatpush.bf16.msra.mxu1 %v3513_v45 }
  0x30   :  { %v3496_v49 = vld [vmem:[#allocation6 + $0x160] sm:$0xf]  ;;  %v4932_v51 = vld [vmem:[#allocation6 + $0x16c] sm:$0xf0]  ;;  %v3369_v56 = vor.u32 %v4900_v48, %v3368_v47  ;;  %2351 = vmatpush.bf16.msra.mxu2 %v3641_v46 }
  0x31   :  { %v3624_v52 = vld [vmem:[#allocation6 + $0x260] sm:$0xf]  ;;  %v4964_v53 = vld [vmem:[#allocation6 + $0x26c] sm:$0xf0]  ;;  %v3497_v57 = vor.u32 %v4932_v51, %v3496_v49  ;;  %2364 = vmatpush.bf16.msra.mxu3 %v3769_v50 }
  0x32   :  { %v3752_v54 = vld [vmem:[#allocation6 + $0x360] sm:$0xf]  ;;  %v4996_v55 = vld [vmem:[#allocation6 + $0x36c] sm:$0xf0]  ;;  %v3625_v58 = vor.u32 %v4964_v53, %v3624_v52  ;;  %2326 = vmatpush.bf16.msra.mxu0 %v3369_v56 }
  0x33   :  { %v3352_v59 = vld [vmem:[#allocation6 + $0x40] sm:$0xf]  ;;  %v4896_v60 = vld [vmem:[#allocation6 + $0x4c] sm:$0xf0]  ;;  %v3753_v62 = vor.u32 %v4996_v55, %v3752_v54  ;;  %2339 = vmatpush.bf16.msra.mxu1 %v3497_v57 }
  0x34   :  { %v3480_v61 = vld [vmem:[#allocation6 + $0x140] sm:$0xf]  ;;  %v4928_v63 = vld [vmem:[#allocation6 + $0x14c] sm:$0xf0]  ;;  %v3353_v4 = vor.u32 %v4896_v60, %v3352_v59  ;;  %2352 = vmatpush.bf16.msra.mxu2 %v3625_v58 }
  0x35   :  { %v3608_v0 = vld [vmem:[#allocation6 + $0x240] sm:$0xf]  ;;  %v4960_v1 = vld [vmem:[#allocation6 + $0x24c] sm:$0xf0]  ;;  %v3481_v5 = vor.u32 %v4928_v63, %v3480_v61  ;;  %2365 = vmatpush.bf16.msra.mxu3 %v3753_v62 }
  0x36   :  { %v3736_v2 = vld [vmem:[#allocation6 + $0x340] sm:$0xf]  ;;  %v4992_v3 = vld [vmem:[#allocation6 + $0x34c] sm:$0xf0]  ;;  %v3609_v6 = vor.u32 %v4960_v1, %v3608_v0  ;;  %2327 = vmatpush.bf16.msra.mxu0 %v3353_v4  ;;  %v131_v4 = vld [vmem:[#allocation3 + $0x10] sm:$0xff] }
  0x37   :  { %v3336_v7 = vld [vmem:[#allocation6 + $0x20] sm:$0xf]  ;;  %v4892_v8 = vld [vmem:[#allocation6 + $0x2c] sm:$0xf0]  ;;  %v3737_v10 = vor.u32 %v4992_v3, %v3736_v2  ;;  %2340 = vmatpush.bf16.msra.mxu1 %v3481_v5 }
  0x38   :  { %v3464_v9 = vld [vmem:[#allocation6 + $0x120] sm:$0xf]  ;;  %v4924_v11 = vld [vmem:[#allocation6 + $0x12c] sm:$0xf0]  ;;  %v3337_v16 = vor.u32 %v4892_v8, %v3336_v7  ;;  %2353 = vmatpush.bf16.msra.mxu2 %v3609_v6 }
  0x39   :  { %v3592_v12 = vld [vmem:[#allocation6 + $0x220] sm:$0xf]  ;;  %v4956_v13 = vld [vmem:[#allocation6 + $0x22c] sm:$0xf0]  ;;  %v3465_v19 = vor.u32 %v4924_v11, %v3464_v9  ;;  %2366 = vmatpush.bf16.msra.mxu3 %v3737_v10  ;;  %v129_v10 = vld [vmem:[#allocation3] sm:$0xff] }
  0x3a   :  { %v3720_v14 = vld [vmem:[#allocation6 + $0x320] sm:$0xf]  ;;  %v4988_v15 = vld [vmem:[#allocation6 + $0x32c] sm:$0xf0]  ;;  %v3593_v20 = vor.u32 %v4956_v13, %v3592_v12  ;;  %2328 = vmatpush.bf16.msra.mxu0 %v3337_v16 }
  0x3b   :  { %v3320_v17 = vld [vmem:[#allocation6] sm:$0xf]  ;;  %v4888_v18 = vld [vmem:[#allocation6 + $0xc] sm:$0xf0]  ;;  %v3721_v24 = vor.u32 %v4988_v15, %v3720_v14  ;;  %2341 = vmatpush.bf16.msra.mxu1 %v3465_v19 }
  0x3c   :  { %v3448_v21 = vld [vmem:[#allocation6 + $0x100] sm:$0xf]  ;;  %v4920_v22 = vld [vmem:[#allocation6 + $0x10c] sm:$0xf0]  ;;  %v3321_v31 = vor.u32 %v4888_v18, %v3320_v17  ;;  %2354 = vmatpush.bf16.msra.mxu2 %v3593_v20 }
  0x3d   :  { %v3576_v23 = vld [vmem:[#allocation6 + $0x200] sm:$0xf]  ;;  %v4952_v25 = vld [vmem:[#allocation6 + $0x20c] sm:$0xf0]  ;;  %v3449_v35 = vor.u32 %v4920_v22, %v3448_v21  ;;  %2367 = vmatpush.bf16.msra.mxu3 %v3721_v24 }
  0x3e   :  { %v3704_v26 = vld [vmem:[#allocation6 + $0x300] sm:$0xf]  ;;  %v4984_v27 = vld [vmem:[#allocation6 + $0x30c] sm:$0xf0]  ;;  %v3577_v36 = vor.u32 %v4952_v25, %v3576_v23  ;;  %2329 = vmatpush.bf16.msra.mxu0 %v3321_v31 }
  0x3f   :  { %v3944_v28 = vld [vmem:[#allocation6 + $0x4e0] sm:$0xf]  ;;  %v5044_v29 = vld [vmem:[#allocation6 + $0x4ec] sm:$0xf0]  ;;  %v3705_v39 = vor.u32 %v4984_v27, %v3704_v26  ;;  %2342 = vmatpush.bf16.msra.mxu1 %v3449_v35 }
  0x40   :  { %v4072_v30 = vld [vmem:[#allocation6 + $0x5e0] sm:$0xf]  ;;  %v5076_v32 = vld [vmem:[#allocation6 + $0x5ec] sm:$0xf0]  ;;  %v3945_v40 = vor.u32 %v5044_v29, %v3944_v28  ;;  %2355 = vmatpush.bf16.msra.mxu2 %v3577_v36 }
  0x41   :  { %v4200_v33 = vld [vmem:[#allocation6 + $0x6e0] sm:$0xf]  ;;  %v5108_v34 = vld [vmem:[#allocation6 + $0x6ec] sm:$0xf0]  ;;  %v4073_v41 = vor.u32 %v5076_v32, %v4072_v30  ;;  %2368 = vmatpush.bf16.msra.mxu3 %v3705_v39  ;;  %v135_v39 = vld [vmem:[#allocation3 + $0x30] sm:$0xff] }
  0x42   :  { %v4328_v37 = vld [vmem:[#allocation6 + $0x7e0] sm:$0xf]  ;;  %v5140_v38 = vld [vmem:[#allocation6 + $0x7ec] sm:$0xf0]  ;;  %v4201_v42 = vor.u32 %v5108_v34, %v4200_v33  ;;  %2374 = vmatpush.bf16.msrb.mxu0 %v3945_v40 }
  0x43   :  { %v3928_v43 = vld [vmem:[#allocation6 + $0x4c0] sm:$0xf]  ;;  %v5040_v44 = vld [vmem:[#allocation6 + $0x4cc] sm:$0xf0]  ;;  %v4329_v46 = vor.u32 %v5140_v38, %v4328_v37  ;;  %2387 = vmatpush.bf16.msrb.mxu1 %v4073_v41 }
  0x44   :  { %v4056_v45 = vld [vmem:[#allocation6 + $0x5c0] sm:$0xf]  ;;  %v5072_v47 = vld [vmem:[#allocation6 + $0x5cc] sm:$0xf0]  ;;  %v3929_v52 = vor.u32 %v5040_v44, %v3928_v43  ;;  %2400 = vmatpush.bf16.msrb.mxu2 %v4201_v42 }
  0x45   :  { %v4184_v48 = vld [vmem:[#allocation6 + $0x6c0] sm:$0xf]  ;;  %v5104_v49 = vld [vmem:[#allocation6 + $0x6cc] sm:$0xf0]  ;;  %v4057_v54 = vor.u32 %v5072_v47, %v4056_v45  ;;  %2413 = vmatpush.bf16.msrb.mxu3 %v4329_v46 }
  0x46   :  { %v4312_v50 = vld [vmem:[#allocation6 + $0x7c0] sm:$0xf]  ;;  %v5136_v51 = vld [vmem:[#allocation6 + $0x7cc] sm:$0xf0]  ;;  %v4185_v55 = vor.u32 %v5104_v49, %v4184_v48  ;;  %2375 = vmatpush.bf16.msrb.mxu0 %v3929_v52 }
  0x47   :  { %v3912_v53 = vld [vmem:[#allocation6 + $0x4a0] sm:$0xf]  ;;  %v5036_v56 = vld [vmem:[#allocation6 + $0x4ac] sm:$0xf0]  ;;  %v4313_v59 = vor.u32 %v5136_v51, %v4312_v50  ;;  %2388 = vmatpush.bf16.msrb.mxu1 %v4057_v54 }
  0x48   :  { %v4040_v57 = vld [vmem:[#allocation6 + $0x5a0] sm:$0xf]  ;;  %v5068_v58 = vld [vmem:[#allocation6 + $0x5ac] sm:$0xf0]  ;;  %v3913_v2 = vor.u32 %v5036_v56, %v3912_v53  ;;  %2401 = vmatpush.bf16.msrb.mxu2 %v4185_v55 }
  0x49   :  { %v4168_v60 = vld [vmem:[#allocation6 + $0x6a0] sm:$0xf]  ;;  %v5100_v61 = vld [vmem:[#allocation6 + $0x6ac] sm:$0xf0]  ;;  %v4041_v6 = vor.u32 %v5068_v58, %v4040_v57  ;;  %2414 = vmatpush.bf16.msrb.mxu3 %v4313_v59 }
  0x4a   :  { %v4296_v62 = vld [vmem:[#allocation6 + $0x7a0] sm:$0xf]  ;;  %v5132_v63 = vld [vmem:[#allocation6 + $0x7ac] sm:$0xf0]  ;;  %v4169_v7 = vor.u32 %v5100_v61, %v4168_v60  ;;  %2376 = vmatpush.bf16.msrb.mxu0 %v3913_v2 }
  0x4b   :  { %v3896_v0 = vld [vmem:[#allocation6 + $0x480] sm:$0xf]  ;;  %v5032_v1 = vld [vmem:[#allocation6 + $0x48c] sm:$0xf0]  ;;  %v4297_v12 = vor.u32 %v5132_v63, %v4296_v62  ;;  %2389 = vmatpush.bf16.msrb.mxu1 %v4041_v6  ;;  %v133_v63 = vld [vmem:[#allocation3 + $0x20] sm:$0xff] }
  0x4c   :  { %v4024_v3 = vld [vmem:[#allocation6 + $0x580] sm:$0xf]  ;;  %v5064_v8 = vld [vmem:[#allocation6 + $0x58c] sm:$0xf0]  ;;  %v3897_v20 = vor.u32 %v5032_v1, %v3896_v0  ;;  %2402 = vmatpush.bf16.msrb.mxu2 %v4169_v7 }
  0x4d   :  { %v132_v5 = vld [vmem:[#allocation3 + $0x18] sm:$0xff]  ;;  %v130_v11 = vld [vmem:[#allocation3 + $0x8] sm:$0xff]  ;;  %v4025_v21 = vor.u32 %v5064_v8, %v4024_v3  ;;  %2415 = vmatpush.bf16.msrb.mxu3 %v4297_v12 }
  0x4e   :  { %v141_v9 = vpack.c.bf16 %v132_v5, %v131_v4  ;;  %v4152_v13 = vld [vmem:[#allocation6 + $0x680] sm:$0xf]  ;;  %v5096_v14 = vld [vmem:[#allocation6 + $0x68c] sm:$0xf0]  ;;  %v140_v15 = vpack.c.bf16 %v130_v11, %v129_v10  ;;  %2377 = vmatpush.bf16.msrb.mxu0 %v3897_v20 }
  0x4f   :  { %v4280_v16 = vld [vmem:[#allocation6 + $0x780] sm:$0xf]  ;;  %v5128_v17 = vld [vmem:[#allocation6 + $0x78c] sm:$0xf0]  ;;  %v4153_v24 = vor.u32 %v5096_v14, %v4152_v13  ;;  %2390 = vmatpush.bf16.msrb.mxu1 %v4025_v21 }
  0x50   :  { %v531_v18 = vunpack.c.l.b16 %v141_v9  ;;  %v532_v19 = vunpack.c.h.b16 %v141_v9  ;;  %v529_v22 = vunpack.c.l.b16 %v140_v15  ;;  %v530_v23 = vunpack.c.h.b16 %v140_v15  ;;  %v3880_v25 = vld [vmem:[#allocation6 + $0x460] sm:$0xf]  ;;  %v5028_v26 = vld [vmem:[#allocation6 + $0x46c] sm:$0xf0] }
  0x51   :  { %v4008_v27 = vld [vmem:[#allocation6 + $0x560] sm:$0xf]  ;;  %v4281_v30 = vor.u32 %v5128_v17, %v4280_v16  ;;  %v5060_v31 = vld [vmem:[#allocation6 + $0x56c] sm:$0xf0]  ;;  %v3881_v38 = vor.u32 %v5028_v26, %v3880_v25  ;;  %2403 = vmatpush.bf16.msrb.mxu2 %v4153_v24  ;;  %v4914_v26 = vld [vmem:[#allocation6 + $0xe4] sm:$0xf] }
  0x52   :  { %v5570_v28 = vpack.c.b16 %v531_v18, %v531_v18  ;;  %v5572_v29 = vpack.c.b16 %v532_v19, %v532_v19  ;;  %v4136_v32 = vld [vmem:[#allocation6 + $0x660] sm:$0xf]  ;;  %v5092_v33 = vld [vmem:[#allocation6 + $0x66c] sm:$0xf0]  ;;  %v5574_v34 = vpack.c.b16 %v529_v22, %v529_v22  ;;  %v5576_v35 = vpack.c.b16 %v530_v23, %v530_v23 }
  0x53   :  { %v4264_v36 = vld [vmem:[#allocation6 + $0x760] sm:$0xf]  ;;  %v5124_v37 = vld [vmem:[#allocation6 + $0x76c] sm:$0xf0]  ;;  %v4009_v41 = vor.u32 %v5060_v31, %v4008_v27  ;;  %v4137_v42 = vor.u32 %v5092_v33, %v4136_v32  ;;  %2416 = vmatpush.bf16.msrb.mxu3 %v4281_v30  ;;  %2378 = vmatpush.bf16.msrb.mxu0 %v3881_v38  ;;  %v3434_v27 = vld [vmem:[#allocation6 + $0xf0] sm:$0xf0] }
  0x54   :  { %2356 = vmatmul.bf16.vlgmr.msra.gmra.mxu2 %v5570_v28  ;;  %2369 = vmatmul.bf16.vlgmr.msra.gmra.mxu3 %v5572_v29  ;;  %v136_v40 = vld [vmem:[#allocation3 + $0x38] sm:$0xff]  ;;  %v5024_v44 = vld [vmem:[#allocation6 + $0x44c] sm:$0xf0]  ;;  %v4265_v46 = vor.u32 %v5124_v37, %v4264_v36 }
  0x55   :  { %2343 = vmatmul.bf16.vlgmr.msra.gmra.mxu1 %v5576_v35  ;;  %v3864_v43 = vld [vmem:[#allocation6 + $0x440] sm:$0xf]  ;;  %v5056_v47 = vld [vmem:[#allocation6 + $0x54c] sm:$0xf0]  ;;  %2330 = vmatmul.bf16.vlgmr.msra.gmra.mxu0 %v5574_v34  ;;  %v5582_v52 = vpack.c.bf16 %v136_v40, %v135_v39 }
  0x56   :  { %v3992_v45 = vld [vmem:[#allocation6 + $0x540] sm:$0xf]  ;;  %v5088_v49 = vld [vmem:[#allocation6 + $0x64c] sm:$0xf0]  ;;  %v3865_v53 = vor.u32 %v5024_v44, %v3864_v43  ;;  %2391 = vmatpush.bf16.msrb.mxu1 %v4009_v41  ;;  %2404 = vmatpush.bf16.msrb.mxu2 %v4137_v42  ;;  %v3437_v42 = vor.u32 %v4914_v26, %v3434_v27 }
  0x57   :  { %v4120_v48 = vld [vmem:[#allocation6 + $0x640] sm:$0xf]  ;;  %v5120_v51 = vld [vmem:[#allocation6 + $0x74c] sm:$0xf0]  ;;  %v3993_v56 = vor.u32 %v5056_v47, %v3992_v45  ;;  %2417 = vmatpush.bf16.msrb.mxu3 %v4265_v46  ;;  %v535_v23 = vunpack.c.l.b16 %v5582_v52  ;;  %v536_v31 = vunpack.c.h.b16 %v5582_v52  ;;  %v4910_v47 = vld [vmem:[#allocation6 + $0xc4] sm:$0xf] }
  0x58   :  { %v4248_v50 = vld [vmem:[#allocation6 + $0x740] sm:$0xf]  ;;  %v5020_v55 = vld [vmem:[#allocation6 + $0x42c] sm:$0xf0]  ;;  %v4121_v57 = vor.u32 %v5088_v49, %v4120_v48  ;;  %2379 = vmatpush.bf16.msrb.mxu0 %v3865_v53  ;;  %v3418_v48 = vld [vmem:[#allocation6 + $0xd0] sm:$0xf0] }
  0x59   :  { %v3848_v54 = vld [vmem:[#allocation6 + $0x420] sm:$0xf]  ;;  %v5052_v59 = vld [vmem:[#allocation6 + $0x52c] sm:$0xf0]  ;;  %v4249_v60 = vor.u32 %v5120_v51, %v4248_v50  ;;  %v5586_v46 = vpack.c.b16 %v535_v23, %v535_v23  ;;  %v5590_v50 = vpack.c.b16 %v536_v31, %v536_v31  ;;  %v139_v53 = vld [vmem:[#allocation3 + $0x50] sm:$0xff] }
  0x5a   :  { %v3976_v58 = vld [vmem:[#allocation6 + $0x520] sm:$0xf]  ;;  %v5084_v62 = vld [vmem:[#allocation6 + $0x62c] sm:$0xf0]  ;;  %v3849_v3 = vor.u32 %v5020_v55, %v3848_v54  ;;  %2392 = vmatpush.bf16.msrb.mxu1 %v3993_v56  ;;  %2405 = vmatpush.bf16.msrb.mxu2 %v4121_v57  ;;  %v3370_v31 = vld [vmem:[#allocation6 + $0x70] sm:$0xf0] }
  0x5b   :  { %v4104_v61 = vld [vmem:[#allocation6 + $0x620] sm:$0xf]  ;;  %v5116_v1 = vld [vmem:[#allocation6 + $0x72c] sm:$0xf0]  ;;  %v3977_v7 = vor.u32 %v5052_v59, %v3976_v58  ;;  %2418 = vmatpush.bf16.msrb.mxu3 %v4249_v60  ;;  %v3421_v59 = vor.u32 %v4910_v47, %v3418_v48 }
  0x5c   :  { %v4232_v0 = vld [vmem:[#allocation6 + $0x720] sm:$0xf]  ;;  %v5016_v4 = vld [vmem:[#allocation6 + $0x40c] sm:$0xf0]  ;;  %v4105_v8 = vor.u32 %v5084_v62, %v4104_v61  ;;  %2380 = vmatpush.bf16.msrb.mxu0 %v3849_v3 }
  0x5d   :  { %v3832_v2 = vld [vmem:[#allocation6 + $0x400] sm:$0xf]  ;;  %v134_v6 = vld [vmem:[#allocation3 + $0x28] sm:$0xff]  ;;  %v4233_v13 = vor.u32 %v5116_v1, %v4232_v0  ;;  %v145_v1 = vpack.c.bf16 %v139_v53, %v139_v53 }
  0x5e   :  { %v3960_v5 = vld [vmem:[#allocation6 + $0x500] sm:$0xf]  ;;  %v5048_v9 = vld [vmem:[#allocation6 + $0x50c] sm:$0xf0]  ;;  %v142_v12 = vpack.c.bf16 %v134_v6, %v133_v63  ;;  %v3833_v19 = vor.u32 %v5016_v4, %v3832_v2  ;;  %2393 = vmatpush.bf16.msrb.mxu1 %v3977_v7  ;;  %2406 = vmatpush.bf16.msrb.mxu2 %v4105_v8  ;;  %v4906_v63 = vld [vmem:[#allocation6 + $0xa4] sm:$0xf] }
  0x5f   :  { %v4088_v10 = vld [vmem:[#allocation6 + $0x600] sm:$0xf]  ;;  %v5080_v11 = vld [vmem:[#allocation6 + $0x60c] sm:$0xf0]  ;;  %v3961_v24 = vor.u32 %v5048_v9, %v3960_v5  ;;  %2419 = vmatpush.bf16.msrb.mxu3 %v4233_v13  ;;  %v3402_v0 = vld [vmem:[#allocation6 + $0xb0] sm:$0xf0] }
  0x60   :  { %v4216_v14 = vld [vmem:[#allocation6 + $0x700] sm:$0xf]  ;;  %v5112_v15 = vld [vmem:[#allocation6 + $0x70c] sm:$0xf0]  ;;  %v4089_v25 = vor.u32 %v5080_v11, %v4088_v10  ;;  %v533_v30 = vunpack.c.l.b16 %v142_v12  ;;  %v534_v36 = vunpack.c.h.b16 %v142_v12  ;;  %2381 = vmatpush.bf16.msrb.mxu0 %v3833_v19  ;;  %v3405_v10 = vor.u32 %v4906_v63, %v3402_v0  ;;  %v4902_v12 = vld [vmem:[#allocation6 + $0x84] sm:$0xf] }
  0x61   :  { %v4456_v16 = vld [vmem:[#allocation6 + $0x8e0] sm:$0xf]  ;;  %v5172_v17 = vld [vmem:[#allocation6 + $0x8ec] sm:$0xf0]  ;;  %v4217_v32 = vor.u32 %v5112_v15, %v4216_v14  ;;  %v137_v13 = vld [vmem:[#allocation3 + $0x40] sm:$0xff]  ;;  %v5507_v19 = vmov 0  }
  0x62   :  { %v4584_v18 = vld [vmem:[#allocation6 + $0x9e0] sm:$0xf]  ;;  %v5204_v20 = vld [vmem:[#allocation6 + $0x9ec] sm:$0xf0]  ;;  %v4457_v33 = vor.u32 %v5172_v17, %v4456_v16  ;;  %2394 = vmatpush.bf16.msrb.mxu1 %v3961_v24  ;;  %2407 = vmatpush.bf16.msrb.mxu2 %v4089_v25  ;;  %v5588_v49 = vpack.c.b16 %v533_v30, %v533_v30  ;;  %v5592_v52 = vpack.c.b16 %v534_v36, %v534_v36  ;;  %v3386_v14 = vld [vmem:[#allocation6 + $0x90] sm:$0xf0] }
  0x63   :  { %v4712_v21 = vld [vmem:[#allocation6 + $0xae0] sm:$0xf]  ;;  %v5236_v22 = vld [vmem:[#allocation6 + $0xaec] sm:$0xf0]  ;;  %v4585_v37 = vor.u32 %v5204_v20, %v4584_v18  ;;  %2420 = vmatpush.bf16.msrb.mxu3 %v4217_v32  ;;  %152 = vst.msk [vmem:[#allocation2 + $0x28] sm:$0xf] %vm151_vm0, %v145_v1  ;;  %v3389_v25 = vor.u32 %v4902_v12, %v3386_v14 }
  0x64   :  { %v4713_v38 = vor.u32 %v5236_v22, %v4712_v21  ;;  %v4440_v39 = vld [vmem:[#allocation6 + $0x8c0] sm:$0xf]  ;;  %v5168_v40 = vld [vmem:[#allocation6 + $0x8cc] sm:$0xf0]  ;;  %2426 = vmatpush.bf16.msra.mxu0 %v4457_v33  ;;  %154 = vst.msk [vmem:[#allocation2 + $0x28] sm:$0xf] %vm153_vm1, %v5507_v19 }
  0x65   :  { %v4568_v41 = vld [vmem:[#allocation6 + $0x9c0] sm:$0xf]  ;;  %v5200_v43 = vld [vmem:[#allocation6 + $0x9cc] sm:$0xf0]  ;;  %v4441_v51 = vor.u32 %v5168_v40, %v4440_v39  ;;  %2408 = vmatmul.bf16.vlgmr.msrb.gmra.mxu2 %v5586_v46  ;;  %2382 = vmatmul.bf16.vlgmr.msrb.gmra.mxu0 %v5588_v49  ;;  %v4898_v30 = vld [vmem:[#allocation6 + $0x64] sm:$0xf] }
  0x66   :  { %v4696_v44 = vld [vmem:[#allocation6 + $0xac0] sm:$0xf]  ;;  %v5232_v45 = vld [vmem:[#allocation6 + $0xacc] sm:$0xf0]  ;;  %2439 = vmatpush.bf16.msra.mxu1 %v4585_v37  ;;  %2452 = vmatpush.bf16.msra.mxu2 %v4713_v38  ;;  %v4569_v54 = vor.u32 %v5200_v43, %v4568_v41  ;;  %v3373_v40 = vor.u32 %v4898_v30, %v3370_v31  ;;  %v3562_v12 = vld [vmem:[#allocation6 + $0x1f0] sm:$0xf0] }
  0x67   :  { %v4697_v55 = vor.u32 %v5232_v45, %v4696_v44  ;;  %v4424_v56 = vld [vmem:[#allocation6 + $0x8a0] sm:$0xf]  ;;  %v5164_v57 = vld [vmem:[#allocation6 + $0x8ac] sm:$0xf0]  ;;  %2465 = vmatpush.bf16.msra.mxu3 %v3437_v42  ;;  %2395 = vmatmul.bf16.vlgmr.msrb.gmra.mxu1 %v5592_v52  ;;  %v4894_v44 = vld [vmem:[#allocation6 + $0x44] sm:$0xf] }
  0x68   :  { %v4552_v58 = vld [vmem:[#allocation6 + $0x9a0] sm:$0xf]  ;;  %v5196_v60 = vld [vmem:[#allocation6 + $0x9ac] sm:$0xf0]  ;;  %2421 = vmatmul.bf16.vlgmr.msrb.gmra.mxu3 %v5590_v50  ;;  %2427 = vmatpush.bf16.msra.mxu0 %v4441_v51  ;;  %v4425_v2 = vor.u32 %v5164_v57, %v4424_v56  ;;  %v3354_v45 = vld [vmem:[#allocation6 + $0x50] sm:$0xf0] }
  0x69   :  { %v4680_v61 = vld [vmem:[#allocation6 + $0xaa0] sm:$0xf]  ;;  %v5228_v62 = vld [vmem:[#allocation6 + $0xaac] sm:$0xf0]  ;;  %v4553_v5 = vor.u32 %v5196_v60, %v4552_v58  ;;  %v3357_v56 = vor.u32 %v4894_v44, %v3354_v45  ;;  %v4890_v60 = vld [vmem:[#allocation6 + $0x24] sm:$0xf] }
  0x6a   :  { %v4408_v3 = vld [vmem:[#allocation6 + $0x880] sm:$0xf]  ;;  %v5160_v4 = vld [vmem:[#allocation6 + $0x88c] sm:$0xf0]  ;;  %2440 = vmatpush.bf16.msra.mxu1 %v4569_v54  ;;  %2453 = vmatpush.bf16.msra.mxu2 %v4697_v55  ;;  %v4681_v6 = vor.u32 %v5228_v62, %v4680_v61  ;;  %v3338_v61 = vld [vmem:[#allocation6 + $0x30] sm:$0xf0] }
  0x6b   :  { %v4536_v7 = vld [vmem:[#allocation6 + $0x980] sm:$0xf]  ;;  %v5192_v8 = vld [vmem:[#allocation6 + $0x98c] sm:$0xf0]  ;;  %2466 = vmatpush.bf16.msra.mxu3 %v3421_v59  ;;  %v4409_v16 = vor.u32 %v5160_v4, %v4408_v3  ;;  %v3930_v44 = vld [vmem:[#allocation6 + $0x4d0] sm:$0xf0] }
  0x6c   :  { %v4664_v9 = vld [vmem:[#allocation6 + $0xa80] sm:$0xf]  ;;  %v5224_v11 = vld [vmem:[#allocation6 + $0xa8c] sm:$0xf0]  ;;  %2428 = vmatpush.bf16.msra.mxu0 %v4425_v2  ;;  %v4537_v20 = vor.u32 %v5192_v8, %v4536_v7  ;;  %v3341_v7 = vor.u32 %v4890_v60, %v3338_v61  ;;  %v4886_v8 = vld [vmem:[#allocation6 + $0x4] sm:$0xf] }
  0x6d   :  { %v138_v15 = vld [vmem:[#allocation3 + $0x48] sm:$0xff]  ;;  %v4392_v17 = vld [vmem:[#allocation6 + $0x860] sm:$0xf]  ;;  %v4665_v21 = vor.u32 %v5224_v11, %v4664_v9  ;;  %v4946_v11 = vld [vmem:[#allocation6 + $0x1e4] sm:$0xf] }
  0x6e   :  { %v5599_v18 = vpack.c.bf16 %v138_v15, %v137_v13  ;;  %2441 = vmatpush.bf16.msra.mxu1 %v4553_v5  ;;  %2454 = vmatpush.bf16.msra.mxu2 %v4681_v6  ;;  %v5156_v22 = vld [vmem:[#allocation6 + $0x86c] sm:$0xf0]  ;;  %v4520_v23 = vld [vmem:[#allocation6 + $0x960] sm:$0xf]  ;;  %v3322_v9 = vld [vmem:[#allocation6 + $0x10] sm:$0xf0] }
  0x6f   :  { %v5188_v24 = vld [vmem:[#allocation6 + $0x96c] sm:$0xf0]  ;;  %2467 = vmatpush.bf16.msra.mxu3 %v3405_v10  ;;  %v4648_v26 = vld [vmem:[#allocation6 + $0xa60] sm:$0xf]  ;;  %v4393_v32 = vor.u32 %v5156_v22, %v4392_v17  ;;  %v160_v10 = vld [vmem:[#allocation2 + $0x28] sm:$0xf] }
  0x70   :  { %v5220_v27 = vld [vmem:[#allocation6 + $0xa6c] sm:$0xf0]  ;;  %2429 = vmatpush.bf16.msra.mxu0 %v4409_v16  ;;  %v4521_v33 = vor.u32 %v5188_v24, %v4520_v23  ;;  %v4376_v37 = vld [vmem:[#allocation6 + $0x840] sm:$0xf]  ;;  %v4978_v13 = vld [vmem:[#allocation6 + $0x2e4] sm:$0xf]  ;;  %v537_v19 = vunpack.c.l.b16 %v5599_v18  ;;  %v539_v24 = vunpack.c.l.b16 %v160_v10 }
  0x71   :  { %v4649_v36 = vor.u32 %v5220_v27, %v4648_v26  ;;  %v5152_v38 = vld [vmem:[#allocation6 + $0x84c] sm:$0xf0]  ;;  %v4504_v39 = vld [vmem:[#allocation6 + $0x940] sm:$0xf]  ;;  %v3690_v15 = vld [vmem:[#allocation6 + $0x2f0] sm:$0xf0]  ;;  %v3325_v26 = vor.u32 %v4886_v8, %v3322_v9  ;;  %v3565_v27 = vor.u32 %v4946_v11, %v3562_v12 }
  0x72   :  { %2442 = vmatpush.bf16.msra.mxu1 %v4537_v20  ;;  %2455 = vmatpush.bf16.msra.mxu2 %v4665_v21  ;;  %v5184_v41 = vld [vmem:[#allocation6 + $0x94c] sm:$0xf0]  ;;  %v4632_v42 = vld [vmem:[#allocation6 + $0xa40] sm:$0xf]  ;;  %v4377_v47 = vor.u32 %v5152_v38, %v4376_v37  ;;  %v5010_v16 = vld [vmem:[#allocation6 + $0x3e4] sm:$0xf]  ;;  %v3693_v30 = vor.u32 %v4978_v13, %v3690_v15  ;;  %v5603_v38 = vpack.c.b16 %v537_v19, %v537_v19 }
  0x73   :  { %2468 = vmatpush.bf16.msra.mxu3 %v3389_v25  ;;  %v5216_v43 = vld [vmem:[#allocation6 + $0xa4c] sm:$0xf0]  ;;  %v4505_v48 = vor.u32 %v5184_v41, %v4504_v39  ;;  %v4360_v53 = vld [vmem:[#allocation6 + $0x820] sm:$0xf]  ;;  %v3818_v17 = vld [vmem:[#allocation6 + $0x3f0] sm:$0xf0]  ;;  %v538_v25 = vunpack.c.h.b16 %v5599_v18 }
  0x74   :  { %2430 = vmatpush.bf16.msra.mxu0 %v4393_v32  ;;  %v4633_v51 = vor.u32 %v5216_v43, %v4632_v42  ;;  %v5148_v54 = vld [vmem:[#allocation6 + $0x82c] sm:$0xf0]  ;;  %v4488_v55 = vld [vmem:[#allocation6 + $0x920] sm:$0xf]  ;;  %v5042_v22 = vld [vmem:[#allocation6 + $0x4e4] sm:$0xf]  ;;  %v3821_v31 = vor.u32 %v5010_v16, %v3818_v17  ;;  %v5605_v42 = vpack.c.b16 %v539_v24, %v539_v24 }
  0x75   :  { %v5180_v57 = vld [vmem:[#allocation6 + $0x92c] sm:$0xf0]  ;;  %v4616_v58 = vld [vmem:[#allocation6 + $0xa20] sm:$0xf]  ;;  %v4361_v62 = vor.u32 %v5148_v54, %v4360_v53  ;;  %v3946_v23 = vld [vmem:[#allocation6 + $0x4f0] sm:$0xf0]  ;;  %v5607_v18 = vpack.c.b16 %v538_v25, %v538_v25 }
  0x76   :  { %2443 = vmatpush.bf16.msra.mxu1 %v4521_v33  ;;  %2456 = vmatpush.bf16.msra.mxu2 %v4649_v36  ;;  %v5212_v59 = vld [vmem:[#allocation6 + $0xa2c] sm:$0xf0]  ;;  %v4344_v63 = vld [vmem:[#allocation6 + $0x800] sm:$0xf]  ;;  %v4489_v2 = vor.u32 %v5180_v57, %v4488_v55  ;;  %v4942_v32 = vld [vmem:[#allocation6 + $0x1c4] sm:$0xf]  ;;  %v3949_v37 = vor.u32 %v5042_v22, %v3946_v23 }
  0x77   :  { %2469 = vmatpush.bf16.msra.mxu3 %v3373_v40  ;;  %v5144_v0 = vld [vmem:[#allocation6 + $0x80c] sm:$0xf0]  ;;  %v4472_v1 = vld [vmem:[#allocation6 + $0x900] sm:$0xf]  ;;  %v4617_v3 = vor.u32 %v5212_v59, %v4616_v58  ;;  %v3546_v33 = vld [vmem:[#allocation6 + $0x1d0] sm:$0xf0] }
  0x78   :  { %2431 = vmatpush.bf16.msra.mxu0 %v4377_v47  ;;  %v5176_v4 = vld [vmem:[#allocation6 + $0x90c] sm:$0xf0]  ;;  %v4600_v5 = vld [vmem:[#allocation6 + $0xa00] sm:$0xf]  ;;  %v4345_v14 = vor.u32 %v5144_v0, %v4344_v63  ;;  %v4974_v36 = vld [vmem:[#allocation6 + $0x2c4] sm:$0xf]  ;;  %v3549_v45 = vor.u32 %v4942_v32, %v3546_v33 }
  0x79   :  { %v5208_v6 = vld [vmem:[#allocation6 + $0xa0c] sm:$0xf0]  ;;  %v4473_v20 = vor.u32 %v5176_v4, %v4472_v1  ;;  %v3674_v39 = vld [vmem:[#allocation6 + $0x2d0] sm:$0xf0]  ;;  %v5006_v40 = vld [vmem:[#allocation6 + $0x3c4] sm:$0xf] }
  0x7a   :  { %2444 = vmatpush.bf16.msra.mxu1 %v4505_v48  ;;  %2457 = vmatpush.bf16.msra.mxu2 %v4633_v51  ;;  %v4601_v21 = vor.u32 %v5208_v6, %v4600_v5  ;;  %v3802_v41 = vld [vmem:[#allocation6 + $0x3d0] sm:$0xf0]  ;;  %v5038_v43 = vld [vmem:[#allocation6 + $0x4c4] sm:$0xf]  ;;  %v3677_v47 = vor.u32 %v4974_v36, %v3674_v39 }
  0x7b   :  { %2470 = vmatpush.bf16.msra.mxu3 %v3357_v56  ;;  %v3805_v48 = vor.u32 %v5006_v40, %v3802_v41  ;;  %v4938_v51 = vld [vmem:[#allocation6 + $0x1a4] sm:$0xf]  ;;  %v3530_v53 = vld [vmem:[#allocation6 + $0x1b0] sm:$0xf0]  ;;  %v3933_v55 = vor.u32 %v5038_v43, %v3930_v44 }
  0x7c   :  { %2432 = vmatpush.bf16.msra.mxu0 %v4361_v62  ;;  %v4970_v54 = vld [vmem:[#allocation6 + $0x2a4] sm:$0xf]  ;;  %v3658_v56 = vld [vmem:[#allocation6 + $0x2b0] sm:$0xf0]  ;;  %v3533_v61 = vor.u32 %v4938_v51, %v3530_v53 }
  0x7d   :  { %v5002_v57 = vld [vmem:[#allocation6 + $0x3a4] sm:$0xf]  ;;  %v3786_v58 = vld [vmem:[#allocation6 + $0x3b0] sm:$0xf0]  ;;  %v3661_v62 = vor.u32 %v4970_v54, %v3658_v56 }
  0x7e   :  { %2445 = vmatpush.bf16.msra.mxu1 %v4489_v2  ;;  %2458 = vmatpush.bf16.msra.mxu2 %v4617_v3  ;;  %v5034_v59 = vld [vmem:[#allocation6 + $0x4a4] sm:$0xf]  ;;  %v3914_v60 = vld [vmem:[#allocation6 + $0x4b0] sm:$0xf0]  ;;  %v3789_v63 = vor.u32 %v5002_v57, %v3786_v58 }
  0x7f   :  { %2471 = vmatpush.bf16.msra.mxu3 %v3341_v7  ;;  %v4934_v0 = vld [vmem:[#allocation6 + $0x184] sm:$0xf]  ;;  %v3514_v1 = vld [vmem:[#allocation6 + $0x190] sm:$0xf0]  ;;  %v3917_v3 = vor.u32 %v5034_v59, %v3914_v60 }
  0x80   :  { %2433 = vmatpush.bf16.msra.mxu0 %v4345_v14  ;;  %v4966_v2 = vld [vmem:[#allocation6 + $0x284] sm:$0xf]  ;;  %v3642_v4 = vld [vmem:[#allocation6 + $0x290] sm:$0xf0]  ;;  %v3517_v9 = vor.u32 %v4934_v0, %v3514_v1 }
  0x81   :  { %v4998_v5 = vld [vmem:[#allocation6 + $0x384] sm:$0xf]  ;;  %v3770_v6 = vld [vmem:[#allocation6 + $0x390] sm:$0xf0]  ;;  %v3645_v10 = vor.u32 %v4966_v2, %v3642_v4 }
  0x82   :  { %2446 = vmatpush.bf16.msra.mxu1 %v4473_v20  ;;  %2459 = vmatpush.bf16.msra.mxu2 %v4601_v21  ;;  %v5030_v7 = vld [vmem:[#allocation6 + $0x484] sm:$0xf]  ;;  %v3898_v8 = vld [vmem:[#allocation6 + $0x490] sm:$0xf0]  ;;  %v3773_v11 = vor.u32 %v4998_v5, %v3770_v6 }
  0x83   :  { %2472 = vmatpush.bf16.msra.mxu3 %v3325_v26  ;;  %2434 = vmatmul.bf16.vlgmr.msra.gmra.mxu0 %v5603_v38  ;;  %v4930_v12 = vld [vmem:[#allocation6 + $0x164] sm:$0xf]  ;;  %v3498_v13 = vld [vmem:[#allocation6 + $0x170] sm:$0xf0]  ;;  %v3901_v15 = vor.u32 %v5030_v7, %v3898_v8 }
  0x84   :  { %2478 = vmatpush.bf16.msrb.mxu0 %v3565_v27  ;;  %v4962_v14 = vld [vmem:[#allocation6 + $0x264] sm:$0xf]  ;;  %v3626_v16 = vld [vmem:[#allocation6 + $0x270] sm:$0xf0]  ;;  %v3501_v22 = vor.u32 %v4930_v12, %v3498_v13 }
  0x85   :  { %2460 = vmatmul.bf16.vlgmr.msra.gmra.mxu2 %v5605_v42  ;;  %2447 = vmatmul.bf16.vlgmr.msra.gmra.mxu1 %v5607_v18  ;;  %v4994_v17 = vld [vmem:[#allocation6 + $0x364] sm:$0xf]  ;;  %v3754_v19 = vld [vmem:[#allocation6 + $0x370] sm:$0xf0]  ;;  %v3629_v23 = vor.u32 %v4962_v14, %v3626_v16 }
  0x86   :  { %2491 = vmatpush.bf16.msrb.mxu1 %v3693_v30  ;;  %2504 = vmatpush.bf16.msrb.mxu2 %v3821_v31  ;;  %v5026_v20 = vld [vmem:[#allocation6 + $0x464] sm:$0xf]  ;;  %v3882_v21 = vld [vmem:[#allocation6 + $0x470] sm:$0xf0]  ;;  %v3757_v24 = vor.u32 %v4994_v17, %v3754_v19 }
  0x87   :  { %2517 = vmatpush.bf16.msrb.mxu3 %v3949_v37  ;;  %v4926_v25 = vld [vmem:[#allocation6 + $0x144] sm:$0xf]  ;;  %v3482_v26 = vld [vmem:[#allocation6 + $0x150] sm:$0xf0]  ;;  %v3885_v30 = vor.u32 %v5026_v20, %v3882_v21 }
  0x88   :  { %2479 = vmatpush.bf16.msrb.mxu0 %v3549_v45  ;;  %2473 = vmatmul.bf16.vlgmr.msra.gmra.mxu3 %v5574_v34  ;;  %v4958_v27 = vld [vmem:[#allocation6 + $0x244] sm:$0xf]  ;;  %v3610_v31 = vld [vmem:[#allocation6 + $0x250] sm:$0xf0]  ;;  %v3485_v39 = vor.u32 %v4926_v25, %v3482_v26 }
  0x89   :  { %v4990_v32 = vld [vmem:[#allocation6 + $0x344] sm:$0xf]  ;;  %v3738_v33 = vld [vmem:[#allocation6 + $0x350] sm:$0xf0]  ;;  %v3613_v40 = vor.u32 %v4958_v27, %v3610_v31 }
  0x8a   :  { %2492 = vmatpush.bf16.msrb.mxu1 %v3677_v47  ;;  %2505 = vmatpush.bf16.msrb.mxu2 %v3805_v48  ;;  %v5022_v36 = vld [vmem:[#allocation6 + $0x444] sm:$0xf]  ;;  %v3866_v37 = vld [vmem:[#allocation6 + $0x450] sm:$0xf0]  ;;  %v3741_v41 = vor.u32 %v4990_v32, %v3738_v33 }
  0x8b   :  { %2518 = vmatpush.bf16.msrb.mxu3 %v3933_v55  ;;  %v4922_v43 = vld [vmem:[#allocation6 + $0x124] sm:$0xf]  ;;  %v3466_v44 = vld [vmem:[#allocation6 + $0x130] sm:$0xf0]  ;;  %v3869_v47 = vor.u32 %v5022_v36, %v3866_v37 }
  0x8c   :  { %2480 = vmatpush.bf16.msrb.mxu0 %v3533_v61  ;;  %v4954_v45 = vld [vmem:[#allocation6 + $0x224] sm:$0xf]  ;;  %v3594_v48 = vld [vmem:[#allocation6 + $0x230] sm:$0xf0]  ;;  %v3469_v56 = vor.u32 %v4922_v43, %v3466_v44 }
  0x8d   :  { %v4986_v51 = vld [vmem:[#allocation6 + $0x324] sm:$0xf]  ;;  %v3722_v53 = vld [vmem:[#allocation6 + $0x330] sm:$0xf0]  ;;  %v3597_v59 = vor.u32 %v4954_v45, %v3594_v48 }
  0x8e   :  { %2493 = vmatpush.bf16.msrb.mxu1 %v3661_v62  ;;  %2506 = vmatpush.bf16.msrb.mxu2 %v3789_v63  ;;  %v5018_v54 = vld [vmem:[#allocation6 + $0x424] sm:$0xf]  ;;  %v3850_v55 = vld [vmem:[#allocation6 + $0x430] sm:$0xf0]  ;;  %v3725_v60 = vor.u32 %v4986_v51, %v3722_v53 }
  0x8f   :  { %2519 = vmatpush.bf16.msrb.mxu3 %v3917_v3  ;;  %v4918_v57 = vld [vmem:[#allocation6 + $0x104] sm:$0xf]  ;;  %v3450_v58 = vld [vmem:[#allocation6 + $0x110] sm:$0xf0]  ;;  %v3853_v0 = vor.u32 %v5018_v54, %v3850_v55 }
  0x90   :  { %2481 = vmatpush.bf16.msrb.mxu0 %v3517_v9  ;;  %v4950_v61 = vld [vmem:[#allocation6 + $0x204] sm:$0xf]  ;;  %v3578_v62 = vld [vmem:[#allocation6 + $0x210] sm:$0xf0]  ;;  %v3453_v7 = vor.u32 %v4918_v57, %v3450_v58 }
  0x91   :  { %v4982_v63 = vld [vmem:[#allocation6 + $0x304] sm:$0xf]  ;;  %v3706_v1 = vld [vmem:[#allocation6 + $0x310] sm:$0xf0] }
  0x92   :  { %2494 = vmatpush.bf16.msrb.mxu1 %v3645_v10  ;;  %2507 = vmatpush.bf16.msrb.mxu2 %v3773_v11  ;;  %v5014_v2 = vld [vmem:[#allocation6 + $0x404] sm:$0xf]  ;;  %v3834_v3 = vld [vmem:[#allocation6 + $0x410] sm:$0xf0]  ;;  %v3581_v11 = vor.u32 %v4950_v61, %v3578_v62  ;;  %v3709_v12 = vor.u32 %v4982_v63, %v3706_v1 }
  0x93   :  { %2520 = vmatpush.bf16.msrb.mxu3 %v3901_v15  ;;  %v5074_v4 = vld [vmem:[#allocation6 + $0x5e4] sm:$0xf]  ;;  %v4074_v5 = vld [vmem:[#allocation6 + $0x5f0] sm:$0xf0]  ;;  %v3837_v15 = vor.u32 %v5014_v2, %v3834_v3 }
  0x94   :  { %2482 = vmatpush.bf16.msrb.mxu0 %v3501_v22  ;;  %v5106_v6 = vld [vmem:[#allocation6 + $0x6e4] sm:$0xf]  ;;  %v4202_v8 = vld [vmem:[#allocation6 + $0x6f0] sm:$0xf0]  ;;  %v4077_v16 = vor.u32 %v5074_v4, %v4074_v5 }
  0x95   :  { %v5138_v9 = vld [vmem:[#allocation6 + $0x7e4] sm:$0xf]  ;;  %v4330_v10 = vld [vmem:[#allocation6 + $0x7f0] sm:$0xf0]  ;;  %v4205_v17 = vor.u32 %v5106_v6, %v4202_v8 }
  0x96   :  { %2495 = vmatpush.bf16.msrb.mxu1 %v3629_v23  ;;  %2508 = vmatpush.bf16.msrb.mxu2 %v3757_v24  ;;  %v5170_v13 = vld [vmem:[#allocation6 + $0x8e4] sm:$0xf]  ;;  %v4458_v14 = vld [vmem:[#allocation6 + $0x8f0] sm:$0xf0]  ;;  %v4333_v19 = vor.u32 %v5138_v9, %v4330_v10 }
  0x97   :  { %2521 = vmatpush.bf16.msrb.mxu3 %v3885_v30  ;;  %v5070_v20 = vld [vmem:[#allocation6 + $0x5c4] sm:$0xf]  ;;  %v4058_v21 = vld [vmem:[#allocation6 + $0x5d0] sm:$0xf0]  ;;  %v4461_v23 = vor.u32 %v5170_v13, %v4458_v14 }
  0x98   :  { %2483 = vmatpush.bf16.msrb.mxu0 %v3485_v39  ;;  %v5102_v22 = vld [vmem:[#allocation6 + $0x6c4] sm:$0xf]  ;;  %v4186_v24 = vld [vmem:[#allocation6 + $0x6d0] sm:$0xf0]  ;;  %v4061_v31 = vor.u32 %v5070_v20, %v4058_v21 }
  0x99   :  { %v5134_v25 = vld [vmem:[#allocation6 + $0x7c4] sm:$0xf]  ;;  %v4314_v26 = vld [vmem:[#allocation6 + $0x7d0] sm:$0xf0]  ;;  %v4189_v32 = vor.u32 %v5102_v22, %v4186_v24 }
  0x9a   :  { %2496 = vmatpush.bf16.msrb.mxu1 %v3613_v40  ;;  %2509 = vmatpush.bf16.msrb.mxu2 %v3741_v41  ;;  %v5166_v27 = vld [vmem:[#allocation6 + $0x8c4] sm:$0xf]  ;;  %v4442_v30 = vld [vmem:[#allocation6 + $0x8d0] sm:$0xf0]  ;;  %v4317_v33 = vor.u32 %v5134_v25, %v4314_v26 }
  0x9b   :  { %2522 = vmatpush.bf16.msrb.mxu3 %v3869_v47  ;;  %v5066_v36 = vld [vmem:[#allocation6 + $0x5a4] sm:$0xf]  ;;  %v4042_v37 = vld [vmem:[#allocation6 + $0x5b0] sm:$0xf0]  ;;  %v4445_v40 = vor.u32 %v5166_v27, %v4442_v30 }
  0x9c   :  { %2484 = vmatpush.bf16.msrb.mxu0 %v3469_v56  ;;  %v5098_v39 = vld [vmem:[#allocation6 + $0x6a4] sm:$0xf]  ;;  %v4170_v41 = vld [vmem:[#allocation6 + $0x6b0] sm:$0xf0]  ;;  %v4045_v48 = vor.u32 %v5066_v36, %v4042_v37 }
  0x9d   :  { %v5130_v43 = vld [vmem:[#allocation6 + $0x7a4] sm:$0xf]  ;;  %v4298_v44 = vld [vmem:[#allocation6 + $0x7b0] sm:$0xf0]  ;;  %v4173_v51 = vor.u32 %v5098_v39, %v4170_v41 }
  0x9e   :  { %2497 = vmatpush.bf16.msrb.mxu1 %v3597_v59  ;;  %2510 = vmatpush.bf16.msrb.mxu2 %v3725_v60  ;;  %v5162_v45 = vld [vmem:[#allocation6 + $0x8a4] sm:$0xf]  ;;  %v4426_v47 = vld [vmem:[#allocation6 + $0x8b0] sm:$0xf0]  ;;  %v4301_v53 = vor.u32 %v5130_v43, %v4298_v44 }
  0x9f   :  { %2523 = vmatpush.bf16.msrb.mxu3 %v3853_v0  ;;  %v5062_v54 = vld [vmem:[#allocation6 + $0x584] sm:$0xf]  ;;  %v4026_v55 = vld [vmem:[#allocation6 + $0x590] sm:$0xf0]  ;;  %v4429_v57 = vor.u32 %v5162_v45, %v4426_v47 }
  0xa0   :  { %2485 = vmatpush.bf16.msrb.mxu0 %v3453_v7  ;;  %v5094_v56 = vld [vmem:[#allocation6 + $0x684] sm:$0xf]  ;;  %v4154_v58 = vld [vmem:[#allocation6 + $0x690] sm:$0xf0]  ;;  %v4029_v63 = vor.u32 %v5062_v54, %v4026_v55 }
  0xa1   :  { %v5126_v59 = vld [vmem:[#allocation6 + $0x784] sm:$0xf]  ;;  %v4282_v60 = vld [vmem:[#allocation6 + $0x790] sm:$0xf0]  ;;  %v4157_v0 = vor.u32 %v5094_v56, %v4154_v58 }
  0xa2   :  { %2498 = vmatpush.bf16.msrb.mxu1 %v3581_v11  ;;  %2511 = vmatpush.bf16.msrb.mxu2 %v3709_v12  ;;  %v5158_v61 = vld [vmem:[#allocation6 + $0x884] sm:$0xf]  ;;  %v4410_v62 = vld [vmem:[#allocation6 + $0x890] sm:$0xf0]  ;;  %v4285_v1 = vor.u32 %v5126_v59, %v4282_v60 }
  0xa3   :  { %2524 = vmatpush.bf16.msrb.mxu3 %v3837_v15  ;;  %2486 = vmatmul.bf16.vlgmr.msrb.gmra.mxu0 %v5576_v35  ;;  %v5058_v2 = vld [vmem:[#allocation6 + $0x564] sm:$0xf]  ;;  %v4010_v3 = vld [vmem:[#allocation6 + $0x570] sm:$0xf0]  ;;  %v4413_v5 = vor.u32 %v5158_v61, %v4410_v62 }
  0xa4   :  { %2530 = vmatpush.bf16.msra.mxu0 %v4077_v16  ;;  %v5090_v4 = vld [vmem:[#allocation6 + $0x664] sm:$0xf]  ;;  %v4138_v6 = vld [vmem:[#allocation6 + $0x670] sm:$0xf0]  ;;  %v4013_v11 = vor.u32 %v5058_v2, %v4010_v3  ;;  %v3568_v3 = vld [vmem:[#allocation6 + $0x1e8] sm:$0xf] }
  0xa5   :  { %2512 = vmatmul.bf16.vlgmr.msrb.gmra.mxu2 %v5572_v29  ;;  %2499 = vmatmul.bf16.vlgmr.msrb.gmra.mxu1 %v5570_v28  ;;  %v5122_v7 = vld [vmem:[#allocation6 + $0x764] sm:$0xf]  ;;  %v4266_v8 = vld [vmem:[#allocation6 + $0x770] sm:$0xf0]  ;;  %v4141_v12 = vor.u32 %v5090_v4, %v4138_v6  ;;  %v4949_v4 = vld [vmem:[#allocation6 + $0x1f4] sm:$0xf0] }
  0xa6   :  { %2543 = vmatpush.bf16.msra.mxu1 %v4205_v17  ;;  %2556 = vmatpush.bf16.msra.mxu2 %v4333_v19  ;;  %v5154_v9 = vld [vmem:[#allocation6 + $0x864] sm:$0xf]  ;;  %v4394_v10 = vld [vmem:[#allocation6 + $0x870] sm:$0xf0]  ;;  %v4269_v13 = vor.u32 %v5122_v7, %v4266_v8 }
  0xa7   :  { %2569 = vmatpush.bf16.msra.mxu3 %v4461_v23  ;;  %v5054_v14 = vld [vmem:[#allocation6 + $0x544] sm:$0xf]  ;;  %v3994_v15 = vld [vmem:[#allocation6 + $0x550] sm:$0xf0]  ;;  %v4397_v17 = vor.u32 %v5154_v9, %v4394_v10 }
  0xa8   :  { %2525 = vmatmul.bf16.vlgmr.msrb.gmra.mxu3 %v5588_v49  ;;  %2531 = vmatpush.bf16.msra.mxu0 %v4061_v31  ;;  %v5086_v16 = vld [vmem:[#allocation6 + $0x644] sm:$0xf]  ;;  %v4122_v19 = vld [vmem:[#allocation6 + $0x650] sm:$0xf0]  ;;  %v3997_v24 = vor.u32 %v5054_v14, %v3994_v15  ;;  %v3424_v14 = vld [vmem:[#allocation6 + $0xc8] sm:$0xf] }
  0xa9   :  { %v5118_v20 = vld [vmem:[#allocation6 + $0x744] sm:$0xf]  ;;  %v4250_v21 = vld [vmem:[#allocation6 + $0x750] sm:$0xf0]  ;;  %v4125_v25 = vor.u32 %v5086_v16, %v4122_v19  ;;  %v4913_v15 = vld [vmem:[#allocation6 + $0xd4] sm:$0xf0] }
  0xaa   :  { %2544 = vmatpush.bf16.msra.mxu1 %v4189_v32  ;;  %2557 = vmatpush.bf16.msra.mxu2 %v4317_v33  ;;  %v5150_v22 = vld [vmem:[#allocation6 + $0x844] sm:$0xf]  ;;  %v4378_v23 = vld [vmem:[#allocation6 + $0x850] sm:$0xf0]  ;;  %v4253_v26 = vor.u32 %v5118_v20, %v4250_v21  ;;  %v3552_v16 = vld [vmem:[#allocation6 + $0x1c8] sm:$0xf]  ;;  %v3425_v21 = vor.u32 %v4913_v15, %v3424_v14 }
  0xab   :  { %2570 = vmatpush.bf16.msra.mxu3 %v4445_v40  ;;  %v5050_v27 = vld [vmem:[#allocation6 + $0x524] sm:$0xf]  ;;  %v3978_v30 = vld [vmem:[#allocation6 + $0x530] sm:$0xf0]  ;;  %v4381_v32 = vor.u32 %v5150_v22, %v4378_v23 }
  0xac   :  { %2532 = vmatpush.bf16.msra.mxu0 %v4045_v48  ;;  %v5082_v31 = vld [vmem:[#allocation6 + $0x624] sm:$0xf]  ;;  %v4106_v33 = vld [vmem:[#allocation6 + $0x630] sm:$0xf0]  ;;  %v3981_v41 = vor.u32 %v5050_v27, %v3978_v30  ;;  %v3408_v27 = vld [vmem:[#allocation6 + $0xa8] sm:$0xf] }
  0xad   :  { %v5114_v36 = vld [vmem:[#allocation6 + $0x724] sm:$0xf]  ;;  %v4234_v37 = vld [vmem:[#allocation6 + $0x730] sm:$0xf0]  ;;  %v4109_v45 = vor.u32 %v5082_v31, %v4106_v33  ;;  %v4909_v30 = vld [vmem:[#allocation6 + $0xb4] sm:$0xf0] }
  0xae   :  { %2545 = vmatpush.bf16.msra.mxu1 %v4173_v51  ;;  %2558 = vmatpush.bf16.msra.mxu2 %v4301_v53  ;;  %v5146_v39 = vld [vmem:[#allocation6 + $0x824] sm:$0xf]  ;;  %v4362_v40 = vld [vmem:[#allocation6 + $0x830] sm:$0xf0]  ;;  %v4237_v47 = vor.u32 %v5114_v36, %v4234_v37  ;;  %v3536_v31 = vld [vmem:[#allocation6 + $0x1a8] sm:$0xf]  ;;  %v3409_v37 = vor.u32 %v4909_v30, %v3408_v27 }
  0xaf   :  { %2571 = vmatpush.bf16.msra.mxu3 %v4429_v57  ;;  %v5046_v43 = vld [vmem:[#allocation6 + $0x504] sm:$0xf]  ;;  %v3962_v44 = vld [vmem:[#allocation6 + $0x510] sm:$0xf0]  ;;  %v4365_v54 = vor.u32 %v5146_v39, %v4362_v40  ;;  %v3472_v27 = vld [vmem:[#allocation6 + $0x128] sm:$0xf] }
  0xb0   :  { %2533 = vmatpush.bf16.msra.mxu0 %v4029_v63  ;;  %v5078_v48 = vld [vmem:[#allocation6 + $0x604] sm:$0xf]  ;;  %v4090_v51 = vld [vmem:[#allocation6 + $0x610] sm:$0xf0]  ;;  %v3965_v61 = vor.u32 %v5046_v43, %v3962_v44  ;;  %v3440_v63 = vld [vmem:[#allocation6 + $0xe8] sm:$0xf] }
  0xb1   :  { %v5110_v53 = vld [vmem:[#allocation6 + $0x704] sm:$0xf]  ;;  %v4218_v55 = vld [vmem:[#allocation6 + $0x710] sm:$0xf0]  ;;  %v4925_v30 = vld [vmem:[#allocation6 + $0x134] sm:$0xf0] }
  0xb2   :  { %2546 = vmatpush.bf16.msra.mxu1 %v4157_v0  ;;  %2559 = vmatpush.bf16.msra.mxu2 %v4285_v1  ;;  %v5142_v56 = vld [vmem:[#allocation6 + $0x804] sm:$0xf]  ;;  %v4346_v57 = vld [vmem:[#allocation6 + $0x810] sm:$0xf0]  ;;  %v4917_v0 = vld [vmem:[#allocation6 + $0xf4] sm:$0xf0]  ;;  %v4093_v1 = vor.u32 %v5078_v48, %v4090_v51  ;;  %v4221_v2 = vor.u32 %v5110_v53, %v4218_v55 }
  0xb3   :  { %2572 = vmatpush.bf16.msra.mxu3 %v4413_v5  ;;  %v5202_v58 = vld [vmem:[#allocation6 + $0x9e4] sm:$0xf]  ;;  %v4586_v59 = vld [vmem:[#allocation6 + $0x9f0] sm:$0xf0]  ;;  %v4349_v5 = vor.u32 %v5142_v56, %v4346_v57  ;;  %v3441_v8 = vor.u32 %v4917_v0, %v3440_v63  ;;  %v3520_v48 = vld [vmem:[#allocation6 + $0x188] sm:$0xf] }
  0xb4   :  { %2534 = vmatpush.bf16.msra.mxu0 %v4013_v11  ;;  %v5234_v60 = vld [vmem:[#allocation6 + $0xae4] sm:$0xf]  ;;  %v4714_v62 = vld [vmem:[#allocation6 + $0xaf0] sm:$0xf0]  ;;  %v4589_v6 = vor.u32 %v5202_v58, %v4586_v59  ;;  %v4937_v51 = vld [vmem:[#allocation6 + $0x194] sm:$0xf0] }
  0xb5   :  { %v4717_v7 = vor.u32 %v5234_v60, %v4714_v62  ;;  %v5198_v9 = vld [vmem:[#allocation6 + $0x9c4] sm:$0xf]  ;;  %v4570_v10 = vld [vmem:[#allocation6 + $0x9d0] sm:$0xf0]  ;;  %v3521_v59 = vor.u32 %v4937_v51, %v3520_v48  ;;  %v4901_v62 = vld [vmem:[#allocation6 + $0x74] sm:$0xf0] }
  0xb6   :  { %2547 = vmatpush.bf16.msra.mxu1 %v4141_v12  ;;  %2560 = vmatpush.bf16.msra.mxu2 %v4269_v13  ;;  %v5230_v11 = vld [vmem:[#allocation6 + $0xac4] sm:$0xf]  ;;  %v3569_v12 = vor.u32 %v4949_v4, %v3568_v3  ;;  %v4698_v13 = vld [vmem:[#allocation6 + $0xad0] sm:$0xf0]  ;;  %v4573_v19 = vor.u32 %v5198_v9, %v4570_v10  ;;  %v3504_v63 = vld [vmem:[#allocation6 + $0x168] sm:$0xf] }
  0xb7   :  { %2573 = vmatpush.bf16.msra.mxu3 %v4397_v17  ;;  %v4945_v17 = vld [vmem:[#allocation6 + $0x1d4] sm:$0xf0]  ;;  %v4701_v20 = vor.u32 %v5230_v11, %v4698_v13  ;;  %v5194_v22 = vld [vmem:[#allocation6 + $0x9a4] sm:$0xf]  ;;  %v4554_v23 = vld [vmem:[#allocation6 + $0x9b0] sm:$0xf0] }
  0xb8   :  { %2535 = vmatpush.bf16.msra.mxu0 %v3997_v24  ;;  %v5226_v24 = vld [vmem:[#allocation6 + $0xaa4] sm:$0xf]  ;;  %v4557_v33 = vor.u32 %v5194_v22, %v4554_v23  ;;  %v4538_v40 = vld [vmem:[#allocation6 + $0x990] sm:$0xf0]  ;;  %v4933_v0 = vld [vmem:[#allocation6 + $0x174] sm:$0xf0] }
  0xb9   :  { %v5190_v39 = vld [vmem:[#allocation6 + $0x984] sm:$0xf]  ;;  %v4666_v44 = vld [vmem:[#allocation6 + $0xa90] sm:$0xf0]  ;;  %v3360_v10 = vld [vmem:[#allocation6 + $0x48] sm:$0xf] }
  0xba   :  { %2548 = vmatpush.bf16.msra.mxu1 %v4125_v25  ;;  %2561 = vmatpush.bf16.msra.mxu2 %v4253_v26  ;;  %v3553_v25 = vor.u32 %v4945_v17, %v3552_v16  ;;  %v4682_v26 = vld [vmem:[#allocation6 + $0xab0] sm:$0xf0]  ;;  %v4541_v53 = vor.u32 %v5190_v39, %v4538_v40  ;;  %v5186_v56 = vld [vmem:[#allocation6 + $0x964] sm:$0xf]  ;;  %v4897_v11 = vld [vmem:[#allocation6 + $0x54] sm:$0xf0] }
  0xbb   :  { %2574 = vmatpush.bf16.msra.mxu3 %v4381_v32  ;;  %v4941_v32 = vld [vmem:[#allocation6 + $0x1b4] sm:$0xf0]  ;;  %v4685_v36 = vor.u32 %v5226_v24, %v4682_v26  ;;  %v4522_v57 = vld [vmem:[#allocation6 + $0x970] sm:$0xf0]  ;;  %v5218_v58 = vld [vmem:[#allocation6 + $0xa64] sm:$0xf]  ;;  %v3361_v17 = vor.u32 %v4897_v11, %v3360_v10 }
  0xbc   :  { %2536 = vmatpush.bf16.msra.mxu0 %v3981_v41  ;;  %v5222_v41 = vld [vmem:[#allocation6 + $0xa84] sm:$0xf]  ;;  %v3537_v43 = vor.u32 %v4941_v32, %v3536_v31  ;;  %v4650_v60 = vld [vmem:[#allocation6 + $0xa70] sm:$0xf0]  ;;  %v4929_v13 = vld [vmem:[#allocation6 + $0x154] sm:$0xf0] }
  0xbd   :  { %v4653_v3 = vor.u32 %v5218_v58, %v4650_v60  ;;  %v4634_v9 = vld [vmem:[#allocation6 + $0xa50] sm:$0xf0]  ;;  %v4893_v26 = vld [vmem:[#allocation6 + $0x34] sm:$0xf0]  ;;  %v3456_v48 = vld [vmem:[#allocation6 + $0x108] sm:$0xf] }
  0xbe   :  { %2549 = vmatpush.bf16.msra.mxu1 %v4109_v45  ;;  %2562 = vmatpush.bf16.msra.mxu2 %v4237_v47  ;;  %v3392_v45 = vld [vmem:[#allocation6 + $0x88] sm:$0xf]  ;;  %v4905_v47 = vld [vmem:[#allocation6 + $0x94] sm:$0xf0]  ;;  %v4618_v24 = vld [vmem:[#allocation6 + $0xa30] sm:$0xf0] }
  0xbf   :  { %2575 = vmatpush.bf16.msra.mxu3 %v4365_v54  ;;  %v4669_v54 = vor.u32 %v5222_v41, %v4666_v44  ;;  %v3393_v55 = vor.u32 %v4905_v47, %v3392_v45  ;;  %v5206_v41 = vld [vmem:[#allocation6 + $0xa04] sm:$0xf]  ;;  %v3328_v44 = vld [vmem:[#allocation6 + $0x8] sm:$0xf]  ;;  %v3473_v45 = vor.u32 %v4925_v30, %v3472_v27  ;;  %v4889_v47 = vld [vmem:[#allocation6 + $0x14] sm:$0xf0] }
  0xc0   :  { %2537 = vmatpush.bf16.msra.mxu0 %v3965_v61  ;;  %v3376_v61 = vld [vmem:[#allocation6 + $0x68] sm:$0xf]  ;;  %v4921_v51 = vld [vmem:[#allocation6 + $0x114] sm:$0xf0] }
  0xc1   :  { %v3377_v4 = vor.u32 %v4901_v62, %v3376_v61  ;;  %v3824_v58 = vld [vmem:[#allocation6 + $0x3e8] sm:$0xf]  ;;  %v5013_v60 = vld [vmem:[#allocation6 + $0x3f4] sm:$0xf0] }
  0xc2   :  { %2550 = vmatpush.bf16.msra.mxu1 %v4093_v1  ;;  %2563 = vmatpush.bf16.msra.mxu2 %v4221_v2  ;;  %v4525_v1 = vor.u32 %v5186_v56, %v4522_v57  ;;  %v5182_v2 = vld [vmem:[#allocation6 + $0x944] sm:$0xf]  ;;  %v3696_v56 = vld [vmem:[#allocation6 + $0x2e8] sm:$0xf]  ;;  %v4981_v57 = vld [vmem:[#allocation6 + $0x2f4] sm:$0xf0] }
  0xc3   :  { %2576 = vmatpush.bf16.msra.mxu3 %v4349_v5  ;;  %2538 = vmatmul.bf16.vlgmr.msra.gmra.mxu0 %v5592_v52  ;;  %v4506_v5 = vld [vmem:[#allocation6 + $0x950] sm:$0xf0]  ;;  %v3952_v61 = vld [vmem:[#allocation6 + $0x4e8] sm:$0xf]  ;;  %v5045_v62 = vld [vmem:[#allocation6 + $0x4f4] sm:$0xf0] }
  0xc4   :  { %2582 = vmatpush.bf16.msrb.mxu0 %v4589_v6  ;;  %v5214_v6 = vld [vmem:[#allocation6 + $0xa44] sm:$0xf]  ;;  %v4509_v14 = vor.u32 %v5182_v2, %v4506_v5  ;;  %v4080_v2 = vld [vmem:[#allocation6 + $0x5e8] sm:$0xf]  ;;  %v3457_v5 = vor.u32 %v4921_v51, %v3456_v48  ;;  %v3953_v10 = vor.u32 %v5045_v62, %v3952_v61  ;;  %v4973_v30 = vld [vmem:[#allocation6 + $0x2b4] sm:$0xf0] }
  0xc5   :  { %2564 = vmatmul.bf16.vlgmr.msra.gmra.mxu2 %v5590_v50  ;;  %2551 = vmatmul.bf16.vlgmr.msra.gmra.mxu1 %v5586_v46  ;;  %v4637_v16 = vor.u32 %v5214_v6, %v4634_v9  ;;  %v3697_v6 = vor.u32 %v4981_v57, %v3696_v56  ;;  %v3825_v9 = vor.u32 %v5013_v60, %v3824_v58  ;;  %v3680_v11 = vld [vmem:[#allocation6 + $0x2c8] sm:$0xf]  ;;  %v5065_v57 = vld [vmem:[#allocation6 + $0x594] sm:$0xf0] }
  0xc6   :  { %2595 = vmatpush.bf16.msrb.mxu1 %v4717_v7  ;;  %2608 = vmatpush.bf16.msrb.mxu2 %v3441_v8  ;;  %v5621_v7 = vld [vmem:[#allocation8] sm:$0xf]  ;;  %v3505_v8 = vor.u32 %v4933_v0, %v3504_v63  ;;  %v3664_v27 = vld [vmem:[#allocation6 + $0x2a8] sm:$0xf] }
  0xc7   :  { %2621 = vmatpush.bf16.msrb.mxu3 %v3569_v12  ;;  %v3488_v12 = vld [vmem:[#allocation6 + $0x148] sm:$0xf]  ;;  %v515_v15 = vperm.slane %v5621_v7, 0 }
  0xc8   :  { %2577 = vmatmul.bf16.vlgmr.msra.gmra.mxu3 %v5603_v38  ;;  %2583 = vmatpush.bf16.msrb.mxu0 %v4573_v19  ;;  %v5178_v19 = vld [vmem:[#allocation6 + $0x924] sm:$0xf]  ;;  %v3489_v23 = vor.u32 %v4929_v13, %v3488_v12  ;;  %v4977_v12 = vld [vmem:[#allocation6 + $0x2d4] sm:$0xf0]  ;;  %v3808_v13 = vld [vmem:[#allocation6 + $0x3c8] sm:$0xf] }
  0xc9   :  { %v3776_v48 = vld [vmem:[#allocation6 + $0x388] sm:$0xf] }
  0xca   :  { %2596 = vmatpush.bf16.msrb.mxu1 %v4701_v20  ;;  %2609 = vmatpush.bf16.msrb.mxu2 %v3425_v21  ;;  %v4490_v20 = vld [vmem:[#allocation6 + $0x930] sm:$0xf0]  ;;  %v5210_v21 = vld [vmem:[#allocation6 + $0xa24] sm:$0xf]  ;;  %v4032_v56 = vld [vmem:[#allocation6 + $0x588] sm:$0xf] }
  0xcb   :  { %2622 = vmatpush.bf16.msrb.mxu3 %v3553_v25  ;;  %v3344_v25 = vld [vmem:[#allocation6 + $0x28] sm:$0xf]  ;;  %v4493_v32 = vor.u32 %v5178_v19, %v4490_v20  ;;  %v4621_v39 = vor.u32 %v5210_v21, %v4618_v24  ;;  %v5041_v19 = vld [vmem:[#allocation6 + $0x4d4] sm:$0xf0] }
  0xcc   :  { %2584 = vmatpush.bf16.msrb.mxu0 %v4557_v33  ;;  %v5174_v33 = vld [vmem:[#allocation6 + $0x904] sm:$0xf]  ;;  %v3345_v40 = vor.u32 %v4893_v26, %v3344_v25  ;;  %v4064_v20 = vld [vmem:[#allocation6 + $0x5c8] sm:$0xf]  ;;  %v5073_v21 = vld [vmem:[#allocation6 + $0x5d4] sm:$0xf0] }
  0xcd   :  { %v3632_v62 = vld [vmem:[#allocation6 + $0x268] sm:$0xf] }
  0xce   :  { %2597 = vmatpush.bf16.msrb.mxu1 %v4685_v36  ;;  %2610 = vmatpush.bf16.msrb.mxu2 %v3409_v37  ;;  %v4474_v36 = vld [vmem:[#allocation6 + $0x910] sm:$0xf0] }
  0xcf   :  { %2623 = vmatpush.bf16.msrb.mxu3 %v3537_v43  ;;  %v4602_v43 = vld [vmem:[#allocation6 + $0xa10] sm:$0xf0] }
  0xd0   :  { %2585 = vmatpush.bf16.msrb.mxu0 %v4541_v53  ;;  %v4605_v0 = vor.u32 %v5206_v41, %v4602_v43  ;;  %v3665_v41 = vor.u32 %v4973_v30, %v3664_v27 }
  0xd2   :  { %2598 = vmatpush.bf16.msrb.mxu1 %v4669_v54  ;;  %2611 = vmatpush.bf16.msrb.mxu2 %v3393_v55  ;;  %v2344_v22 = vpop.f32.mrf.mxu1  ;;  %v2331_v31 = vpop.f32.mrf.mxu0 }
  0xd3   :  { %2624 = vmatpush.bf16.msrb.mxu3 %v3521_v59  ;;  %v2332_v37 = vadd.f32 %v2331_v31, %v515_v15  ;;  %v4477_v59 = vor.u32 %v5174_v33, %v4474_v36  ;;  %v3792_v31 = vld [vmem:[#allocation6 + $0x3a8] sm:$0xf]  ;;  %v5005_v33 = vld [vmem:[#allocation6 + $0x3b4] sm:$0xf0] }
  0xd4   :  { %2586 = vmatpush.bf16.msrb.mxu0 %v4525_v1  ;;  %v3329_v1 = vor.u32 %v4889_v47, %v3328_v44  ;;  %v3920_v36 = vld [vmem:[#allocation6 + $0x4a8] sm:$0xf]  ;;  %v3793_v43 = vor.u32 %v5005_v33, %v3792_v31  ;;  %v4969_v47 = vld [vmem:[#allocation6 + $0x294] sm:$0xf0] }
  0xd5   :  { %v2345_v53 = vadd.f32 %v2344_v22, %v2332_v37  ;;  %v3681_v22 = vor.u32 %v4977_v12, %v3680_v11  ;;  %v5037_v37 = vld [vmem:[#allocation6 + $0x4b4] sm:$0xf0] }
  0xd6   :  { %2599 = vmatpush.bf16.msrb.mxu1 %v4653_v3  ;;  %2612 = vmatpush.bf16.msrb.mxu2 %v3377_v4  ;;  %v5077_v3 = vld [vmem:[#allocation6 + $0x5f4] sm:$0xf0]  ;;  %v3921_v44 = vor.u32 %v5037_v37, %v3920_v36  ;;  %v3600_v36 = vld [vmem:[#allocation6 + $0x228] sm:$0xf] }
  0xd7   :  { %2625 = vmatpush.bf16.msrb.mxu3 %v3505_v8  ;;  %v2357_v54 = vpop.f32.mrf.mxu2  ;;  %v2370_v55 = vpop.f32.mrf.mxu3  ;;  %v4081_v15 = vor.u32 %v5077_v3, %v4080_v2  ;;  %v4033_v3 = vor.u32 %v5065_v57, %v4032_v56  ;;  %v4957_v37 = vld [vmem:[#allocation6 + $0x234] sm:$0xf0]  ;;  %v3712_v57 = vld [vmem:[#allocation6 + $0x308] sm:$0xf] }
  0xd8   :  { %2587 = vmatpush.bf16.msrb.mxu0 %v4509_v14  ;;  %v2358_v63 = vadd.f32 %v2357_v54, %v2345_v53  ;;  %v5001_v53 = vld [vmem:[#allocation6 + $0x394] sm:$0xf0]  ;;  %v3904_v54 = vld [vmem:[#allocation6 + $0x488] sm:$0xf] }
  0xd9   :  { %v3777_v60 = vor.u32 %v5001_v53, %v3776_v48  ;;  %v5053_v48 = vld [vmem:[#allocation6 + $0x534] sm:$0xf0]  ;;  %v3584_v53 = vld [vmem:[#allocation6 + $0x208] sm:$0xf] }
  0xda   :  { %2600 = vmatpush.bf16.msrb.mxu1 %v4637_v16  ;;  %2613 = vmatpush.bf16.msrb.mxu2 %v3361_v17  ;;  %v2346_v4 = vpop.f32.mrf.mxu1  ;;  %v5624_v8 = vadd.f32 %v2370_v55, %v2358_v63  ;;  %v2333_v14 = vpop.f32.mrf.mxu0  ;;  %v5009_v16 = vld [vmem:[#allocation6 + $0x3d4] sm:$0xf0]  ;;  %v3936_v17 = vld [vmem:[#allocation6 + $0x4c8] sm:$0xf] }
  0xdb   :  { %2626 = vmatpush.bf16.msrb.mxu3 %v3489_v23  ;;  %v3809_v25 = vor.u32 %v5009_v16, %v3808_v13  ;;  %v3937_v26 = vor.u32 %v5041_v19, %v3936_v17  ;;  %v5033_v55 = vld [vmem:[#allocation6 + $0x494] sm:$0xf0]  ;;  %v3744_v17 = vld [vmem:[#allocation6 + $0x348] sm:$0xf] }
  0xdc   :  { %2588 = vmatpush.bf16.msrb.mxu0 %v4493_v32  ;;  %v4065_v32 = vor.u32 %v5073_v21, %v4064_v20  ;;  %v3905_v61 = vor.u32 %v5033_v55, %v3904_v54  ;;  %v4965_v63 = vld [vmem:[#allocation6 + $0x274] sm:$0xf0]  ;;  %v3872_v21 = vld [vmem:[#allocation6 + $0x448] sm:$0xf] }
  0xdd   :  { %v4997_v4 = vld [vmem:[#allocation6 + $0x374] sm:$0xf0]  ;;  %v3633_v12 = vor.u32 %v4965_v63, %v3632_v62  ;;  %v3968_v63 = vld [vmem:[#allocation6 + $0x508] sm:$0xf] }
  0xde   :  { %2601 = vmatpush.bf16.msrb.mxu1 %v4621_v39  ;;  %2614 = vmatpush.bf16.msrb.mxu2 %v3345_v40  ;;  %v4048_v39 = vld [vmem:[#allocation6 + $0x5a8] sm:$0xf]  ;;  %v5069_v40 = vld [vmem:[#allocation6 + $0x5b4] sm:$0xf0] }
  0xdf   :  { %2627 = vmatpush.bf16.msrb.mxu3 %v3473_v45  ;;  %v2359_v23 = vpop.f32.mrf.mxu2  ;;  %v2372_v24 = vpop.f32.mrf.mxu3  ;;  %v3648_v45 = vld [vmem:[#allocation6 + $0x288] sm:$0xf]  ;;  %v4049_v51 = vor.u32 %v5069_v40, %v4048_v39  ;;  %v4961_v16 = vld [vmem:[#allocation6 + $0x254] sm:$0xf0] }
  0xe0   :  { %2589 = vmatpush.bf16.msrb.mxu0 %v4477_v59  ;;  %v3649_v58 = vor.u32 %v4969_v47, %v3648_v45  ;;  %v4993_v20 = vld [vmem:[#allocation6 + $0x354] sm:$0xf0]  ;;  %v3728_v39 = vld [vmem:[#allocation6 + $0x328] sm:$0xf] }
  0xe1   :  { %v5021_v45 = vld [vmem:[#allocation6 + $0x434] sm:$0xf0]  ;;  %v3984_v47 = vld [vmem:[#allocation6 + $0x528] sm:$0xf] }
  0xe2   :  { %2602 = vmatpush.bf16.msrb.mxu1 %v4605_v0  ;;  %2615 = vmatpush.bf16.msrb.mxu2 %v3329_v1  ;;  %v2383_v59 = vpop.f32.mrf.mxu0  ;;  %v3760_v0 = vld [vmem:[#allocation6 + $0x368] sm:$0xf]  ;;  %v4953_v54 = vld [vmem:[#allocation6 + $0x214] sm:$0xf0] }
  0xe3   :  { %2628 = vmatpush.bf16.msrb.mxu3 %v3457_v5  ;;  %2590 = vmatmul.bf16.vlgmr.msrb.gmra.mxu0 %v5607_v18  ;;  %v2384_v1 = vadd.f32 %v2383_v59, %v5624_v8  ;;  %v3888_v5 = vld [vmem:[#allocation6 + $0x468] sm:$0xf]  ;;  %v3761_v13 = vor.u32 %v4997_v4, %v3760_v0  ;;  %v5017_v62 = vld [vmem:[#allocation6 + $0x414] sm:$0xf0] }
  0xe4   :  { %2634 = vmatpush.bf16.msra.mxu0 %v3697_v6  ;;  %v2396_v2 = vpop.f32.mrf.mxu1  ;;  %v5029_v6 = vld [vmem:[#allocation6 + $0x474] sm:$0xf0]  ;;  %v3840_v59 = vld [vmem:[#allocation6 + $0x408] sm:$0xf] }
  0xe5   :  { %2603 = vmatmul.bf16.vlgmr.msrb.gmra.mxu1 %v5605_v42  ;;  %2616 = vmatmul.bf16.vlgmr.msrb.gmra.mxu2 %v5574_v34  ;;  %v2397_v11 = vadd.f32 %v2396_v2, %v2384_v1  ;;  %v3889_v14 = vor.u32 %v5029_v6, %v3888_v5  ;;  %v5049_v0 = vld [vmem:[#allocation6 + $0x514] sm:$0xf0]  ;;  %v4208_v2 = vld [vmem:[#allocation6 + $0x6e8] sm:$0xf]  ;;  %v3585_v5 = vor.u32 %v4953_v54, %v3584_v53 }
  0xe6   :  { %2647 = vmatpush.bf16.msra.mxu1 %v3825_v9  ;;  %2660 = vmatpush.bf16.msra.mxu2 %v3953_v10  ;;  %v4016_v9 = vld [vmem:[#allocation6 + $0x568] sm:$0xf]  ;;  %v5061_v10 = vld [vmem:[#allocation6 + $0x574] sm:$0xf0] }
  0xe7   :  { %2673 = vmatpush.bf16.msra.mxu3 %v4081_v15  ;;  %v3616_v15 = vld [vmem:[#allocation6 + $0x248] sm:$0xf]  ;;  %v4017_v8 = vor.u32 %v5061_v10, %v4016_v9  ;;  %v5141_v6 = vld [vmem:[#allocation6 + $0x7f4] sm:$0xf0] }
  0xe8   :  { %2635 = vmatpush.bf16.msra.mxu0 %v3681_v22  ;;  %2629 = vmatmul.bf16.vlgmr.msrb.gmra.mxu3 %v5576_v35  ;;  %v2409_v19 = vpop.f32.mrf.mxu2  ;;  %v5025_v22 = vld [vmem:[#allocation6 + $0x454] sm:$0xf0]  ;;  %v3617_v27 = vor.u32 %v4961_v16, %v3616_v15  ;;  %v4336_v4 = vld [vmem:[#allocation6 + $0x7e8] sm:$0xf]  ;;  %v3969_v15 = vor.u32 %v5049_v0, %v3968_v63 }
  0xe9   :  { %v2410_v23 = vadd.f32 %v2409_v19, %v2397_v11  ;;  %v3873_v33 = vor.u32 %v5025_v22, %v3872_v21  ;;  %v4464_v9 = vld [vmem:[#allocation6 + $0x8e8] sm:$0xf]  ;;  %v5173_v10 = vld [vmem:[#allocation6 + $0x8f4] sm:$0xf0] }
  0xea   :  { %2648 = vmatpush.bf16.msra.mxu1 %v3809_v25  ;;  %2661 = vmatpush.bf16.msra.mxu2 %v3937_v26  ;;  %v4000_v25 = vld [vmem:[#allocation6 + $0x548] sm:$0xf]  ;;  %v5057_v26 = vld [vmem:[#allocation6 + $0x554] sm:$0xf0]  ;;  %v2385_v31 = vpop.f32.mrf.mxu0  ;;  %v4465_v19 = vor.u32 %v5173_v10, %v4464_v9 }
  0xeb   :  { %2674 = vmatpush.bf16.msra.mxu3 %v4065_v32  ;;  %v2422_v24 = vpop.f32.mrf.mxu3  ;;  %v3745_v32 = vor.u32 %v4993_v20, %v3744_v17  ;;  %v4337_v17 = vor.u32 %v5141_v6, %v4336_v4  ;;  %v5105_v20 = vld [vmem:[#allocation6 + $0x6d4] sm:$0xf0]  ;;  %v4320_v21 = vld [vmem:[#allocation6 + $0x7c8] sm:$0xf] }
  0xec   :  { %2636 = vmatpush.bf16.msra.mxu0 %v3665_v41  ;;  %v5631_v30 = vadd.f32 %v2422_v24, %v2410_v23  ;;  %v2398_v40 = vpop.f32.mrf.mxu1  ;;  %v4001_v41 = vor.u32 %v5057_v26, %v4000_v25  ;;  %v5137_v23 = vld [vmem:[#allocation6 + $0x7d4] sm:$0xf0]  ;;  %v4448_v24 = vld [vmem:[#allocation6 + $0x8c8] sm:$0xf] }
  0xed   :  { %v5169_v25 = vld [vmem:[#allocation6 + $0x8d4] sm:$0xf0]  ;;  %v4576_v26 = vld [vmem:[#allocation6 + $0x9c8] sm:$0xf] }
  0xee   :  { %2649 = vmatpush.bf16.msra.mxu1 %v3793_v43  ;;  %2662 = vmatpush.bf16.msra.mxu2 %v3921_v44  ;;  %v4989_v43 = vld [vmem:[#allocation6 + $0x334] sm:$0xf0]  ;;  %v3856_v44 = vld [vmem:[#allocation6 + $0x428] sm:$0xf] }
  0xef   :  { %2675 = vmatpush.bf16.msra.mxu3 %v4049_v51  ;;  %v3601_v51 = vor.u32 %v4957_v37, %v3600_v36  ;;  %v3729_v55 = vor.u32 %v4989_v43, %v3728_v39  ;;  %v3857_v56 = vor.u32 %v5021_v45, %v3856_v44  ;;  %v4176_v36 = vld [vmem:[#allocation6 + $0x6a8] sm:$0xf]  ;;  %v5101_v37 = vld [vmem:[#allocation6 + $0x6b4] sm:$0xf0] }
  0xf0   :  { %2637 = vmatpush.bf16.msra.mxu0 %v3649_v58  ;;  %v4985_v58 = vld [vmem:[#allocation6 + $0x314] sm:$0xf0]  ;;  %v4304_v39 = vld [vmem:[#allocation6 + $0x7a8] sm:$0xf] }
  0xf1   :  { %v3713_v11 = vor.u32 %v4985_v58, %v3712_v57  ;;  %v4432_v43 = vld [vmem:[#allocation6 + $0x8a8] sm:$0xf]  ;;  %v5165_v44 = vld [vmem:[#allocation6 + $0x8b4] sm:$0xf0] }
  0xf2   :  { %2650 = vmatpush.bf16.msra.mxu1 %v3777_v60  ;;  %2663 = vmatpush.bf16.msra.mxu2 %v3905_v61  ;;  %v2411_v60 = vpop.f32.mrf.mxu2  ;;  %v3985_v61 = vor.u32 %v5053_v48, %v3984_v47  ;;  %v4560_v45 = vld [vmem:[#allocation6 + $0x9a8] sm:$0xf]  ;;  %v5197_v47 = vld [vmem:[#allocation6 + $0x9b4] sm:$0xf0]  ;;  %v4177_v48 = vor.u32 %v5101_v37, %v4176_v36  ;;  %v4433_v53 = vor.u32 %v5165_v44, %v4432_v43 }
  0xf3   :  { %2676 = vmatpush.bf16.msra.mxu3 %v4033_v3  ;;  %v2424_v1 = vpop.f32.mrf.mxu3  ;;  %v5109_v3 = vld [vmem:[#allocation6 + $0x6f4] sm:$0xf0]  ;;  %v4160_v54 = vld [vmem:[#allocation6 + $0x688] sm:$0xf]  ;;  %v4561_v57 = vor.u32 %v5197_v47, %v4560_v45 }
  0xf4   :  { %2638 = vmatpush.bf16.msra.mxu0 %v3633_v12  ;;  %v3841_v12 = vor.u32 %v5017_v62, %v3840_v59  ;;  %v4209_v16 = vor.u32 %v5109_v3, %v4208_v2  ;;  %v5129_v58 = vld [vmem:[#allocation6 + $0x794] sm:$0xf0]  ;;  %v4416_v59 = vld [vmem:[#allocation6 + $0x888] sm:$0xf] }
  0xf5   :  { %v5161_v60 = vld [vmem:[#allocation6 + $0x894] sm:$0xf0]  ;;  %v4544_v62 = vld [vmem:[#allocation6 + $0x988] sm:$0xf] }
  0xf6   :  { %2651 = vmatpush.bf16.msra.mxu1 %v3761_v13  ;;  %2664 = vmatpush.bf16.msra.mxu2 %v3889_v14  ;;  %v4592_v13 = vld [vmem:[#allocation6 + $0x9e8] sm:$0xf]  ;;  %v5205_v14 = vld [vmem:[#allocation6 + $0x9f4] sm:$0xf0]  ;;  %v4417_v4 = vor.u32 %v5161_v60, %v4416_v59 }
  0xf7   :  { %2677 = vmatpush.bf16.msra.mxu3 %v4017_v8  ;;  %v4192_v8 = vld [vmem:[#allocation6 + $0x6c8] sm:$0xf]  ;;  %v4593_v22 = vor.u32 %v5205_v14, %v4592_v13  ;;  %v5193_v63 = vld [vmem:[#allocation6 + $0x994] sm:$0xf0] }
  0xf8   :  { %2639 = vmatpush.bf16.msra.mxu0 %v3617_v27  ;;  %v5201_v27 = vld [vmem:[#allocation6 + $0x9d4] sm:$0xf0]  ;;  %v4193_v31 = vor.u32 %v5105_v20, %v4192_v8  ;;  %v4272_v9 = vld [vmem:[#allocation6 + $0x768] sm:$0xf]  ;;  %v4545_v10 = vor.u32 %v5193_v63, %v4544_v62 }
  0xf9   :  { %v4577_v40 = vor.u32 %v5201_v27, %v4576_v26  ;;  %v5093_v6 = vld [vmem:[#allocation6 + $0x674] sm:$0xf0]  ;;  %v4400_v13 = vld [vmem:[#allocation6 + $0x868] sm:$0xf] }
  0xfa   :  { %2652 = vmatpush.bf16.msra.mxu1 %v3745_v32  ;;  %2665 = vmatpush.bf16.msra.mxu2 %v3873_v33  ;;  %v4321_v32 = vor.u32 %v5137_v23, %v4320_v21  ;;  %v4449_v33 = vor.u32 %v5169_v25, %v4448_v24  ;;  %v5157_v14 = vld [vmem:[#allocation6 + $0x874] sm:$0xf0]  ;;  %v4128_v8 = vld [vmem:[#allocation6 + $0x648] sm:$0xf] }
  0xfb   :  { %2678 = vmatpush.bf16.msra.mxu3 %v4001_v41  ;;  %v5133_v41 = vld [vmem:[#allocation6 + $0x7b4] sm:$0xf0]  ;;  %v4256_v21 = vld [vmem:[#allocation6 + $0x748] sm:$0xf] }
  0xfc   :  { %2640 = vmatpush.bf16.msra.mxu0 %v3601_v51  ;;  %v4305_v51 = vor.u32 %v5133_v41, %v4304_v39  ;;  %v5089_v20 = vld [vmem:[#allocation6 + $0x654] sm:$0xf0]  ;;  %v4384_v25 = vld [vmem:[#allocation6 + $0x848] sm:$0xf] }
  0xfd   :  { %v5121_v24 = vld [vmem:[#allocation6 + $0x754] sm:$0xf0]  ;;  %v4129_v37 = vor.u32 %v5089_v20, %v4128_v8  ;;  %v4112_v43 = vld [vmem:[#allocation6 + $0x628] sm:$0xf] }
  0xfe   :  { %2653 = vmatpush.bf16.msra.mxu1 %v3729_v55  ;;  %2666 = vmatpush.bf16.msra.mxu2 %v3857_v56  ;;  %v5097_v55 = vld [vmem:[#allocation6 + $0x694] sm:$0xf0]  ;;  %v4288_v56 = vld [vmem:[#allocation6 + $0x788] sm:$0xf] }
  0xff   :  { %2679 = vmatpush.bf16.msra.mxu3 %v3985_v61  ;;  %v4161_v1 = vor.u32 %v5097_v55, %v4160_v54  ;;  %v4289_v3 = vor.u32 %v5129_v58, %v4288_v56  ;;  %v5153_v26 = vld [vmem:[#allocation6 + $0x854] sm:$0xf0]  ;;  %v4240_v45 = vld [vmem:[#allocation6 + $0x728] sm:$0xf] }
 0x100   :  { %2641 = vmatpush.bf16.msra.mxu0 %v3585_v5  ;;  %v2435_v61 = vpop.f32.mrf.mxu0  ;;  %v4144_v5 = vld [vmem:[#allocation6 + $0x668] sm:$0xf]  ;;  %v4385_v41 = vor.u32 %v5153_v26, %v4384_v25  ;;  %v5085_v44 = vld [vmem:[#allocation6 + $0x634] sm:$0xf0]  ;;  %v3426_v26 = vld [vmem:[#allocation6 + $0xd8] sm:$0xf0] }
 0x101   :  { %v2436_v0 = vadd.f32 %v2435_v61, %v5631_v30  ;;  %v4496_v54 = vld [vmem:[#allocation6 + $0x928] sm:$0xf]  ;;  %v5181_v55 = vld [vmem:[#allocation6 + $0x934] sm:$0xf0]  ;;  %v4113_v56 = vor.u32 %v5085_v44, %v4112_v43 }
 0x102   :  { %2654 = vmatpush.bf16.msra.mxu1 %v3713_v11  ;;  %2667 = vmatpush.bf16.msra.mxu2 %v3841_v12  ;;  %v2448_v2 = vpop.f32.mrf.mxu1  ;;  %v5125_v12 = vld [vmem:[#allocation6 + $0x774] sm:$0xf0]  ;;  %v4224_v61 = vld [vmem:[#allocation6 + $0x708] sm:$0xf] }
 0x103   :  { %2680 = vmatpush.bf16.msra.mxu3 %v3969_v15  ;;  %2642 = vmatmul.bf16.vlgmr.msra.gmra.mxu0 %v5570_v28  ;;  %v2449_v11 = vadd.f32 %v2448_v2, %v2436_v0  ;;  %v4528_v15 = vld [vmem:[#allocation6 + $0x968] sm:$0xf]  ;;  %v4273_v30 = vor.u32 %v5125_v12, %v4272_v9  ;;  %v5081_v58 = vld [vmem:[#allocation6 + $0x614] sm:$0xf0]  ;;  %v4497_v0 = vor.u32 %v5181_v55, %v4496_v54  ;;  %v4915_v9 = vld [vmem:[#allocation6 + $0xec] sm:$0xf] }
 0x104   :  { %2686 = vmatpush.bf16.msrb.mxu0 %v4209_v16  ;;  %v5189_v16 = vld [vmem:[#allocation6 + $0x974] sm:$0xf0]  ;;  %v4352_v63 = vld [vmem:[#allocation6 + $0x808] sm:$0xf]  ;;  %v3442_v12 = vld [vmem:[#allocation6 + $0xf8] sm:$0xf0] }
 0x105   :  { %2668 = vmatmul.bf16.vlgmr.msra.gmra.mxu2 %v5588_v49  ;;  %2655 = vmatmul.bf16.vlgmr.msra.gmra.mxu1 %v5572_v29  ;;  %v5113_v62 = vld [vmem:[#allocation6 + $0x714] sm:$0xf0]  ;;  %v4480_v2 = vld [vmem:[#allocation6 + $0x908] sm:$0xf]  ;;  %v3445_v20 = vor.u32 %v4915_v9, %v3442_v12  ;;  %v3538_v54 = vld [vmem:[#allocation6 + $0x1b8] sm:$0xf0] }
 0x106   :  { %2699 = vmatpush.bf16.msrb.mxu1 %v4337_v17  ;;  %2712 = vmatpush.bf16.msrb.mxu2 %v4465_v19  ;;  %v4145_v17 = vor.u32 %v5093_v6, %v4144_v5  ;;  %v4401_v19 = vor.u32 %v5157_v14, %v4400_v13  ;;  %v4720_v5 = vld [vmem:[#allocation6 + $0xae8] sm:$0xf]  ;;  %v5237_v6 = vld [vmem:[#allocation6 + $0xaf4] sm:$0xf0]  ;;  %v4947_v13 = vld [vmem:[#allocation6 + $0x1ec] sm:$0xf] }
 0x107   :  { %2725 = vmatpush.bf16.msrb.mxu3 %v4593_v22  ;;  %v4529_v22 = vor.u32 %v5189_v16, %v4528_v15  ;;  %v3570_v14 = vld [vmem:[#allocation6 + $0x1f8] sm:$0xf0]  ;;  %v4225_v15 = vor.u32 %v5113_v62, %v4224_v61  ;;  %v4721_v8 = vor.u32 %v5237_v6, %v4720_v5  ;;  %v5229_v44 = vld [vmem:[#allocation6 + $0xab4] sm:$0xf0]  ;;  %v4971_v55 = vld [vmem:[#allocation6 + $0x2ac] sm:$0xf] }
 0x108   :  { %2681 = vmatmul.bf16.vlgmr.msra.gmra.mxu3 %v5592_v52  ;;  %2687 = vmatpush.bf16.msrb.mxu0 %v4193_v31  ;;  %v2461_v23 = vpop.f32.mrf.mxu2  ;;  %v4512_v31 = vld [vmem:[#allocation6 + $0x948] sm:$0xf]  ;;  %v2437_v36 = vpop.f32.mrf.mxu0  ;;  %v5225_v61 = vld [vmem:[#allocation6 + $0xa94] sm:$0xf0]  ;;  %v4903_v62 = vld [vmem:[#allocation6 + $0x8c] sm:$0xf] }
 0x109   :  { %v5638_v27 = vadd.f32 %v2461_v23, %v2449_v11  ;;  %v5233_v23 = vld [vmem:[#allocation6 + $0xad4] sm:$0xf0]  ;;  %v4975_v36 = vld [vmem:[#allocation6 + $0x2cc] sm:$0xf] }
 0x10a   :  { %2700 = vmatpush.bf16.msrb.mxu1 %v4321_v32  ;;  %2713 = vmatpush.bf16.msrb.mxu2 %v4449_v33  ;;  %v5185_v32 = vld [vmem:[#allocation6 + $0x954] sm:$0xf0]  ;;  %v2450_v39 = vpop.f32.mrf.mxu1 }
 0x10b   :  { %2726 = vmatpush.bf16.msrb.mxu3 %v4577_v40  ;;  %v5640_v33 = vpop.f32.mrf.mxu3  ;;  %v4257_v40 = vor.u32 %v5121_v24, %v4256_v21  ;;  %v4513_v47 = vor.u32 %v5185_v32, %v4512_v31  ;;  %v3573_v21 = vor.u32 %v4947_v13, %v3570_v14  ;;  %v4911_v24 = vld [vmem:[#allocation6 + $0xcc] sm:$0xf]  ;;  %v3554_v32 = vld [vmem:[#allocation6 + $0x1d8] sm:$0xf0]  ;;  %v5221_v12 = vld [vmem:[#allocation6 + $0xa74] sm:$0xf0] }
 0x10c   :  { %2688 = vmatpush.bf16.msrb.mxu0 %v4177_v48  ;;  %v5117_v48 = vld [vmem:[#allocation6 + $0x734] sm:$0xf0]  ;;  %v4943_v31 = vld [vmem:[#allocation6 + $0x1cc] sm:$0xf] }
 0x10d   :  { %v4241_v59 = vor.u32 %v5117_v48, %v4240_v45  ;;  %v3557_v43 = vor.u32 %v4943_v31, %v3554_v32  ;;  %v4907_v45 = vld [vmem:[#allocation6 + $0xac] sm:$0xf] }
 0x10e   :  { %2701 = vmatpush.bf16.msrb.mxu1 %v4305_v51  ;;  %2714 = vmatpush.bf16.msrb.mxu2 %v4433_v53  ;;  %v4368_v51 = vld [vmem:[#allocation6 + $0x828] sm:$0xf]  ;;  %v5149_v53 = vld [vmem:[#allocation6 + $0x834] sm:$0xf0] }
 0x10f   :  { %2727 = vmatpush.bf16.msrb.mxu3 %v4561_v57  ;;  %v4096_v57 = vld [vmem:[#allocation6 + $0x608] sm:$0xf]  ;;  %v4369_v60 = vor.u32 %v5149_v53, %v4368_v51  ;;  %v3410_v51 = vld [vmem:[#allocation6 + $0xb8] sm:$0xf0]  ;;  %v4939_v53 = vld [vmem:[#allocation6 + $0x1ac] sm:$0xf] }
 0x110   :  { %2689 = vmatpush.bf16.msrb.mxu0 %v4161_v1  ;;  %v5145_v1 = vld [vmem:[#allocation6 + $0x814] sm:$0xf0]  ;;  %v4097_v11 = vor.u32 %v5081_v58, %v4096_v57  ;;  %v3541_v58 = vor.u32 %v4939_v53, %v3538_v54  ;;  %v4624_v54 = vld [vmem:[#allocation6 + $0xa28] sm:$0xf] }
 0x111   :  { %v4353_v16 = vor.u32 %v5145_v1, %v4352_v63  ;;  %v4935_v1 = vld [vmem:[#allocation6 + $0x18c] sm:$0xf] }
 0x112   :  { %2702 = vmatpush.bf16.msrb.mxu1 %v4289_v3  ;;  %2715 = vmatpush.bf16.msrb.mxu2 %v4417_v4  ;;  %v5177_v3 = vld [vmem:[#allocation6 + $0x914] sm:$0xf0]  ;;  %v2463_v4 = vpop.f32.mrf.mxu2 }
 0x113   :  { %2728 = vmatpush.bf16.msrb.mxu3 %v4545_v10  ;;  %v2476_v10 = vpop.f32.mrf.mxu3  ;;  %v3650_v4 = vld [vmem:[#allocation6 + $0x298] sm:$0xf0] }
 0x114   :  { %2690 = vmatpush.bf16.msrb.mxu0 %v4145_v17  ;;  %v4979_v17 = vld [vmem:[#allocation6 + $0x2ec] sm:$0xf] }
 0x116   :  { %2703 = vmatpush.bf16.msrb.mxu1 %v4273_v30  ;;  %2716 = vmatpush.bf16.msrb.mxu2 %v4401_v19  ;;  %v3698_v30 = vld [vmem:[#allocation6 + $0x2f8] sm:$0xf0]  ;;  %v4481_v19 = vor.u32 %v5177_v3, %v4480_v2  ;;  %v4967_v3 = vld [vmem:[#allocation6 + $0x28c] sm:$0xf] }
 0x117   :  { %2729 = vmatpush.bf16.msrb.mxu3 %v4529_v22  ;;  %v4704_v22 = vld [vmem:[#allocation6 + $0xac8] sm:$0xf]  ;;  %v3701_v25 = vor.u32 %v4979_v17, %v3698_v30  ;;  %v3522_v2 = vld [vmem:[#allocation6 + $0x198] sm:$0xf0]  ;;  %v4931_v17 = vld [vmem:[#allocation6 + $0x16c] sm:$0xf] }
 0x118   :  { %2691 = vmatpush.bf16.msrb.mxu0 %v4129_v37  ;;  %v3682_v37 = vld [vmem:[#allocation6 + $0x2d8] sm:$0xf0]  ;;  %v4705_v39 = vor.u32 %v5233_v23, %v4704_v22  ;;  %v3525_v10 = vor.u32 %v4935_v1, %v3522_v2  ;;  %v5209_v1 = vld [vmem:[#allocation6 + $0xa14] sm:$0xf0] }
 0x119   :  { %v3685_v48 = vor.u32 %v4975_v36, %v3682_v37  ;;  %v3506_v30 = vld [vmem:[#allocation6 + $0x178] sm:$0xf0]  ;;  %v4927_v37 = vld [vmem:[#allocation6 + $0x14c] sm:$0xf] }
 0x11a   :  { %2704 = vmatpush.bf16.msrb.mxu1 %v4257_v40  ;;  %2717 = vmatpush.bf16.msrb.mxu2 %v4385_v41  ;;  %v4688_v40 = vld [vmem:[#allocation6 + $0xaa8] sm:$0xf]  ;;  %v3429_v41 = vor.u32 %v4911_v24, %v3426_v26  ;;  %v3509_v23 = vor.u32 %v4931_v17, %v3506_v30  ;;  %v4895_v26 = vld [vmem:[#allocation6 + $0x4c] sm:$0xf]  ;;  %v3362_v36 = vld [vmem:[#allocation6 + $0x58] sm:$0xf0] }
 0x11b   :  { %2730 = vmatpush.bf16.msrb.mxu3 %v4513_v47  ;;  %v516_v47 = vperm.slane %v5621_v7, 1  ;;  %v4689_v57 = vor.u32 %v5229_v44, %v4688_v40  ;;  %v3413_v7 = vor.u32 %v4907_v45, %v3410_v51  ;;  %v4640_v24 = vld [vmem:[#allocation6 + $0xa48] sm:$0xf]  ;;  %v3618_v44 = vld [vmem:[#allocation6 + $0x258] sm:$0xf0]  ;;  %v3365_v51 = vor.u32 %v4895_v26, %v3362_v36 }
 0x11c   :  { %2692 = vmatpush.bf16.msrb.mxu0 %v4113_v56  ;;  %v3666_v56 = vld [vmem:[#allocation6 + $0x2b8] sm:$0xf0] }
 0x11d   :  { %v3669_v63 = vor.u32 %v4971_v55, %v3666_v56  ;;  %v5213_v55 = vld [vmem:[#allocation6 + $0xa34] sm:$0xf0]  ;;  %v4891_v56 = vld [vmem:[#allocation6 + $0x2c] sm:$0xf]  ;;  %v3954_v30 = vld [vmem:[#allocation6 + $0x4f8] sm:$0xf0] }
 0x11e   :  { %2705 = vmatpush.bf16.msrb.mxu1 %v4241_v59  ;;  %2718 = vmatpush.bf16.msrb.mxu2 %v4369_v60  ;;  %v2475_v59 = vadd.f32 %v5640_v33, %v516_v47  ;;  %v4672_v60 = vld [vmem:[#allocation6 + $0xa88] sm:$0xf]  ;;  %v4899_v33 = vld [vmem:[#allocation6 + $0x6c] sm:$0xf]  ;;  %v3810_v36 = vld [vmem:[#allocation6 + $0x3d8] sm:$0xf0] }
 0x11f   :  { %2731 = vmatpush.bf16.msrb.mxu3 %v4497_v0  ;;  %v3394_v0 = vld [vmem:[#allocation6 + $0x98] sm:$0xf0]  ;;  %v4673_v5 = vor.u32 %v5225_v61, %v4672_v60  ;;  %v4955_v61 = vld [vmem:[#allocation6 + $0x22c] sm:$0xf] }
 0x120   :  { %2693 = vmatpush.bf16.msrb.mxu0 %v4097_v11  ;;  %v2487_v6 = vpop.f32.mrf.mxu0  ;;  %v3397_v9 = vor.u32 %v4903_v62, %v3394_v0  ;;  %v4656_v11 = vld [vmem:[#allocation6 + $0xa68] sm:$0xf]  ;;  %v3474_v60 = vld [vmem:[#allocation6 + $0x138] sm:$0xf0] }
 0x121   :  { %v2488_v13 = vadd.f32 %v2487_v6, %v2475_v59  ;;  %v4923_v59 = vld [vmem:[#allocation6 + $0x12c] sm:$0xf]  ;;  %v3602_v62 = vld [vmem:[#allocation6 + $0x238] sm:$0xf0]  ;;  %v4608_v0 = vld [vmem:[#allocation6 + $0xa08] sm:$0xf] }
 0x122   :  { %2706 = vmatpush.bf16.msrb.mxu1 %v4225_v15  ;;  %2719 = vmatpush.bf16.msrb.mxu2 %v4353_v16  ;;  %v2500_v14 = vpop.f32.mrf.mxu1  ;;  %v3653_v15 = vor.u32 %v4967_v3, %v3650_v4  ;;  %v3378_v16 = vld [vmem:[#allocation6 + $0x78] sm:$0xf0]  ;;  %v3477_v3 = vor.u32 %v4923_v59, %v3474_v60  ;;  %v4887_v4 = vld [vmem:[#allocation6 + $0xc] sm:$0xf]  ;;  %v4609_v17 = vor.u32 %v5209_v1, %v4608_v0 }
 0x123   :  { %2732 = vmatpush.bf16.msrb.mxu3 %v4481_v19  ;;  %2694 = vmatmul.bf16.vlgmr.msrb.gmra.mxu0 %v5586_v46  ;;  %v4963_v19 = vld [vmem:[#allocation6 + $0x26c] sm:$0xf]  ;;  %v3381_v22 = vor.u32 %v4899_v33, %v3378_v16  ;;  %v3586_v33 = vld [vmem:[#allocation6 + $0x218] sm:$0xf0] }
 0x124   :  { %2738 = vmatpush.bf16.msra.mxu0 %v4721_v8  ;;  %v3634_v8 = vld [vmem:[#allocation6 + $0x278] sm:$0xf0]  ;;  %v4919_v6 = vld [vmem:[#allocation6 + $0x10c] sm:$0xf] }
 0x125   :  { %2720 = vmatmul.bf16.vlgmr.msrb.gmra.mxu2 %v5603_v38  ;;  %2707 = vmatmul.bf16.vlgmr.msrb.gmra.mxu1 %v5590_v50  ;;  %v3637_v32 = vor.u32 %v4963_v19, %v3634_v8  ;;  %v5043_v16 = vld [vmem:[#allocation6 + $0x4ec] sm:$0xf]  ;;  %v4082_v8 = vld [vmem:[#allocation6 + $0x5f8] sm:$0xf0] }
 0x126   :  { %2751 = vmatpush.bf16.msra.mxu1 %v3445_v20  ;;  %2764 = vmatpush.bf16.msra.mxu2 %v3573_v21  ;;  %v2501_v20 = vadd.f32 %v2500_v14, %v2488_v13  ;;  %v4657_v21 = vor.u32 %v5221_v12, %v4656_v11  ;;  %v3458_v11 = vld [vmem:[#allocation6 + $0x118] sm:$0xf0]  ;;  %v4951_v12 = vld [vmem:[#allocation6 + $0x20c] sm:$0xf]  ;;  %v3957_v26 = vor.u32 %v5043_v16, %v3954_v30 }
 0x127   :  { %2777 = vmatpush.bf16.msra.mxu3 %v3701_v25  ;;  %v5217_v25 = vld [vmem:[#allocation6 + $0xa54] sm:$0xf0]  ;;  %v5011_v14 = vld [vmem:[#allocation6 + $0x3ec] sm:$0xf]  ;;  %v4050_v59 = vld [vmem:[#allocation6 + $0x5b8] sm:$0xf0] }
 0x128   :  { %2733 = vmatmul.bf16.vlgmr.msrb.gmra.mxu3 %v5607_v18  ;;  %2739 = vmatpush.bf16.msra.mxu0 %v4705_v39  ;;  %v2513_v31 = vpop.f32.mrf.mxu2  ;;  %v3490_v39 = vld [vmem:[#allocation6 + $0x158] sm:$0xf0]  ;;  %v4641_v45 = vor.u32 %v5217_v25, %v4640_v24  ;;  %v5075_v19 = vld [vmem:[#allocation6 + $0x5ec] sm:$0xf]  ;;  %v3589_v24 = vor.u32 %v4951_v12, %v3586_v33 }
 0x129   :  { %v2514_v40 = vadd.f32 %v2513_v31, %v2501_v20  ;;  %v3493_v53 = vor.u32 %v4927_v37, %v3490_v39  ;;  %v4085_v31 = vor.u32 %v5075_v19, %v4082_v8  ;;  %v5039_v37 = vld [vmem:[#allocation6 + $0x4cc] sm:$0xf]  ;;  %v3890_v19 = vld [vmem:[#allocation6 + $0x478] sm:$0xf0] }
 0x12a   :  { %2752 = vmatpush.bf16.msra.mxu1 %v3429_v41  ;;  %2765 = vmatpush.bf16.msra.mxu2 %v3557_v43  ;;  %v4959_v43 = vld [vmem:[#allocation6 + $0x24c] sm:$0xf] }
 0x12b   :  { %2778 = vmatpush.bf16.msra.mxu3 %v3685_v48  ;;  %v2526_v41 = vpop.f32.mrf.mxu3  ;;  %v2489_v48 = vpop.f32.mrf.mxu0  ;;  %v5099_v60 = vld [vmem:[#allocation6 + $0x6ac] sm:$0xf] }
 0x12c   :  { %2740 = vmatpush.bf16.msra.mxu0 %v4689_v57  ;;  %v5648_v47 = vadd.f32 %v2526_v41, %v2514_v40  ;;  %v2502_v57 = vpop.f32.mrf.mxu1  ;;  %v3938_v40 = vld [vmem:[#allocation6 + $0x4d8] sm:$0xf0]  ;;  %v5071_v41 = vld [vmem:[#allocation6 + $0x5cc] sm:$0xf] }
 0x12d   :  { %v4999_v1 = vld [vmem:[#allocation6 + $0x38c] sm:$0xf] }
 0x12e   :  { %2753 = vmatpush.bf16.msra.mxu1 %v3413_v7  ;;  %2766 = vmatpush.bf16.msra.mxu2 %v3541_v58  ;;  %v3621_v7 = vor.u32 %v4959_v43, %v3618_v44  ;;  %v3346_v58 = vld [vmem:[#allocation6 + $0x38] sm:$0xf0]  ;;  %v5103_v44 = vld [vmem:[#allocation6 + $0x6cc] sm:$0xf] }
 0x12f   :  { %2779 = vmatpush.bf16.msra.mxu3 %v3669_v63  ;;  %v4625_v63 = vor.u32 %v5213_v55, %v4624_v54  ;;  %v3349_v2 = vor.u32 %v4891_v56, %v3346_v58  ;;  %v4066_v43 = vld [vmem:[#allocation6 + $0x5d8] sm:$0xf0]  ;;  %v5003_v54 = vld [vmem:[#allocation6 + $0x3ac] sm:$0xf] }
 0x130   :  { %2741 = vmatpush.bf16.msra.mxu0 %v4673_v5  ;;  %v3330_v5 = vld [vmem:[#allocation6 + $0x18] sm:$0xf0]  ;;  %v5035_v56 = vld [vmem:[#allocation6 + $0x4ac] sm:$0xf] }
 0x131   :  { %v3333_v20 = vor.u32 %v4887_v4, %v3330_v5  ;;  %v3794_v55 = vld [vmem:[#allocation6 + $0x3b8] sm:$0xf0]  ;;  %v5067_v58 = vld [vmem:[#allocation6 + $0x5ac] sm:$0xf] }
 0x132   :  { %2754 = vmatpush.bf16.msra.mxu1 %v3397_v9  ;;  %2767 = vmatpush.bf16.msra.mxu2 %v3525_v10  ;;  %v2515_v9 = vpop.f32.mrf.mxu2  ;;  %v3605_v10 = vor.u32 %v4955_v61, %v3602_v62  ;;  %v4178_v61 = vld [vmem:[#allocation6 + $0x6b8] sm:$0xf0]  ;;  %v3797_v62 = vor.u32 %v5003_v54, %v3794_v55  ;;  %v4053_v0 = vor.u32 %v5067_v58, %v4050_v59  ;;  %v5027_v16 = vld [vmem:[#allocation6 + $0x46c] sm:$0xf] }
 0x133   :  { %2780 = vmatpush.bf16.msra.mxu3 %v3653_v15  ;;  %v2528_v13 = vpop.f32.mrf.mxu3  ;;  %v3826_v15 = vld [vmem:[#allocation6 + $0x3f8] sm:$0xf0]  ;;  %v4181_v4 = vor.u32 %v5099_v60, %v4178_v61  ;;  %v5059_v8 = vld [vmem:[#allocation6 + $0x56c] sm:$0xf] }
 0x134   :  { %2742 = vmatpush.bf16.msra.mxu0 %v4657_v21  ;;  %v3461_v21 = vor.u32 %v4919_v6, %v3458_v11  ;;  %v3829_v25 = vor.u32 %v5011_v14, %v3826_v15  ;;  %v3906_v5 = vld [vmem:[#allocation6 + $0x498] sm:$0xf0]  ;;  %v5063_v6 = vld [vmem:[#allocation6 + $0x58c] sm:$0xf] }
 0x135   :  { %v4034_v9 = vld [vmem:[#allocation6 + $0x598] sm:$0xf0]  ;;  %v4995_v14 = vld [vmem:[#allocation6 + $0x36c] sm:$0xf] }
 0x136   :  { %2755 = vmatpush.bf16.msra.mxu1 %v3381_v22  ;;  %2768 = vmatpush.bf16.msra.mxu2 %v3509_v23  ;;  %v5107_v22 = vld [vmem:[#allocation6 + $0x6ec] sm:$0xf]  ;;  %v4210_v23 = vld [vmem:[#allocation6 + $0x6f8] sm:$0xf0]  ;;  %v4037_v13 = vor.u32 %v5063_v6, %v4034_v9 }
 0x137   :  { %2781 = vmatpush.bf16.msra.mxu3 %v3637_v32  ;;  %v5007_v32 = vld [vmem:[#allocation6 + $0x3cc] sm:$0xf]  ;;  %v4213_v39 = vor.u32 %v5107_v22, %v4210_v23  ;;  %v4162_v11 = vld [vmem:[#allocation6 + $0x698] sm:$0xf0] }
 0x138   :  { %2743 = vmatpush.bf16.msra.mxu0 %v4641_v45  ;;  %v4194_v45 = vld [vmem:[#allocation6 + $0x6d8] sm:$0xf0]  ;;  %v3813_v48 = vor.u32 %v5007_v32, %v3810_v36  ;;  %v5019_v58 = vld [vmem:[#allocation6 + $0x42c] sm:$0xf] }
 0x139   :  { %v4197_v57 = vor.u32 %v5103_v44, %v4194_v45  ;;  %v3762_v15 = vld [vmem:[#allocation6 + $0x378] sm:$0xf0]  ;;  %v5087_v44 = vld [vmem:[#allocation6 + $0x64c] sm:$0xf] }
 0x13a   :  { %2756 = vmatpush.bf16.msra.mxu1 %v3365_v51  ;;  %2769 = vmatpush.bf16.msra.mxu2 %v3493_v53  ;;  %v3941_v51 = vor.u32 %v5039_v37, %v3938_v40  ;;  %v4069_v53 = vor.u32 %v5071_v41, %v4066_v43  ;;  %v4146_v22 = vld [vmem:[#allocation6 + $0x678] sm:$0xf0]  ;;  %v3765_v23 = vor.u32 %v4995_v14, %v3762_v15  ;;  %v5051_v61 = vld [vmem:[#allocation6 + $0x52c] sm:$0xf] }
 0x13b   :  { %2782 = vmatpush.bf16.msra.mxu3 %v3621_v7  ;;  %v3922_v7 = vld [vmem:[#allocation6 + $0x4b8] sm:$0xf0]  ;;  %v5015_v6 = vld [vmem:[#allocation6 + $0x40c] sm:$0xf] }
 0x13c   :  { %2744 = vmatpush.bf16.msra.mxu0 %v4625_v63  ;;  %v3925_v63 = vor.u32 %v5035_v56, %v3922_v7  ;;  %v3874_v37 = vld [vmem:[#allocation6 + $0x458] sm:$0xf0]  ;;  %v5171_v14 = vld [vmem:[#allocation6 + $0x8ec] sm:$0xf] }
 0x13d   :  { %v4002_v40 = vld [vmem:[#allocation6 + $0x558] sm:$0xf0] }
 0x13e   :  { %2757 = vmatpush.bf16.msra.mxu1 %v3349_v2  ;;  %2770 = vmatpush.bf16.msra.mxu2 %v3477_v3  ;;  %v3778_v2 = vld [vmem:[#allocation6 + $0x398] sm:$0xf0]  ;;  %v5031_v3 = vld [vmem:[#allocation6 + $0x48c] sm:$0xf] }
 0x13f   :  { %2783 = vmatpush.bf16.msra.mxu3 %v3605_v10  ;;  %v3781_v12 = vor.u32 %v4999_v1, %v3778_v2  ;;  %v3909_v33 = vor.u32 %v5031_v3, %v3906_v5  ;;  %v4130_v45 = vld [vmem:[#allocation6 + $0x658] sm:$0xf0]  ;;  %v4983_v2 = vld [vmem:[#allocation6 + $0x30c] sm:$0xf] }
 0x140   :  { %2745 = vmatpush.bf16.msra.mxu0 %v4609_v17  ;;  %v2539_v10 = vpop.f32.mrf.mxu0  ;;  %v3730_v7 = vld [vmem:[#allocation6 + $0x338] sm:$0xf0]  ;;  %v4133_v59 = vor.u32 %v5087_v44, %v4130_v45 }
 0x141   :  { %v3858_v60 = vld [vmem:[#allocation6 + $0x438] sm:$0xf0] }
 0x142   :  { %2758 = vmatpush.bf16.msra.mxu1 %v3333_v20  ;;  %2771 = vmatpush.bf16.msra.mxu2 %v3461_v21  ;;  %v4018_v20 = vld [vmem:[#allocation6 + $0x578] sm:$0xf0]  ;;  %v5091_v21 = vld [vmem:[#allocation6 + $0x66c] sm:$0xf] }
 0x143   :  { %2784 = vmatpush.bf16.msra.mxu3 %v3589_v24  ;;  %2746 = vmatmul.bf16.vlgmr.msra.gmra.mxu0 %v5605_v42  ;;  %v4021_v24 = vor.u32 %v5059_v8, %v4018_v20  ;;  %v4149_v32 = vor.u32 %v5091_v21, %v4146_v22  ;;  %v3714_v3 = vld [vmem:[#allocation6 + $0x318] sm:$0xf0]  ;;  %v5235_v21 = vld [vmem:[#allocation6 + $0xaec] sm:$0xf] }
 0x144   :  { %2790 = vmatpush.bf16.msrb.mxu0 %v3829_v25  ;;  %v4991_v25 = vld [vmem:[#allocation6 + $0x34c] sm:$0xf]  ;;  %v3842_v9 = vld [vmem:[#allocation6 + $0x418] sm:$0xf0] }
 0x145   :  { %2772 = vmatmul.bf16.vlgmr.msra.gmra.mxu2 %v5576_v35  ;;  %2759 = vmatmul.bf16.vlgmr.msra.gmra.mxu1 %v5574_v34  ;;  %v5095_v35 = vld [vmem:[#allocation6 + $0x68c] sm:$0xf]  ;;  %v2552_v34 = vpop.f32.mrf.mxu1  ;;  %v3845_v8 = vor.u32 %v5015_v6, %v3842_v9  ;;  %v4722_v22 = vld [vmem:[#allocation6 + $0xaf8] sm:$0xf0] }
 0x146   :  { %2803 = vmatpush.bf16.msrb.mxu1 %v3957_v26  ;;  %2816 = vmatpush.bf16.msrb.mxu2 %v4085_v31  ;;  %v4165_v17 = vor.u32 %v5095_v35, %v4162_v11  ;;  %v3746_v26 = vld [vmem:[#allocation6 + $0x358] sm:$0xf0]  ;;  %v5023_v31 = vld [vmem:[#allocation6 + $0x44c] sm:$0xf] }
 0x147   :  { %2829 = vmatpush.bf16.msrb.mxu3 %v4213_v39  ;;  %v5055_v39 = vld [vmem:[#allocation6 + $0x54c] sm:$0xf]  ;;  %v3877_v55 = vor.u32 %v5023_v31, %v3874_v37  ;;  %v3970_v11 = vld [vmem:[#allocation6 + $0x518] sm:$0xf0] }
 0x148   :  { %2785 = vmatmul.bf16.vlgmr.msra.gmra.mxu3 %v5570_v28  ;;  %2791 = vmatpush.bf16.msrb.mxu0 %v3813_v48  ;;  %v2540_v28 = vadd.f32 %v2539_v10, %v5648_v47  ;;  %v3893_v47 = vor.u32 %v5027_v16, %v3890_v19  ;;  %v2565_v36 = vpop.f32.mrf.mxu2  ;;  %v2541_v48 = vpop.f32.mrf.mxu0  ;;  %v4005_v56 = vor.u32 %v5055_v39, %v4002_v40  ;;  %v5047_v10 = vld [vmem:[#allocation6 + $0x50c] sm:$0xf]  ;;  %v4594_v19 = vld [vmem:[#allocation6 + $0x9f8] sm:$0xf0] }
 0x149   :  { %v3717_v16 = vor.u32 %v4983_v2, %v3714_v3  ;;  %v3973_v20 = vor.u32 %v5047_v10, %v3970_v11  ;;  %v4322_v31 = vld [vmem:[#allocation6 + $0x7d8] sm:$0xf0]  ;;  %v5199_v39 = vld [vmem:[#allocation6 + $0x9cc] sm:$0xf] }
 0x14a   :  { %2804 = vmatpush.bf16.msrb.mxu1 %v3941_v51  ;;  %2817 = vmatpush.bf16.msrb.mxu2 %v4069_v53  ;;  %v2553_v30 = vadd.f32 %v2552_v34, %v2540_v28  ;;  %v3749_v51 = vor.u32 %v4991_v25, %v3746_v26  ;;  %v5079_v28 = vld [vmem:[#allocation6 + $0x60c] sm:$0xf]  ;;  %v4450_v37 = vld [vmem:[#allocation6 + $0x8d8] sm:$0xf0] }
 0x14b   :  { %2830 = vmatpush.bf16.msrb.mxu3 %v4197_v57  ;;  %v2578_v43 = vpop.f32.mrf.mxu3  ;;  %v4987_v57 = vld [vmem:[#allocation6 + $0x32c] sm:$0xf]  ;;  %v4578_v40 = vld [vmem:[#allocation6 + $0x9d8] sm:$0xf0] }
 0x14c   :  { %2792 = vmatpush.bf16.msrb.mxu0 %v3797_v62  ;;  %v2566_v41 = vadd.f32 %v2565_v36, %v2553_v30  ;;  %v3986_v62 = vld [vmem:[#allocation6 + $0x538] sm:$0xf0]  ;;  %v3733_v1 = vor.u32 %v4987_v57, %v3730_v7  ;;  %v5203_v30 = vld [vmem:[#allocation6 + $0x9ec] sm:$0xf]  ;;  %v4725_v36 = vor.u32 %v5235_v21, %v4722_v22  ;;  %v4581_v48 = vor.u32 %v5199_v39, %v4578_v40 }
 0x14d   :  { %v2554_v53 = vpop.f32.mrf.mxu1  ;;  %v3989_v5 = vor.u32 %v5051_v61, %v3986_v62  ;;  %v4597_v25 = vor.u32 %v5203_v30, %v4594_v19  ;;  %v5135_v26 = vld [vmem:[#allocation6 + $0x7cc] sm:$0xf]  ;;  %v4434_v57 = vld [vmem:[#allocation6 + $0x8b8] sm:$0xf0] }
 0x14e   :  { %2805 = vmatpush.bf16.msrb.mxu1 %v3925_v63  ;;  %2818 = vmatpush.bf16.msrb.mxu2 %v4053_v0  ;;  %v5655_v54 = vadd.f32 %v2578_v43, %v2566_v41  ;;  %v5083_v63 = vld [vmem:[#allocation6 + $0x62c] sm:$0xf]  ;;  %v4114_v0 = vld [vmem:[#allocation6 + $0x638] sm:$0xf0]  ;;  %v4325_v44 = vor.u32 %v5135_v26, %v4322_v31 }
 0x14f   :  { %2831 = vmatpush.bf16.msrb.mxu3 %v4181_v4  ;;  %v3861_v4 = vor.u32 %v5019_v58, %v3858_v60  ;;  %v4117_v35 = vor.u32 %v5083_v63, %v4114_v0  ;;  %v5231_v41 = vld [vmem:[#allocation6 + $0xacc] sm:$0xf]  ;;  %v4706_v43 = vld [vmem:[#allocation6 + $0xad8] sm:$0xf0] }
 0x150   :  { %2793 = vmatpush.bf16.msrb.mxu0 %v3781_v12  ;;  %v4098_v12 = vld [vmem:[#allocation6 + $0x618] sm:$0xf0]  ;;  %v2567_v34 = vpop.f32.mrf.mxu2  ;;  %v5195_v7 = vld [vmem:[#allocation6 + $0x9ac] sm:$0xf] }
 0x151   :  { %v4306_v53 = vld [vmem:[#allocation6 + $0x7b8] sm:$0xf0]  ;;  %v5127_v0 = vld [vmem:[#allocation6 + $0x78c] sm:$0xf] }
 0x152   :  { %2806 = vmatpush.bf16.msrb.mxu1 %v3909_v33  ;;  %2819 = vmatpush.bf16.msrb.mxu2 %v4037_v13  ;;  %v5139_v33 = vld [vmem:[#allocation6 + $0x7ec] sm:$0xf]  ;;  %v4338_v13 = vld [vmem:[#allocation6 + $0x7f8] sm:$0xf0] }
 0x153   :  { %2832 = vmatpush.bf16.msrb.mxu3 %v4165_v17  ;;  %v2580_v15 = vpop.f32.mrf.mxu3  ;;  %v4466_v17 = vld [vmem:[#allocation6 + $0x8f8] sm:$0xf0]  ;;  %v5123_v11 = vld [vmem:[#allocation6 + $0x76c] sm:$0xf] }
 0x154   :  { %2794 = vmatpush.bf16.msrb.mxu0 %v3765_v23  ;;  %v4101_v23 = vor.u32 %v5079_v28, %v4098_v12  ;;  %v4562_v58 = vld [vmem:[#allocation6 + $0x9b8] sm:$0xf0]  ;;  %v5155_v12 = vld [vmem:[#allocation6 + $0x86c] sm:$0xf] }
 0x155   :  { %v4690_v60 = vld [vmem:[#allocation6 + $0xab8] sm:$0xf0]  ;;  %v4565_v63 = vor.u32 %v5195_v7, %v4562_v58  ;;  %v5219_v15 = vld [vmem:[#allocation6 + $0xa6c] sm:$0xf] }
 0x156   :  { %2807 = vmatpush.bf16.msrb.mxu1 %v3893_v47  ;;  %2820 = vmatpush.bf16.msrb.mxu2 %v4021_v24  ;;  %v4341_v47 = vor.u32 %v5139_v33, %v4338_v13  ;;  %v4469_v24 = vor.u32 %v5171_v14, %v4466_v17  ;;  %v4418_v3 = vld [vmem:[#allocation6 + $0x898] sm:$0xf0]  ;;  %v5187_v13 = vld [vmem:[#allocation6 + $0x96c] sm:$0xf] }
 0x157   :  { %2833 = vmatpush.bf16.msrb.mxu3 %v4149_v32  ;;  %v5167_v32 = vld [vmem:[#allocation6 + $0x8cc] sm:$0xf]  ;;  %v4274_v28 = vld [vmem:[#allocation6 + $0x778] sm:$0xf0] }
 0x158   :  { %2795 = vmatpush.bf16.msrb.mxu0 %v3749_v51  ;;  %v4453_v45 = vor.u32 %v5167_v32, %v4450_v37  ;;  %v5131_v51 = vld [vmem:[#allocation6 + $0x7ac] sm:$0xf]  ;;  %v4402_v33 = vld [vmem:[#allocation6 + $0x878] sm:$0xf0]  ;;  %v4277_v17 = vor.u32 %v5123_v11, %v4274_v28  ;;  %v5244_v28 = vld [vmem:[#allocation9 + $0x30] sm:$0xff] }
 0x159   :  { %v4309_v61 = vor.u32 %v5131_v51, %v4306_v53  ;;  %v4530_v14 = vld [vmem:[#allocation6 + $0x978] sm:$0xf0]  ;;  %v4405_v30 = vor.u32 %v5155_v12, %v4402_v33  ;;  %v5151_v21 = vld [vmem:[#allocation6 + $0x84c] sm:$0xf]  ;;  %v5252_v12 = vld [vmem:[#allocation9 + $0x70] sm:$0xff] }
 0x15a   :  { %2808 = vmatpush.bf16.msrb.mxu1 %v3877_v55  ;;  %2821 = vmatpush.bf16.msrb.mxu2 %v4005_v56  ;;  %v5163_v55 = vld [vmem:[#allocation6 + $0x8ac] sm:$0xf]  ;;  %v4709_v56 = vor.u32 %v5231_v41, %v4706_v43  ;;  %v4533_v19 = vor.u32 %v5187_v13, %v4530_v14  ;;  %v4642_v31 = vld [vmem:[#allocation6 + $0xa58] sm:$0xf0]  ;;  %v5242_v13 = vld [vmem:[#allocation9 + $0x20] sm:$0xff] }
 0x15b   :  { %2834 = vmatpush.bf16.msrb.mxu3 %v4133_v59  ;;  %v5227_v59 = vld [vmem:[#allocation6 + $0xaac] sm:$0xf]  ;;  %v4437_v62 = vor.u32 %v5163_v55, %v4434_v57  ;;  %v4370_v51 = vld [vmem:[#allocation6 + $0x838] sm:$0xf0] }
 0x15c   :  { %2796 = vmatpush.bf16.msrb.mxu0 %v3733_v1  ;;  %v4290_v1 = vld [vmem:[#allocation6 + $0x798] sm:$0xf0]  ;;  %v4693_v2 = vor.u32 %v5227_v59, %v4690_v60  ;;  %v5215_v26 = vld [vmem:[#allocation6 + $0xa4c] sm:$0xf] }
 0x15d   :  { %v4293_v9 = vor.u32 %v5127_v0, %v4290_v1  ;;  %v5115_v43 = vld [vmem:[#allocation6 + $0x72c] sm:$0xf]  ;;  %v4498_v55 = vld [vmem:[#allocation6 + $0x938] sm:$0xf0] }
 0x15e   :  { %2809 = vmatpush.bf16.msrb.mxu1 %v3861_v4  ;;  %2822 = vmatpush.bf16.msrb.mxu2 %v3989_v5  ;;  %v5191_v4 = vld [vmem:[#allocation6 + $0x98c] sm:$0xf]  ;;  %v4546_v5 = vld [vmem:[#allocation6 + $0x998] sm:$0xf0] }
 0x15f   :  { %2835 = vmatpush.bf16.msrb.mxu3 %v4117_v35  ;;  %v4549_v35 = vor.u32 %v5191_v4, %v4546_v5  ;;  %v5179_v53 = vld [vmem:[#allocation6 + $0x92c] sm:$0xf]  ;;  %v4626_v57 = vld [vmem:[#allocation6 + $0xa38] sm:$0xf0] }
 0x160   :  { %2797 = vmatpush.bf16.msrb.mxu0 %v3717_v16  ;;  %v5661_v6 = vpop.f32.mrf.mxu0  ;;  %v4658_v16 = vld [vmem:[#allocation6 + $0xa78] sm:$0xf0]  ;;  %v4501_v59 = vor.u32 %v5179_v53, %v4498_v55  ;;  %v5111_v60 = vld [vmem:[#allocation6 + $0x70c] sm:$0xf] }
 0x161   :  { %v4661_v22 = vor.u32 %v5219_v15, %v4658_v16  ;;  %v4354_v0 = vld [vmem:[#allocation6 + $0x818] sm:$0xf0]  ;;  %v5175_v1 = vld [vmem:[#allocation6 + $0x90c] sm:$0xf]  ;;  %v5250_v16 = vld [vmem:[#allocation9 + $0x60] sm:$0xff] }
 0x162   :  { %2810 = vmatpush.bf16.msrb.mxu1 %v3845_v8  ;;  %2823 = vmatpush.bf16.msrb.mxu2 %v3973_v20  ;;  %v5663_v10 = vpop.f32.mrf.mxu1  ;;  %v5119_v8 = vld [vmem:[#allocation6 + $0x74c] sm:$0xf]  ;;  %v4258_v20 = vld [vmem:[#allocation6 + $0x758] sm:$0xf0] }
 0x163   :  { %2836 = vmatpush.bf16.msrb.mxu3 %v4101_v23  ;;  %2798 = vmatmul.bf16.vlgmr.msrb.gmra.mxu0 %v5572_v29  ;;  %v5223_v29 = vld [vmem:[#allocation6 + $0xa8c] sm:$0xf]  ;;  %v4386_v23 = vld [vmem:[#allocation6 + $0x858] sm:$0xf0]  ;;  %v4261_v37 = vor.u32 %v5119_v8, %v4258_v20  ;;  %v5248_v20 = vld [vmem:[#allocation9 + $0x50] sm:$0xff] }
 0x164   :  { %2842 = vmatpush.bf16.msra.mxu0 %v4341_v47  ;;  %v5183_v47 = vld [vmem:[#allocation6 + $0x94c] sm:$0xf]  ;;  %v4389_v40 = vor.u32 %v5151_v21, %v4386_v23  ;;  %v4610_v4 = vld [vmem:[#allocation6 + $0xa18] sm:$0xf0]  ;;  %v2592_v23 = vadd.f32 %v5661_v6, %v5655_v54  ;;  %v5256_v6 = vld [vmem:[#allocation9 + $0x90] sm:$0xff] }
 0x165   :  { %2824 = vmatmul.bf16.vlgmr.msrb.gmra.mxu2 %v5592_v52  ;;  %2811 = vmatmul.bf16.vlgmr.msrb.gmra.mxu1 %v5588_v49  ;;  %v5159_v52 = vld [vmem:[#allocation6 + $0x88c] sm:$0xf]  ;;  %v5253_v11 = vld [vmem:[#allocation9 + $0x78] sm:$0xff] }
 0x166   :  { %2855 = vmatpush.bf16.msra.mxu1 %v4469_v24  ;;  %2868 = vmatpush.bf16.msra.mxu2 %v4597_v25  ;;  %v4421_v49 = vor.u32 %v5159_v52, %v4418_v3  ;;  %v4514_v24 = vld [vmem:[#allocation6 + $0x958] sm:$0xf0]  ;;  %v5207_v3 = vld [vmem:[#allocation6 + $0xa0c] sm:$0xf] }
 0x167   :  { %2881 = vmatpush.bf16.msra.mxu3 %v4725_v36  ;;  %v4517_v41 = vor.u32 %v5183_v47, %v4514_v24  ;;  %v4482_v52 = vld [vmem:[#allocation6 + $0x918] sm:$0xf0]  ;;  %v5251_v33 = vld [vmem:[#allocation9 + $0x68] sm:$0xff] }
 0x168   :  { %2837 = vmatmul.bf16.vlgmr.msrb.gmra.mxu3 %v5586_v46  ;;  %2843 = vmatpush.bf16.msra.mxu0 %v4325_v44  ;;  %v4674_v46 = vld [vmem:[#allocation6 + $0xa98] sm:$0xf0]  ;;  %v5665_v25 = vpop.f32.mrf.mxu2  ;;  %v2593_v36 = vpop.f32.mrf.mxu0  ;;  %v5239_v47 = vld [vmem:[#allocation9 + $0x8] sm:$0xff] }
 0x169   :  { %v4677_v34 = vor.u32 %v5223_v29, %v4674_v46  ;;  %v4242_v44 = vld [vmem:[#allocation6 + $0x738] sm:$0xf0]  ;;  %v5247_v24 = vld [vmem:[#allocation9 + $0x48] sm:$0xff]  ;;  %v2605_v36 = vadd.f32 %v5663_v10, %v2592_v23 }
 0x16a   :  { %2856 = vmatpush.bf16.msra.mxu1 %v4453_v45  ;;  %2869 = vmatpush.bf16.msra.mxu2 %v4581_v48  ;;  %v2606_v39 = vpop.f32.mrf.mxu1  ;;  %v5147_v45 = vld [vmem:[#allocation6 + $0x82c] sm:$0xf]  ;;  %v4645_v48 = vor.u32 %v5215_v26, %v4642_v31  ;;  %v4245_v7 = vor.u32 %v5115_v43, %v4242_v44  ;;  %v5261_v15 = vld [vmem:[#allocation9 + $0xb8] sm:$0xff]  ;;  %v5258_v31 = vld [vmem:[#allocation9 + $0xa0] sm:$0xff] }
 0x16b   :  { %2882 = vmatpush.bf16.msra.mxu3 %v4709_v56  ;;  %v5667_v32 = vpop.f32.mrf.mxu3  ;;  %v5211_v56 = vld [vmem:[#allocation6 + $0xa2c] sm:$0xf]  ;;  %v4373_v58 = vor.u32 %v5147_v45, %v4370_v51  ;;  %v5238_v39 = vld [vmem:[#allocation9] sm:$0xff]  ;;  %v5257_v43 = vld [vmem:[#allocation9 + $0x98] sm:$0xff]  ;;  %v2895_v44 = vmax.f32 %v2605_v36, 0.0 }
 0x16c   :  { %2844 = vmatpush.bf16.msra.mxu0 %v4309_v61  ;;  %v4226_v61 = vld [vmem:[#allocation6 + $0x718] sm:$0xf0]  ;;  %v5255_v53 = vld [vmem:[#allocation9 + $0x88] sm:$0xff] }
 0x16d   :  { %v4229_v29 = vor.u32 %v5111_v60, %v4226_v61  ;;  %v2899_v45 = vpack.c.bf16 %v2895_v44, %v2895_v44 }
 0x16e   :  { %2857 = vmatpush.bf16.msra.mxu1 %v4437_v62  ;;  %2870 = vmatpush.bf16.msra.mxu2 %v4565_v63  ;;  %v5143_v62 = vld [vmem:[#allocation6 + $0x80c] sm:$0xf]  ;;  %v4629_v63 = vor.u32 %v5211_v56, %v4626_v57  ;;  %v5254_v57 = vld [vmem:[#allocation9 + $0x80] sm:$0xff] }
 0x16f   :  { %2883 = vmatpush.bf16.msra.mxu3 %v4693_v2  ;;  %v4357_v46 = vor.u32 %v5143_v62, %v4354_v0 }
 0x170   :  { %2845 = vmatpush.bf16.msra.mxu0 %v4293_v9  ;;  %v2619_v2 = vpop.f32.mrf.mxu2  ;;  %v4485_v9 = vor.u32 %v5175_v1, %v4482_v52 }
 0x172   :  { %2858 = vmatpush.bf16.msra.mxu1 %v4421_v49  ;;  %2871 = vmatpush.bf16.msra.mxu2 %v4549_v35  ;;  %v4613_v49 = vor.u32 %v5207_v3, %v4610_v4  ;;  %v5245_v35 = vld [vmem:[#allocation9 + $0x38] sm:$0xff] }
 0x173   :  { %2884 = vmatpush.bf16.msra.mxu3 %v4677_v34  ;;  %v2632_v5 = vpop.f32.mrf.mxu3  ;;  %v5243_v34 = vld [vmem:[#allocation9 + $0x28] sm:$0xff] }
 0x174   :  { %2846 = vmatpush.bf16.msra.mxu0 %v4277_v17 }
 0x176   :  { %2859 = vmatpush.bf16.msra.mxu1 %v4405_v30  ;;  %2872 = vmatpush.bf16.msra.mxu2 %v4533_v19  ;;  %v5260_v19 = vld [vmem:[#allocation9 + $0xb0] sm:$0xff] }
 0x177   :  { %2885 = vmatpush.bf16.msra.mxu3 %v4661_v22  ;;  %v5259_v22 = vld [vmem:[#allocation9 + $0xa8] sm:$0xff] }
 0x178   :  { %2847 = vmatpush.bf16.msra.mxu0 %v4261_v37 }
 0x17a   :  { %2860 = vmatpush.bf16.msra.mxu1 %v4389_v40  ;;  %2873 = vmatpush.bf16.msra.mxu2 %v4517_v41  ;;  %v2894_v40 = vmax.f32 %v5638_v27, 0.0  ;;  %v5246_v41 = vld [vmem:[#allocation9 + $0x40] sm:$0xff] }
 0x17b   :  { %2886 = vmatpush.bf16.msra.mxu3 %v4645_v48  ;;  %v5293_v48 = vld [vmem:[#allocation8] sm:$0xf] }
 0x17c   :  { %2848 = vmatpush.bf16.msra.mxu0 %v4245_v7  ;;  %v2898_v54 = vpack.c.bf16 %v2894_v40, %v2894_v40  ;;  %v517_v51 = vperm.slane %v5293_v48, 2 }
 0x17e   :  { %2861 = vmatpush.bf16.msra.mxu1 %v4373_v58  ;;  %2874 = vmatpush.bf16.msra.mxu2 %v4501_v59  ;;  %v2618_v10 = vadd.f32 %v5665_v25, %v517_v51 }
 0x17f   :  { %2887 = vmatpush.bf16.msra.mxu3 %v4629_v63 }
 0x180   :  { %2849 = vmatpush.bf16.msra.mxu0 %v4229_v29  ;;  %v2643_v14 = vpop.f32.mrf.mxu0  ;;  %v2631_v55 = vadd.f32 %v5667_v32, %v2618_v10 }
 0x182   :  { %2862 = vmatpush.bf16.msra.mxu1 %v4357_v46  ;;  %2875 = vmatpush.bf16.msra.mxu2 %v4485_v9  ;;  %v2656_v17 = vpop.f32.mrf.mxu1  ;;  %v2644_v7 = vadd.f32 %v2643_v14, %v2631_v55 }
 0x183   :  { %2888 = vmatpush.bf16.msra.mxu3 %v4613_v49  ;;  %2850 = vmatmul.bf16.vlgmr.msra.gmra.mxu0 %v5590_v50  ;;  %v5241_v50 = vld [vmem:[#allocation9 + $0x18] sm:$0xff] }
 0x184   :  { %3162 = vmatpush.bf16.msrb.mxu0 %v5245_v35  ;;  %v2657_v61 = vadd.f32 %v2656_v17, %v2644_v7  ;;  %v5264_v17 = vld [vmem:[#allocation9 + $0xd0] sm:$0xff] }
 0x185   :  { %2863 = vmatmul.bf16.vlgmr.msra.gmra.mxu1 %v5603_v38  ;;  %2876 = vmatmul.bf16.vlgmr.msra.gmra.mxu2 %v5607_v18  ;;  %v5249_v38 = vld [vmem:[#allocation9 + $0x58] sm:$0xff] }
 0x186   :  { %3175 = vmatpush.bf16.msrb.mxu1 %v5253_v11  ;;  %2889 = vmatmul.bf16.vlgmr.msra.gmra.mxu3 %v5605_v42  ;;  %v5240_v42 = vld [vmem:[#allocation9 + $0x10] sm:$0xff]  ;;  %v5269_v11 = vld [vmem:[#allocation9 + $0xf8] sm:$0xff] }
 0x187   :  { %3188 = vmatpush.bf16.msrb.mxu2 %v5261_v15  ;;  %3201 = vmatpush.bf16.msrb.mxu3 %v5269_v11  ;;  %v5266_v15 = vld [vmem:[#allocation9 + $0xe0] sm:$0xff] }
 0x188   :  { %3163 = vmatpush.bf16.msrb.mxu0 %v5244_v28  ;;  %v2669_v30 = vpop.f32.mrf.mxu2  ;;  %v2645_v8 = vpop.f32.mrf.mxu0 }
 0x189   :  { %v2670_v63 = vadd.f32 %v2669_v30, %v2657_v61 }
 0x18a   :  { %3176 = vmatpush.bf16.msrb.mxu1 %v5252_v12  ;;  %v2658_v21 = vpop.f32.mrf.mxu1  ;;  %v5268_v12 = vld [vmem:[#allocation9 + $0xf0] sm:$0xff] }
 0x18b   :  { %v2682_v18 = vpop.f32.mrf.mxu3  ;;  %3189 = vmatpush.bf16.msrb.mxu2 %v5260_v19  ;;  %3202 = vmatpush.bf16.msrb.mxu3 %v5268_v12  ;;  %v5263_v19 = vld [vmem:[#allocation9 + $0xc8] sm:$0xff] }
 0x18c   :  { %3164 = vmatpush.bf16.msrb.mxu0 %v5243_v34  ;;  %v2683_v52 = vadd.f32 %v2682_v18, %v2670_v63  ;;  %v5277_v63 = vld [vmem:[#allocation12 + $0x38] sm:$0xff] }
 0x18e   :  { %3177 = vmatpush.bf16.msrb.mxu1 %v5251_v33  ;;  %v5267_v33 = vld [vmem:[#allocation9 + $0xe8] sm:$0xff] }
 0x18f   :  { %3190 = vmatpush.bf16.msrb.mxu2 %v5259_v22  ;;  %3203 = vmatpush.bf16.msrb.mxu3 %v5267_v33  ;;  %v5262_v22 = vld [vmem:[#allocation9 + $0xc0] sm:$0xff] }
 0x190   :  { %3165 = vmatpush.bf16.msrb.mxu0 %v5242_v13  ;;  %v2671_v26 = vpop.f32.mrf.mxu2 }
 0x192   :  { %3178 = vmatpush.bf16.msrb.mxu1 %v5250_v16  ;;  %v5265_v16 = vld [vmem:[#allocation9 + $0xd8] sm:$0xff] }
 0x193   :  { %v2684_v37 = vpop.f32.mrf.mxu3  ;;  %3191 = vmatpush.bf16.msrb.mxu2 %v5258_v31  ;;  %3204 = vmatpush.bf16.msrb.mxu3 %v5266_v15 }
 0x194   :  { %3166 = vmatpush.bf16.msrb.mxu0 %v5241_v50  ;;  %v518_v50 = vperm.slane %v5293_v48, 3 }
 0x196   :  { %3179 = vmatpush.bf16.msrb.mxu1 %v5249_v38 }
 0x197   :  { %3192 = vmatpush.bf16.msrb.mxu2 %v5257_v43  ;;  %3205 = vmatpush.bf16.msrb.mxu3 %v5265_v16 }
 0x198   :  { %3167 = vmatpush.bf16.msrb.mxu0 %v5240_v42 }
 0x19a   :  { %3180 = vmatpush.bf16.msrb.mxu1 %v5248_v20 }
 0x19b   :  { %3193 = vmatpush.bf16.msrb.mxu2 %v5256_v6  ;;  %3206 = vmatpush.bf16.msrb.mxu3 %v5264_v17 }
 0x19c   :  { %3168 = vmatpush.bf16.msrb.mxu0 %v5239_v47 }
 0x19e   :  { %3181 = vmatpush.bf16.msrb.mxu1 %v5247_v24 }
 0x19f   :  { %3194 = vmatpush.bf16.msrb.mxu2 %v5255_v53  ;;  %3207 = vmatpush.bf16.msrb.mxu3 %v5263_v19 }
 0x1a0   :  { %3169 = vmatpush.bf16.msrb.mxu0 %v5238_v39  ;;  %v2695_v27 = vpop.f32.mrf.mxu0 }
 0x1a1   :  { %v2696_v2 = vadd.f32 %v2695_v27, %v2683_v52  ;;  %v5274_v52 = vld [vmem:[#allocation12 + $0x20] sm:$0xff] }
 0x1a2   :  { %3182 = vmatpush.bf16.msrb.mxu1 %v5246_v41  ;;  %v2708_v56 = vpop.f32.mrf.mxu1 }
 0x1a3   :  { %3170 = vmatmul.bf16.vlgmr.msrb.gmra.mxu0 %v2898_v54  ;;  %3195 = vmatpush.bf16.msrb.mxu2 %v5254_v57  ;;  %v2709_v25 = vadd.f32 %v2708_v56, %v2696_v2  ;;  %v5291_v57 = vld [vmem:[#allocation11] ss:$0 sm:$0xff] }
 0x1a4   :  { %3208 = vmatpush.bf16.msrb.mxu3 %v5262_v22  ;;  %3284 = vmatpush.bf16.msra.mxu0 %v5277_v63  ;;  %v5273_v2 = vld [vmem:[#allocation12 + $0x18] sm:$0xff] }
 0x1a5   :  { %3183 = vmatmul.bf16.vlgmr.msrb.gmra.mxu1 %v2899_v45 }
 0x1a8   :  { %v2721_v58 = vpop.f32.mrf.mxu2  ;;  %v2697_v60 = vpop.f32.mrf.mxu0 }
 0x1a9   :  { %v2722_v3 = vadd.f32 %v2721_v58, %v2709_v25  ;;  %v5272_v25 = vld [vmem:[#allocation12 + $0x10] sm:$0xff] }
 0x1aa   :  { %v2710_v62 = vpop.f32.mrf.mxu1 }
 0x1ab   :  { %v2734_v59 = vpop.f32.mrf.mxu3 }
 0x1ac   :  { %v2735_v4 = vadd.f32 %v2734_v59, %v2722_v3 }
 0x1b0   :  { %v2723_v0 = vpop.f32.mrf.mxu2 }
 0x1b1   :  { %v5276_v0 = vld [vmem:[#allocation12 + $0x30] sm:$0xff] }
 0x1b2   :  { %3285 = vmatpush.bf16.msra.mxu0 %v5276_v0 }
 0x1b3   :  { %v2736_v1 = vpop.f32.mrf.mxu3 }
 0x1b4   :  { %v5275_v1 = vld [vmem:[#allocation12 + $0x28] sm:$0xff] }
 0x1b6   :  { %3286 = vmatpush.bf16.msra.mxu0 %v5275_v1 }
 0x1ba   :  { %3287 = vmatpush.bf16.msra.mxu0 %v5274_v52 }
 0x1be   :  { %3288 = vmatpush.bf16.msra.mxu0 %v5273_v2 }
 0x1c0   :  { %v2747_v5 = vpop.f32.mrf.mxu0 }
 0x1c1   :  { %v2748_v32 = vadd.f32 %v2747_v5, %v2735_v4 }
 0x1c2   :  { %v2760_v29 = vpop.f32.mrf.mxu1  ;;  %3289 = vmatpush.bf16.msra.mxu0 %v5272_v25 }
 0x1c3   :  { %v2896_v46 = vmax.f32 %v2748_v32, 0.0  ;;  %v2761_v18 = vadd.f32 %v2760_v29, %v518_v50  ;;  %v5271_v32 = vld [vmem:[#allocation12 + $0x8] sm:$0xff]  ;;  %v5270_v29 = vld [vmem:[#allocation12] sm:$0xff] }
 0x1c5   :  { %v2900_v9 = vpack.c.bf16 %v2896_v46, %v2896_v46 }
 0x1c6   :  { %3290 = vmatpush.bf16.msra.mxu0 %v5271_v32 }
 0x1c7   :  { %3196 = vmatmul.bf16.vlgmr.msrb.gmra.mxu2 %v2900_v9 }
 0x1c8   :  { %v2773_v49 = vpop.f32.mrf.mxu2  ;;  %v2749_v28 = vpop.f32.mrf.mxu0 }
 0x1c9   :  { %v2774_v20 = vadd.f32 %v2773_v49, %v2761_v18  ;;  %v5292_v28 = vld [vmem:[#allocation14] ss:$0 sm:$0xff] }
 0x1ca   :  { %v2762_v34 = vpop.f32.mrf.mxu1  ;;  %3291 = vmatpush.bf16.msra.mxu0 %v5270_v29 }
 0x1cb   :  { %v2786_v35 = vpop.f32.mrf.mxu3 }
 0x1cc   :  { %v2787_v47 = vadd.f32 %v2786_v35, %v2774_v20 }
 0x1d0   :  { %v2775_v13 = vpop.f32.mrf.mxu2 }
 0x1d3   :  { %v2788_v14 = vpop.f32.mrf.mxu3 }
 0x1e0   :  { %v2799_v38 = vpop.f32.mrf.mxu0 }
 0x1e1   :  { %v2800_v31 = vadd.f32 %v2799_v38, %v2787_v47 }
 0x1e2   :  { %v2812_v30 = vpop.f32.mrf.mxu1 }
 0x1e3   :  { %v2813_v36 = vadd.f32 %v2812_v30, %v2800_v31 }
 0x1e8   :  { %v2825_v42 = vpop.f32.mrf.mxu2  ;;  %v2801_v21 = vpop.f32.mrf.mxu0 }
 0x1e9   :  { %v2826_v37 = vadd.f32 %v2825_v42, %v2813_v36 }
 0x1ea   :  { %v2814_v23 = vpop.f32.mrf.mxu1 }
 0x1eb   :  { %v2838_v8 = vpop.f32.mrf.mxu3 }
 0x1ec   :  { %v2839_v39 = vadd.f32 %v2838_v8, %v2826_v37 }
 0x1f0   :  { %v2827_v24 = vpop.f32.mrf.mxu2 }
 0x1f3   :  { %v2840_v26 = vpop.f32.mrf.mxu3 }
 0x200   :  { %v2851_v40 = vpop.f32.mrf.mxu0 }
 0x201   :  { %v2852_v43 = vadd.f32 %v2851_v40, %v2839_v39 }
 0x202   :  { %v2864_v41 = vpop.f32.mrf.mxu1 }
 0x203   :  { %v2865_v44 = vadd.f32 %v2864_v41, %v2852_v43 }
 0x208   :  { %v2877_v54 = vpop.f32.mrf.mxu2  ;;  %v2853_v48 = vpop.f32.mrf.mxu0 }
 0x209   :  { %v2878_v6 = vadd.f32 %v2877_v54, %v2865_v44  ;;  %v2890_v45 = vpop.f32.mrf.mxu3 }
 0x20a   :  { %v2866_v51 = vpop.f32.mrf.mxu1 }
 0x20b   :  { %v2891_v10 = vadd.f32 %v2890_v45, %v2878_v6 }
 0x20d   :  { %v2897_v53 = vmax.f32 %v2891_v10, 0.0 }
 0x20f   :  { %v2901_v27 = vpack.c.bf16 %v2897_v53, %v2897_v53 }
 0x210   :  { %v2879_v55 = vpop.f32.mrf.mxu2 }
 0x211   :  { %v2892_v56 = vpop.f32.mrf.mxu3  ;;  %3209 = vmatmul.bf16.vlgmr.msrb.gmra.mxu3 %v2901_v27 }
 0x220   :  { %v3171_v7 = vpop.f32.mrf.mxu0 }
 0x221   :  { %v3172_v58 = vadd.f32 %v5291_v57, %v3171_v7 }
 0x222   :  { %v3184_v59 = vpop.f32.mrf.mxu1 }
 0x223   :  { %v3185_v60 = vadd.f32 %v3184_v59, %v3172_v58 }
 0x228   :  { %v3173_v61 = vpop.f32.mrf.mxu0 }
 0x22a   :  { %v3186_v62 = vpop.f32.mrf.mxu1 }
 0x24a   :  { %v3197_v3 = vpop.f32.mrf.mxu2 }
 0x24b   :  { %v3198_v4 = vadd.f32 %v3197_v3, %v3185_v60 }
 0x252   :  { %v3199_v5 = vpop.f32.mrf.mxu2 }
 0x294   :  { %v3210_v46 = vpop.f32.mrf.mxu3 }
 0x295   :  { %v3211_v9 = vadd.f32 %v3210_v46, %v3198_v4 }
 0x297   :  { %v3214_v49 = vmax.f32 %v3211_v9, 0.0 }
 0x299   :  { %v3215_v35 = vpack.c.bf16 %v3214_v49, %v3214_v49 }
 0x29b   :  { %3292 = vmatmul.bf16.vlgmr.msra.gmra.mxu0 %v3215_v35 }
 0x29c   :  { %v3212_v11 = vpop.f32.mrf.mxu3 }
 0x318   :  { %v3293_v12 = vpop.f32.mrf.mxu0 }
 0x319   :  { %v3294_v34 = vadd.f32 %v5292_v28, %v3293_v12 }
 0x31b   :  { %3297 = vst [vmem:[#allocation15] sm:$0xff] %v3294_v34 }
 0x31c   :  { %3308 = dma.vmem_to_hbm [thread:$0]  %s3304_s6, 128, %s3306_s14, [#allocation5]  }
 0x320   :  { %v3295_v33 = vpop.f32.mrf.mxu0 }
 0x321   :  { %5494 = dma.done.wait [#allocation5], 128  }
 0x322   :  { %5495 = vsyncadd [#allocation5], 4294967168 }
 0x323   :  { %3313 = vsyncpa [#allocation4], 1 }
 0x324   :  { %3314 = vsyncpa [#allocation7], 1 }
 0x325   :  { %3315 = vsyncpa [#allocation10], 1 }
 0x326   :  { %3316 = vsyncpa [#allocation13], 1 }
 0x327   :  { %3317 = vsyncpa [#allocation5], 1 }

// kernel: tpu_custom_call.1
= control target key start
LH: loop header
LB: loop body
LE: loop exit
PB: predicated region body
PF: predicated region fallthrough
CT: control target
= control target key end

     0   :  { %12 = vsyncpa [#allocation4], 0  ;;  %s5682_s0 = inlined_call_operand.hbm [shape: f32[8,1323], index: 0, kind: input, shape index: {}]   ;;  %s5683_s1 = inlined_call_operand.hbm [shape: bf16[1408,512], index: 1, kind: input, shape index: {}]   ;;  %s5684_s2 = inlined_call_operand.hbm [shape: f32[1,512], index: 2, kind: input, shape index: {}]   ;;  %s5685_s3 = inlined_call_operand.hbm [shape: bf16[512,128], index: 3, kind: input, shape index: {}]   ;;  %s5686_s4 = inlined_call_operand.hbm [shape: f32[1,128], index: 4, kind: input, shape index: {}]   ;;  %s5687_s5 = inlined_call_operand.hbm [shape: bf16[128,128], index: 5, kind: input, shape index: {}]   ;;  %s5688_s6 = inlined_call_operand.hbm [shape: f32[1,128], index: 6, kind: input, shape index: {}]   ;;  %s5689_s7 = inlined_call_operand.hbm [shape: f32[8,128], index: 7, kind: output, shape index: {}]  }
   0x1   :  { %13 = vsyncpa [#allocation7], 0 }
   0x2   :  { %14 = vsyncpa [#allocation10], 0 }
   0x3   :  { %15 = vsyncpa [#allocation13], 0  ;;  %s32_s26 = sshll.u32 %s5683_s1, 4  ;;  %s33_s26 = int_to_ptr.hbm [resolvable:$true] %s32_s26 }
   0x4   :  { %16 = vsyncpa [#allocation5], 0  ;;  %s5496_s27 = smov [#allocation6]   ;;  %s56_s8 = sshll.u32 %s5685_s3, 4  ;;  %s57_s8 = int_to_ptr.hbm [resolvable:$true] %s56_s8 }
   0x5   :  { %s34_s28 = sshll.u32 %s5496_s27, 4  ;;  %s5497_s9 = smov 256   ;;  %s35_s28 = int_to_ptr.vmem [resolvable:$true] %s34_s28 }
   0x6   :  { %s5498_s10 = smov 16   ;;  %s5499_s11 = smov [#allocation9]  }
   0x7   :  { %40 = dma.hbm_to_vmem [thread:$0]  %s33_s26, 45056, %s35_s28, [#allocation7], %s5497_s9, %s5497_s9, %s5498_s10  }
   0x8   :  { %s58_s12 = sshll.u32 %s5499_s11, 4  ;;  %s5500_s13 = smov 64   ;;  %s59_s12 = int_to_ptr.vmem [resolvable:$true] %s58_s12 }
   0x9   :  { %s5501_s14 = smov 4   ;;  %s80_s16 = sshll.u32 %s5687_s5, 4  ;;  %s81_s16 = int_to_ptr.hbm [resolvable:$true] %s80_s16 }
   0xa   :  { %64 = dma.hbm_to_vmem [thread:$0]  %s57_s8, 4096, %s59_s12, [#allocation10], %s5500_s13, %s5500_s13, %s5501_s14  }
   0xb   :  { %s5502_s17 = smov [#allocation12]   ;;  %s22_s20 = sshll.u32 %s5682_s0, 4  ;;  %s23_s20 = int_to_ptr.hbm [resolvable:$true] %s22_s20 }
   0xc   :  { %s82_s18 = sshll.u32 %s5502_s17, 4  ;;  %s5503_s21 = smov [#allocation3]   ;;  %s83_s18 = int_to_ptr.vmem [resolvable:$true] %s82_s18 }
   0xd   :  { %88 = dma.hbm_to_vmem [thread:$0]  %s81_s16, 1024, %s83_s18, [#allocation13], %s5500_s13, %s5500_s13, %s5501_s14  }
   0xe   :  { %s24_s22 = sshll.u32 %s5503_s21, 4  ;;  %s46_s25 = sshll.u32 %s5684_s2, 4  ;;  %s25_s22 = int_to_ptr.vmem [resolvable:$true] %s24_s22  ;;  %s47_s25 = int_to_ptr.hbm [resolvable:$true] %s46_s25 }
   0xf   :  { %27 = dma.hbm_to_vmem [thread:$0]  %s23_s20, 1408, %s25_s22, [#allocation4]  }
  0x10   :  { %s70_s27 = sshll.u32 %s5686_s4, 4  ;;  %s5504_s28 = smov [#allocation8]   ;;  %s71_s27 = int_to_ptr.hbm [resolvable:$true] %s70_s27 }
  0x11   :  { %s48_s29 = sshll.u32 %s5504_s28, 4  ;;  %s5505_s0 = smov [#allocation11]   ;;  %s49_s29 = int_to_ptr.vmem [resolvable:$true] %s48_s29 }
  0x12   :  { %51 = dma.hbm_to_vmem [thread:$0]  %s47_s25, 64, %s49_s29, [#allocation7]  }
  0x13   :  { %s72_s30 = sshll.u32 %s5505_s0, 4  ;;  %s94_s10 = sshll.u32 %s5688_s6, 4  ;;  %s73_s30 = int_to_ptr.vmem [resolvable:$true] %s72_s30  ;;  %s95_s10 = int_to_ptr.hbm [resolvable:$true] %s94_s10 }
  0x14   :  { %75 = dma.hbm_to_vmem [thread:$0]  %s71_s27, 16, %s73_s30, [#allocation10]  }
  0x15   :  { %s5506_s2 = smov [#allocation14]  }
  0x16   :  { %s96_s11 = sshll.u32 %s5506_s2, 4  ;;  %s97_s11 = int_to_ptr.vmem [resolvable:$true] %s96_s11 }
  0x17   :  { %99 = dma.hbm_to_vmem [thread:$0]  %s95_s10, 16, %s97_s11, [#allocation13]  }
  0x18   :  { %5486 = dma.done.wait [#allocation4], 1408  }
  0x19   :  { %5487 = vsyncadd [#allocation4], 4294965888 }
  0x1a   :  { %5488 = dma.done.wait [#allocation7], 45120  }
  0x1b   :  { %5489 = vsyncadd [#allocation7], 4294922176 }
  0x1c   :  { %5490 = dma.done.wait [#allocation10], 4112  }
  0x1d   :  { %5491 = vsyncadd [#allocation10], 4294963184 }
  0x1e   :  { %5492 = dma.done.wait [#allocation13], 1040  }
  0x1f   :  { %5493 = vsyncadd [#allocation13], 4294966256  ;;  %v3432_v0 = vld [vmem:[#allocation6 + $0xe0] sm:$0xf]  ;;  %v4916_v1 = vld [vmem:[#allocation6 + $0xec] sm:$0xf0] }
  0x20   :  { %v3560_v2 = vld [vmem:[#allocation6 + $0x1e0] sm:$0xf]  ;;  %v3433_v3 = vor.u32 %v4916_v1, %v3432_v0  ;;  %v4948_v4 = vld [vmem:[#allocation6 + $0x1ec] sm:$0xf0]  ;;  %vm151_vm0 = vcmask 347136   ;;  %vm153_vm1 = vcmask 1043800  }
  0x21   :  { %v3688_v5 = vld [vmem:[#allocation6 + $0x2e0] sm:$0xf]  ;;  %v4980_v6 = vld [vmem:[#allocation6 + $0x2ec] sm:$0xf0]  ;;  %v3561_v7 = vor.u32 %v4948_v4, %v3560_v2  ;;  %s5508_s4 = smov [#allocation15]   ;;  %s3305_s14 = sshll.u32 %s5689_s7, 4  ;;  %s3306_s14 = int_to_ptr.hbm [resolvable:$true] %s3305_s14 }
  0x22   :  { %v3689_v8 = vor.u32 %v4980_v6, %v3688_v5  ;;  %v3816_v9 = vld [vmem:[#allocation6 + $0x3e0] sm:$0xf]  ;;  %v5012_v10 = vld [vmem:[#allocation6 + $0x3ec] sm:$0xf0]  ;;  %2322 = vmatpush.bf16.msra.mxu0 %v3433_v3  ;;  %s3303_s6 = sshll.u32 %s5508_s4, 4  ;;  %s3304_s6 = int_to_ptr.vmem [resolvable:$true] %s3303_s6 }
  0x23   :  { %v3416_v11 = vld [vmem:[#allocation6 + $0xc0] sm:$0xf]  ;;  %v3817_v12 = vor.u32 %v5012_v10, %v3816_v9  ;;  %v4912_v13 = vld [vmem:[#allocation6 + $0xcc] sm:$0xf0]  ;;  %2335 = vmatpush.bf16.msra.mxu1 %v3561_v7 }
  0x24   :  { %v3544_v14 = vld [vmem:[#allocation6 + $0x1c0] sm:$0xf]  ;;  %v4944_v15 = vld [vmem:[#allocation6 + $0x1cc] sm:$0xf0]  ;;  %2348 = vmatpush.bf16.msra.mxu2 %v3689_v8  ;;  %v3417_v16 = vor.u32 %v4912_v13, %v3416_v11 }
  0x25   :  { %v3545_v17 = vor.u32 %v4944_v15, %v3544_v14  ;;  %v3672_v18 = vld [vmem:[#allocation6 + $0x2c0] sm:$0xf]  ;;  %v4976_v19 = vld [vmem:[#allocation6 + $0x2cc] sm:$0xf0]  ;;  %2361 = vmatpush.bf16.msra.mxu3 %v3817_v12 }
  0x26   :  { %v3800_v20 = vld [vmem:[#allocation6 + $0x3c0] sm:$0xf]  ;;  %v3673_v21 = vor.u32 %v4976_v19, %v3672_v18  ;;  %v5008_v22 = vld [vmem:[#allocation6 + $0x3cc] sm:$0xf0]  ;;  %2323 = vmatpush.bf16.msra.mxu0 %v3417_v16 }
  0x27   :  { %v3400_v23 = vld [vmem:[#allocation6 + $0xa0] sm:$0xf]  ;;  %v4908_v24 = vld [vmem:[#allocation6 + $0xac] sm:$0xf0]  ;;  %v3801_v25 = vor.u32 %v5008_v22, %v3800_v20  ;;  %2336 = vmatpush.bf16.msra.mxu1 %v3545_v17 }
  0x28   :  { %v3528_v26 = vld [vmem:[#allocation6 + $0x1a0] sm:$0xf]  ;;  %v4940_v27 = vld [vmem:[#allocation6 + $0x1ac] sm:$0xf0]  ;;  %v3401_v29 = vor.u32 %v4908_v24, %v3400_v23  ;;  %2349 = vmatpush.bf16.msra.mxu2 %v3673_v21 }
  0x29   :  { %v3656_v28 = vld [vmem:[#allocation6 + $0x2a0] sm:$0xf]  ;;  %v4972_v30 = vld [vmem:[#allocation6 + $0x2ac] sm:$0xf0]  ;;  %v3529_v33 = vor.u32 %v4940_v27, %v3528_v26  ;;  %2362 = vmatpush.bf16.msra.mxu3 %v3801_v25 }
  0x2a   :  { %v3784_v31 = vld [vmem:[#allocation6 + $0x3a0] sm:$0xf]  ;;  %v5004_v32 = vld [vmem:[#allocation6 + $0x3ac] sm:$0xf0]  ;;  %v3657_v34 = vor.u32 %v4972_v30, %v3656_v28  ;;  %2324 = vmatpush.bf16.msra.mxu0 %v3401_v29 }
  0x2b   :  { %v3384_v35 = vld [vmem:[#allocation6 + $0x80] sm:$0xf]  ;;  %v4904_v36 = vld [vmem:[#allocation6 + $0x8c] sm:$0xf0]  ;;  %v3785_v38 = vor.u32 %v5004_v32, %v3784_v31  ;;  %2337 = vmatpush.bf16.msra.mxu1 %v3529_v33 }
  0x2c   :  { %v3512_v37 = vld [vmem:[#allocation6 + $0x180] sm:$0xf]  ;;  %v4936_v39 = vld [vmem:[#allocation6 + $0x18c] sm:$0xf0]  ;;  %v3385_v44 = vor.u32 %v4904_v36, %v3384_v35  ;;  %2350 = vmatpush.bf16.msra.mxu2 %v3657_v34 }
  0x2d   :  { %v3640_v40 = vld [vmem:[#allocation6 + $0x280] sm:$0xf]  ;;  %v4968_v41 = vld [vmem:[#allocation6 + $0x28c] sm:$0xf0]  ;;  %v3513_v45 = vor.u32 %v4936_v39, %v3512_v37  ;;  %2363 = vmatpush.bf16.msra.mxu3 %v3785_v38 }
  0x2e   :  { %v3768_v42 = vld [vmem:[#allocation6 + $0x380] sm:$0xf]  ;;  %v5000_v43 = vld [vmem:[#allocation6 + $0x38c] sm:$0xf0]  ;;  %v3641_v46 = vor.u32 %v4968_v41, %v3640_v40  ;;  %2325 = vmatpush.bf16.msra.mxu0 %v3385_v44 }
  0x2f   :  { %v3368_v47 = vld [vmem:[#allocation6 + $0x60] sm:$0xf]  ;;  %v4900_v48 = vld [vmem:[#allocation6 + $0x6c] sm:$0xf0]  ;;  %v3769_v50 = vor.u32 %v5000_v43, %v3768_v42  ;;  %2338 = vmatpush.bf16.msra.mxu1 %v3513_v45 }
  0x30   :  { %v3496_v49 = vld [vmem:[#allocation6 + $0x160] sm:$0xf]  ;;  %v4932_v51 = vld [vmem:[#allocation6 + $0x16c] sm:$0xf0]  ;;  %v3369_v56 = vor.u32 %v4900_v48, %v3368_v47  ;;  %2351 = vmatpush.bf16.msra.mxu2 %v3641_v46 }
  0x31   :  { %v3624_v52 = vld [vmem:[#allocation6 + $0x260] sm:$0xf]  ;;  %v4964_v53 = vld [vmem:[#allocation6 + $0x26c] sm:$0xf0]  ;;  %v3497_v57 = vor.u32 %v4932_v51, %v3496_v49  ;;  %2364 = vmatpush.bf16.msra.mxu3 %v3769_v50 }
  0x32   :  { %v3752_v54 = vld [vmem:[#allocation6 + $0x360] sm:$0xf]  ;;  %v4996_v55 = vld [vmem:[#allocation6 + $0x36c] sm:$0xf0]  ;;  %v3625_v58 = vor.u32 %v4964_v53, %v3624_v52  ;;  %2326 = vmatpush.bf16.msra.mxu0 %v3369_v56 }
  0x33   :  { %v3352_v59 = vld [vmem:[#allocation6 + $0x40] sm:$0xf]  ;;  %v4896_v60 = vld [vmem:[#allocation6 + $0x4c] sm:$0xf0]  ;;  %v3753_v62 = vor.u32 %v4996_v55, %v3752_v54  ;;  %2339 = vmatpush.bf16.msra.mxu1 %v3497_v57 }
  0x34   :  { %v3480_v61 = vld [vmem:[#allocation6 + $0x140] sm:$0xf]  ;;  %v4928_v63 = vld [vmem:[#allocation6 + $0x14c] sm:$0xf0]  ;;  %v3353_v4 = vor.u32 %v4896_v60, %v3352_v59  ;;  %2352 = vmatpush.bf16.msra.mxu2 %v3625_v58 }
  0x35   :  { %v3608_v0 = vld [vmem:[#allocation6 + $0x240] sm:$0xf]  ;;  %v4960_v1 = vld [vmem:[#allocation6 + $0x24c] sm:$0xf0]  ;;  %v3481_v5 = vor.u32 %v4928_v63, %v3480_v61  ;;  %2365 = vmatpush.bf16.msra.mxu3 %v3753_v62 }
  0x36   :  { %v3736_v2 = vld [vmem:[#allocation6 + $0x340] sm:$0xf]  ;;  %v4992_v3 = vld [vmem:[#allocation6 + $0x34c] sm:$0xf0]  ;;  %v3609_v6 = vor.u32 %v4960_v1, %v3608_v0  ;;  %2327 = vmatpush.bf16.msra.mxu0 %v3353_v4  ;;  %v131_v4 = vld [vmem:[#allocation3 + $0x10] sm:$0xff] }
  0x37   :  { %v3336_v7 = vld [vmem:[#allocation6 + $0x20] sm:$0xf]  ;;  %v4892_v8 = vld [vmem:[#allocation6 + $0x2c] sm:$0xf0]  ;;  %v3737_v10 = vor.u32 %v4992_v3, %v3736_v2  ;;  %2340 = vmatpush.bf16.msra.mxu1 %v3481_v5 }
  0x38   :  { %v3464_v9 = vld [vmem:[#allocation6 + $0x120] sm:$0xf]  ;;  %v4924_v11 = vld [vmem:[#allocation6 + $0x12c] sm:$0xf0]  ;;  %v3337_v16 = vor.u32 %v4892_v8, %v3336_v7  ;;  %2353 = vmatpush.bf16.msra.mxu2 %v3609_v6 }
  0x39   :  { %v3592_v12 = vld [vmem:[#allocation6 + $0x220] sm:$0xf]  ;;  %v4956_v13 = vld [vmem:[#allocation6 + $0x22c] sm:$0xf0]  ;;  %v3465_v19 = vor.u32 %v4924_v11, %v3464_v9  ;;  %2366 = vmatpush.bf16.msra.mxu3 %v3737_v10  ;;  %v129_v10 = vld [vmem:[#allocation3] sm:$0xff] }
  0x3a   :  { %v3720_v14 = vld [vmem:[#allocation6 + $0x320] sm:$0xf]  ;;  %v4988_v15 = vld [vmem:[#allocation6 + $0x32c] sm:$0xf0]  ;;  %v3593_v20 = vor.u32 %v4956_v13, %v3592_v12  ;;  %2328 = vmatpush.bf16.msra.mxu0 %v3337_v16 }
  0x3b   :  { %v3320_v17 = vld [vmem:[#allocation6] sm:$0xf]  ;;  %v4888_v18 = vld [vmem:[#allocation6 + $0xc] sm:$0xf0]  ;;  %v3721_v24 = vor.u32 %v4988_v15, %v3720_v14  ;;  %2341 = vmatpush.bf16.msra.mxu1 %v3465_v19 }
  0x3c   :  { %v3448_v21 = vld [vmem:[#allocation6 + $0x100] sm:$0xf]  ;;  %v4920_v22 = vld [vmem:[#allocation6 + $0x10c] sm:$0xf0]  ;;  %v3321_v31 = vor.u32 %v4888_v18, %v3320_v17  ;;  %2354 = vmatpush.bf16.msra.mxu2 %v3593_v20 }
  0x3d   :  { %v3576_v23 = vld [vmem:[#allocation6 + $0x200] sm:$0xf]  ;;  %v4952_v25 = vld [vmem:[#allocation6 + $0x20c] sm:$0xf0]  ;;  %v3449_v35 = vor.u32 %v4920_v22, %v3448_v21  ;;  %2367 = vmatpush.bf16.msra.mxu3 %v3721_v24 }
  0x3e   :  { %v3704_v26 = vld [vmem:[#allocation6 + $0x300] sm:$0xf]  ;;  %v4984_v27 = vld [vmem:[#allocation6 + $0x30c] sm:$0xf0]  ;;  %v3577_v36 = vor.u32 %v4952_v25, %v3576_v23  ;;  %2329 = vmatpush.bf16.msra.mxu0 %v3321_v31 }
  0x3f   :  { %v3944_v28 = vld [vmem:[#allocation6 + $0x4e0] sm:$0xf]  ;;  %v5044_v29 = vld [vmem:[#allocation6 + $0x4ec] sm:$0xf0]  ;;  %v3705_v39 = vor.u32 %v4984_v27, %v3704_v26  ;;  %2342 = vmatpush.bf16.msra.mxu1 %v3449_v35 }
  0x40   :  { %v4072_v30 = vld [vmem:[#allocation6 + $0x5e0] sm:$0xf]  ;;  %v5076_v32 = vld [vmem:[#allocation6 + $0x5ec] sm:$0xf0]  ;;  %v3945_v40 = vor.u32 %v5044_v29, %v3944_v28  ;;  %2355 = vmatpush.bf16.msra.mxu2 %v3577_v36 }
  0x41   :  { %v4200_v33 = vld [vmem:[#allocation6 + $0x6e0] sm:$0xf]  ;;  %v5108_v34 = vld [vmem:[#allocation6 + $0x6ec] sm:$0xf0]  ;;  %v4073_v41 = vor.u32 %v5076_v32, %v4072_v30  ;;  %2368 = vmatpush.bf16.msra.mxu3 %v3705_v39  ;;  %v135_v39 = vld [vmem:[#allocation3 + $0x30] sm:$0xff] }
  0x42   :  { %v4328_v37 = vld [vmem:[#allocation6 + $0x7e0] sm:$0xf]  ;;  %v5140_v38 = vld [vmem:[#allocation6 + $0x7ec] sm:$0xf0]  ;;  %v4201_v42 = vor.u32 %v5108_v34, %v4200_v33  ;;  %2374 = vmatpush.bf16.msrb.mxu0 %v3945_v40 }
  0x43   :  { %v3928_v43 = vld [vmem:[#allocation6 + $0x4c0] sm:$0xf]  ;;  %v5040_v44 = vld [vmem:[#allocation6 + $0x4cc] sm:$0xf0]  ;;  %v4329_v46 = vor.u32 %v5140_v38, %v4328_v37  ;;  %2387 = vmatpush.bf16.msrb.mxu1 %v4073_v41 }
  0x44   :  { %v4056_v45 = vld [vmem:[#allocation6 + $0x5c0] sm:$0xf]  ;;  %v5072_v47 = vld [vmem:[#allocation6 + $0x5cc] sm:$0xf0]  ;;  %v3929_v52 = vor.u32 %v5040_v44, %v3928_v43  ;;  %2400 = vmatpush.bf16.msrb.mxu2 %v4201_v42 }
  0x45   :  { %v4184_v48 = vld [vmem:[#allocation6 + $0x6c0] sm:$0xf]  ;;  %v5104_v49 = vld [vmem:[#allocation6 + $0x6cc] sm:$0xf0]  ;;  %v4057_v54 = vor.u32 %v5072_v47, %v4056_v45  ;;  %2413 = vmatpush.bf16.msrb.mxu3 %v4329_v46 }
  0x46   :  { %v4312_v50 = vld [vmem:[#allocation6 + $0x7c0] sm:$0xf]  ;;  %v5136_v51 = vld [vmem:[#allocation6 + $0x7cc] sm:$0xf0]  ;;  %v4185_v55 = vor.u32 %v5104_v49, %v4184_v48  ;;  %2375 = vmatpush.bf16.msrb.mxu0 %v3929_v52 }
  0x47   :  { %v3912_v53 = vld [vmem:[#allocation6 + $0x4a0] sm:$0xf]  ;;  %v5036_v56 = vld [vmem:[#allocation6 + $0x4ac] sm:$0xf0]  ;;  %v4313_v59 = vor.u32 %v5136_v51, %v4312_v50  ;;  %2388 = vmatpush.bf16.msrb.mxu1 %v4057_v54 }
  0x48   :  { %v4040_v57 = vld [vmem:[#allocation6 + $0x5a0] sm:$0xf]  ;;  %v5068_v58 = vld [vmem:[#allocation6 + $0x5ac] sm:$0xf0]  ;;  %v3913_v2 = vor.u32 %v5036_v56, %v3912_v53  ;;  %2401 = vmatpush.bf16.msrb.mxu2 %v4185_v55 }
  0x49   :  { %v4168_v60 = vld [vmem:[#allocation6 + $0x6a0] sm:$0xf]  ;;  %v5100_v61 = vld [vmem:[#allocation6 + $0x6ac] sm:$0xf0]  ;;  %v4041_v6 = vor.u32 %v5068_v58, %v4040_v57  ;;  %2414 = vmatpush.bf16.msrb.mxu3 %v4313_v59 }
  0x4a   :  { %v4296_v62 = vld [vmem:[#allocation6 + $0x7a0] sm:$0xf]  ;;  %v5132_v63 = vld [vmem:[#allocation6 + $0x7ac] sm:$0xf0]  ;;  %v4169_v7 = vor.u32 %v5100_v61, %v4168_v60  ;;  %2376 = vmatpush.bf16.msrb.mxu0 %v3913_v2 }
  0x4b   :  { %v3896_v0 = vld [vmem:[#allocation6 + $0x480] sm:$0xf]  ;;  %v5032_v1 = vld [vmem:[#allocation6 + $0x48c] sm:$0xf0]  ;;  %v4297_v12 = vor.u32 %v5132_v63, %v4296_v62  ;;  %2389 = vmatpush.bf16.msrb.mxu1 %v4041_v6  ;;  %v133_v63 = vld [vmem:[#allocation3 + $0x20] sm:$0xff] }
  0x4c   :  { %v4024_v3 = vld [vmem:[#allocation6 + $0x580] sm:$0xf]  ;;  %v5064_v8 = vld [vmem:[#allocation6 + $0x58c] sm:$0xf0]  ;;  %v3897_v20 = vor.u32 %v5032_v1, %v3896_v0  ;;  %2402 = vmatpush.bf16.msrb.mxu2 %v4169_v7 }
  0x4d   :  { %v132_v5 = vld [vmem:[#allocation3 + $0x18] sm:$0xff]  ;;  %v130_v11 = vld [vmem:[#allocation3 + $0x8] sm:$0xff]  ;;  %v4025_v21 = vor.u32 %v5064_v8, %v4024_v3  ;;  %2415 = vmatpush.bf16.msrb.mxu3 %v4297_v12 }
  0x4e   :  { %v141_v9 = vpack.c.bf16 %v132_v5, %v131_v4  ;;  %v4152_v13 = vld [vmem:[#allocation6 + $0x680] sm:$0xf]  ;;  %v5096_v14 = vld [vmem:[#allocation6 + $0x68c] sm:$0xf0]  ;;  %v140_v15 = vpack.c.bf16 %v130_v11, %v129_v10  ;;  %2377 = vmatpush.bf16.msrb.mxu0 %v3897_v20 }
  0x4f   :  { %v4280_v16 = vld [vmem:[#allocation6 + $0x780] sm:$0xf]  ;;  %v5128_v17 = vld [vmem:[#allocation6 + $0x78c] sm:$0xf0]  ;;  %v4153_v24 = vor.u32 %v5096_v14, %v4152_v13  ;;  %2390 = vmatpush.bf16.msrb.mxu1 %v4025_v21 }
  0x50   :  { %v531_v18 = vunpack.c.l.b16 %v141_v9  ;;  %v532_v19 = vunpack.c.h.b16 %v141_v9  ;;  %v529_v22 = vunpack.c.l.b16 %v140_v15  ;;  %v530_v23 = vunpack.c.h.b16 %v140_v15  ;;  %v3880_v25 = vld [vmem:[#allocation6 + $0x460] sm:$0xf]  ;;  %v5028_v26 = vld [vmem:[#allocation6 + $0x46c] sm:$0xf0] }
  0x51   :  { %v4008_v27 = vld [vmem:[#allocation6 + $0x560] sm:$0xf]  ;;  %v4281_v30 = vor.u32 %v5128_v17, %v4280_v16  ;;  %v5060_v31 = vld [vmem:[#allocation6 + $0x56c] sm:$0xf0]  ;;  %v3881_v38 = vor.u32 %v5028_v26, %v3880_v25  ;;  %2403 = vmatpush.bf16.msrb.mxu2 %v4153_v24  ;;  %v4914_v26 = vld [vmem:[#allocation6 + $0xe4] sm:$0xf] }
  0x52   :  { %v5570_v28 = vpack.c.b16 %v531_v18, %v531_v18  ;;  %v5572_v29 = vpack.c.b16 %v532_v19, %v532_v19  ;;  %v4136_v32 = vld [vmem:[#allocation6 + $0x660] sm:$0xf]  ;;  %v5092_v33 = vld [vmem:[#allocation6 + $0x66c] sm:$0xf0]  ;;  %v5574_v34 = vpack.c.b16 %v529_v22, %v529_v22  ;;  %v5576_v35 = vpack.c.b16 %v530_v23, %v530_v23 }
  0x53   :  { %v4264_v36 = vld [vmem:[#allocation6 + $0x760] sm:$0xf]  ;;  %v5124_v37 = vld [vmem:[#allocation6 + $0x76c] sm:$0xf0]  ;;  %v4009_v41 = vor.u32 %v5060_v31, %v4008_v27  ;;  %v4137_v42 = vor.u32 %v5092_v33, %v4136_v32  ;;  %2416 = vmatpush.bf16.msrb.mxu3 %v4281_v30  ;;  %2378 = vmatpush.bf16.msrb.mxu0 %v3881_v38  ;;  %v3434_v27 = vld [vmem:[#allocation6 + $0xf0] sm:$0xf0] }
  0x54   :  { %2356 = vmatmul.bf16.vlgmr.msra.gmra.mxu2 %v5570_v28  ;;  %2369 = vmatmul.bf16.vlgmr.msra.gmra.mxu3 %v5572_v29  ;;  %v136_v40 = vld [vmem:[#allocation3 + $0x38] sm:$0xff]  ;;  %v5024_v44 = vld [vmem:[#allocation6 + $0x44c] sm:$0xf0]  ;;  %v4265_v46 = vor.u32 %v5124_v37, %v4264_v36 }
  0x55   :  { %2343 = vmatmul.bf16.vlgmr.msra.gmra.mxu1 %v5576_v35  ;;  %v3864_v43 = vld [vmem:[#allocation6 + $0x440] sm:$0xf]  ;;  %v5056_v47 = vld [vmem:[#allocation6 + $0x54c] sm:$0xf0]  ;;  %2330 = vmatmul.bf16.vlgmr.msra.gmra.mxu0 %v5574_v34  ;;  %v5582_v52 = vpack.c.bf16 %v136_v40, %v135_v39 }
  0x56   :  { %v3992_v45 = vld [vmem:[#allocation6 + $0x540] sm:$0xf]  ;;  %v5088_v49 = vld [vmem:[#allocation6 + $0x64c] sm:$0xf0]  ;;  %v3865_v53 = vor.u32 %v5024_v44, %v3864_v43  ;;  %2391 = vmatpush.bf16.msrb.mxu1 %v4009_v41  ;;  %2404 = vmatpush.bf16.msrb.mxu2 %v4137_v42  ;;  %v3437_v42 = vor.u32 %v4914_v26, %v3434_v27 }
  0x57   :  { %v4120_v48 = vld [vmem:[#allocation6 + $0x640] sm:$0xf]  ;;  %v5120_v51 = vld [vmem:[#allocation6 + $0x74c] sm:$0xf0]  ;;  %v3993_v56 = vor.u32 %v5056_v47, %v3992_v45  ;;  %2417 = vmatpush.bf16.msrb.mxu3 %v4265_v46  ;;  %v535_v23 = vunpack.c.l.b16 %v5582_v52  ;;  %v536_v31 = vunpack.c.h.b16 %v5582_v52  ;;  %v4910_v47 = vld [vmem:[#allocation6 + $0xc4] sm:$0xf] }
  0x58   :  { %v4248_v50 = vld [vmem:[#allocation6 + $0x740] sm:$0xf]  ;;  %v5020_v55 = vld [vmem:[#allocation6 + $0x42c] sm:$0xf0]  ;;  %v4121_v57 = vor.u32 %v5088_v49, %v4120_v48  ;;  %2379 = vmatpush.bf16.msrb.mxu0 %v3865_v53  ;;  %v3418_v48 = vld [vmem:[#allocation6 + $0xd0] sm:$0xf0] }
  0x59   :  { %v3848_v54 = vld [vmem:[#allocation6 + $0x420] sm:$0xf]  ;;  %v5052_v59 = vld [vmem:[#allocation6 + $0x52c] sm:$0xf0]  ;;  %v4249_v60 = vor.u32 %v5120_v51, %v4248_v50  ;;  %v5586_v46 = vpack.c.b16 %v535_v23, %v535_v23  ;;  %v5590_v50 = vpack.c.b16 %v536_v31, %v536_v31  ;;  %v139_v53 = vld [vmem:[#allocation3 + $0x50] sm:$0xff] }
  0x5a   :  { %v3976_v58 = vld [vmem:[#allocation6 + $0x520] sm:$0xf]  ;;  %v5084_v62 = vld [vmem:[#allocation6 + $0x62c] sm:$0xf0]  ;;  %v3849_v3 = vor.u32 %v5020_v55, %v3848_v54  ;;  %2392 = vmatpush.bf16.msrb.mxu1 %v3993_v56  ;;  %2405 = vmatpush.bf16.msrb.mxu2 %v4121_v57  ;;  %v3370_v31 = vld [vmem:[#allocation6 + $0x70] sm:$0xf0] }
  0x5b   :  { %v4104_v61 = vld [vmem:[#allocation6 + $0x620] sm:$0xf]  ;;  %v5116_v1 = vld [vmem:[#allocation6 + $0x72c] sm:$0xf0]  ;;  %v3977_v7 = vor.u32 %v5052_v59, %v3976_v58  ;;  %2418 = vmatpush.bf16.msrb.mxu3 %v4249_v60  ;;  %v3421_v59 = vor.u32 %v4910_v47, %v3418_v48 }
  0x5c   :  { %v4232_v0 = vld [vmem:[#allocation6 + $0x720] sm:$0xf]  ;;  %v5016_v4 = vld [vmem:[#allocation6 + $0x40c] sm:$0xf0]  ;;  %v4105_v8 = vor.u32 %v5084_v62, %v4104_v61  ;;  %2380 = vmatpush.bf16.msrb.mxu0 %v3849_v3 }
  0x5d   :  { %v3832_v2 = vld [vmem:[#allocation6 + $0x400] sm:$0xf]  ;;  %v134_v6 = vld [vmem:[#allocation3 + $0x28] sm:$0xff]  ;;  %v4233_v13 = vor.u32 %v5116_v1, %v4232_v0  ;;  %v145_v1 = vpack.c.bf16 %v139_v53, %v139_v53 }
  0x5e   :  { %v3960_v5 = vld [vmem:[#allocation6 + $0x500] sm:$0xf]  ;;  %v5048_v9 = vld [vmem:[#allocation6 + $0x50c] sm:$0xf0]  ;;  %v142_v12 = vpack.c.bf16 %v134_v6, %v133_v63  ;;  %v3833_v19 = vor.u32 %v5016_v4, %v3832_v2  ;;  %2393 = vmatpush.bf16.msrb.mxu1 %v3977_v7  ;;  %2406 = vmatpush.bf16.msrb.mxu2 %v4105_v8  ;;  %v4906_v63 = vld [vmem:[#allocation6 + $0xa4] sm:$0xf] }
  0x5f   :  { %v4088_v10 = vld [vmem:[#allocation6 + $0x600] sm:$0xf]  ;;  %v5080_v11 = vld [vmem:[#allocation6 + $0x60c] sm:$0xf0]  ;;  %v3961_v24 = vor.u32 %v5048_v9, %v3960_v5  ;;  %2419 = vmatpush.bf16.msrb.mxu3 %v4233_v13  ;;  %v3402_v0 = vld [vmem:[#allocation6 + $0xb0] sm:$0xf0] }
  0x60   :  { %v4216_v14 = vld [vmem:[#allocation6 + $0x700] sm:$0xf]  ;;  %v5112_v15 = vld [vmem:[#allocation6 + $0x70c] sm:$0xf0]  ;;  %v4089_v25 = vor.u32 %v5080_v11, %v4088_v10  ;;  %v533_v30 = vunpack.c.l.b16 %v142_v12  ;;  %v534_v36 = vunpack.c.h.b16 %v142_v12  ;;  %2381 = vmatpush.bf16.msrb.mxu0 %v3833_v19  ;;  %v3405_v10 = vor.u32 %v4906_v63, %v3402_v0  ;;  %v4902_v12 = vld [vmem:[#allocation6 + $0x84] sm:$0xf] }
  0x61   :  { %v4456_v16 = vld [vmem:[#allocation6 + $0x8e0] sm:$0xf]  ;;  %v5172_v17 = vld [vmem:[#allocation6 + $0x8ec] sm:$0xf0]  ;;  %v4217_v32 = vor.u32 %v5112_v15, %v4216_v14  ;;  %v137_v13 = vld [vmem:[#allocation3 + $0x40] sm:$0xff]  ;;  %v5507_v19 = vmov 0  }
  0x62   :  { %v4584_v18 = vld [vmem:[#allocation6 + $0x9e0] sm:$0xf]  ;;  %v5204_v20 = vld [vmem:[#allocation6 + $0x9ec] sm:$0xf0]  ;;  %v4457_v33 = vor.u32 %v5172_v17, %v4456_v16  ;;  %2394 = vmatpush.bf16.msrb.mxu1 %v3961_v24  ;;  %2407 = vmatpush.bf16.msrb.mxu2 %v4089_v25  ;;  %v5588_v49 = vpack.c.b16 %v533_v30, %v533_v30  ;;  %v5592_v52 = vpack.c.b16 %v534_v36, %v534_v36  ;;  %v3386_v14 = vld [vmem:[#allocation6 + $0x90] sm:$0xf0] }
  0x63   :  { %v4712_v21 = vld [vmem:[#allocation6 + $0xae0] sm:$0xf]  ;;  %v5236_v22 = vld [vmem:[#allocation6 + $0xaec] sm:$0xf0]  ;;  %v4585_v37 = vor.u32 %v5204_v20, %v4584_v18  ;;  %2420 = vmatpush.bf16.msrb.mxu3 %v4217_v32  ;;  %152 = vst.msk [vmem:[#allocation2 + $0x28] sm:$0xf] %vm151_vm0, %v145_v1  ;;  %v3389_v25 = vor.u32 %v4902_v12, %v3386_v14 }
  0x64   :  { %v4713_v38 = vor.u32 %v5236_v22, %v4712_v21  ;;  %v4440_v39 = vld [vmem:[#allocation6 + $0x8c0] sm:$0xf]  ;;  %v5168_v40 = vld [vmem:[#allocation6 + $0x8cc] sm:$0xf0]  ;;  %2426 = vmatpush.bf16.msra.mxu0 %v4457_v33  ;;  %154 = vst.msk [vmem:[#allocation2 + $0x28] sm:$0xf] %vm153_vm1, %v5507_v19 }
  0x65   :  { %v4568_v41 = vld [vmem:[#allocation6 + $0x9c0] sm:$0xf]  ;;  %v5200_v43 = vld [vmem:[#allocation6 + $0x9cc] sm:$0xf0]  ;;  %v4441_v51 = vor.u32 %v5168_v40, %v4440_v39  ;;  %2408 = vmatmul.bf16.vlgmr.msrb.gmra.mxu2 %v5586_v46  ;;  %2382 = vmatmul.bf16.vlgmr.msrb.gmra.mxu0 %v5588_v49  ;;  %v4898_v30 = vld [vmem:[#allocation6 + $0x64] sm:$0xf] }
  0x66   :  { %v4696_v44 = vld [vmem:[#allocation6 + $0xac0] sm:$0xf]  ;;  %v5232_v45 = vld [vmem:[#allocation6 + $0xacc] sm:$0xf0]  ;;  %2439 = vmatpush.bf16.msra.mxu1 %v4585_v37  ;;  %2452 = vmatpush.bf16.msra.mxu2 %v4713_v38  ;;  %v4569_v54 = vor.u32 %v5200_v43, %v4568_v41  ;;  %v3373_v40 = vor.u32 %v4898_v30, %v3370_v31  ;;  %v3562_v12 = vld [vmem:[#allocation6 + $0x1f0] sm:$0xf0] }
  0x67   :  { %v4697_v55 = vor.u32 %v5232_v45, %v4696_v44  ;;  %v4424_v56 = vld [vmem:[#allocation6 + $0x8a0] sm:$0xf]  ;;  %v5164_v57 = vld [vmem:[#allocation6 + $0x8ac] sm:$0xf0]  ;;  %2465 = vmatpush.bf16.msra.mxu3 %v3437_v42  ;;  %2395 = vmatmul.bf16.vlgmr.msrb.gmra.mxu1 %v5592_v52  ;;  %v4894_v44 = vld [vmem:[#allocation6 + $0x44] sm:$0xf] }
  0x68   :  { %v4552_v58 = vld [vmem:[#allocation6 + $0x9a0] sm:$0xf]  ;;  %v5196_v60 = vld [vmem:[#allocation6 + $0x9ac] sm:$0xf0]  ;;  %2421 = vmatmul.bf16.vlgmr.msrb.gmra.mxu3 %v5590_v50  ;;  %2427 = vmatpush.bf16.msra.mxu0 %v4441_v51  ;;  %v4425_v2 = vor.u32 %v5164_v57, %v4424_v56  ;;  %v3354_v45 = vld [vmem:[#allocation6 + $0x50] sm:$0xf0] }
  0x69   :  { %v4680_v61 = vld [vmem:[#allocation6 + $0xaa0] sm:$0xf]  ;;  %v5228_v62 = vld [vmem:[#allocation6 + $0xaac] sm:$0xf0]  ;;  %v4553_v5 = vor.u32 %v5196_v60, %v4552_v58  ;;  %v3357_v56 = vor.u32 %v4894_v44, %v3354_v45  ;;  %v4890_v60 = vld [vmem:[#allocation6 + $0x24] sm:$0xf] }
  0x6a   :  { %v4408_v3 = vld [vmem:[#allocation6 + $0x880] sm:$0xf]  ;;  %v5160_v4 = vld [vmem:[#allocation6 + $0x88c] sm:$0xf0]  ;;  %2440 = vmatpush.bf16.msra.mxu1 %v4569_v54  ;;  %2453 = vmatpush.bf16.msra.mxu2 %v4697_v55  ;;  %v4681_v6 = vor.u32 %v5228_v62, %v4680_v61  ;;  %v3338_v61 = vld [vmem:[#allocation6 + $0x30] sm:$0xf0] }
  0x6b   :  { %v4536_v7 = vld [vmem:[#allocation6 + $0x980] sm:$0xf]  ;;  %v5192_v8 = vld [vmem:[#allocation6 + $0x98c] sm:$0xf0]  ;;  %2466 = vmatpush.bf16.msra.mxu3 %v3421_v59  ;;  %v4409_v16 = vor.u32 %v5160_v4, %v4408_v3  ;;  %v3930_v44 = vld [vmem:[#allocation6 + $0x4d0] sm:$0xf0] }
  0x6c   :  { %v4664_v9 = vld [vmem:[#allocation6 + $0xa80] sm:$0xf]  ;;  %v5224_v11 = vld [vmem:[#allocation6 + $0xa8c] sm:$0xf0]  ;;  %2428 = vmatpush.bf16.msra.mxu0 %v4425_v2  ;;  %v4537_v20 = vor.u32 %v5192_v8, %v4536_v7  ;;  %v3341_v7 = vor.u32 %v4890_v60, %v3338_v61  ;;  %v4886_v8 = vld [vmem:[#allocation6 + $0x4] sm:$0xf] }
  0x6d   :  { %v138_v15 = vld [vmem:[#allocation3 + $0x48] sm:$0xff]  ;;  %v4392_v17 = vld [vmem:[#allocation6 + $0x860] sm:$0xf]  ;;  %v4665_v21 = vor.u32 %v5224_v11, %v4664_v9  ;;  %v4946_v11 = vld [vmem:[#allocation6 + $0x1e4] sm:$0xf] }
  0x6e   :  { %v5599_v18 = vpack.c.bf16 %v138_v15, %v137_v13  ;;  %2441 = vmatpush.bf16.msra.mxu1 %v4553_v5  ;;  %2454 = vmatpush.bf16.msra.mxu2 %v4681_v6  ;;  %v5156_v22 = vld [vmem:[#allocation6 + $0x86c] sm:$0xf0]  ;;  %v4520_v23 = vld [vmem:[#allocation6 + $0x960] sm:$0xf]  ;;  %v3322_v9 = vld [vmem:[#allocation6 + $0x10] sm:$0xf0] }
  0x6f   :  { %v5188_v24 = vld [vmem:[#allocation6 + $0x96c] sm:$0xf0]  ;;  %2467 = vmatpush.bf16.msra.mxu3 %v3405_v10  ;;  %v4648_v26 = vld [vmem:[#allocation6 + $0xa60] sm:$0xf]  ;;  %v4393_v32 = vor.u32 %v5156_v22, %v4392_v17  ;;  %v160_v10 = vld [vmem:[#allocation2 + $0x28] sm:$0xf] }
  0x70   :  { %v5220_v27 = vld [vmem:[#allocation6 + $0xa6c] sm:$0xf0]  ;;  %2429 = vmatpush.bf16.msra.mxu0 %v4409_v16  ;;  %v4521_v33 = vor.u32 %v5188_v24, %v4520_v23  ;;  %v4376_v37 = vld [vmem:[#allocation6 + $0x840] sm:$0xf]  ;;  %v4978_v13 = vld [vmem:[#allocation6 + $0x2e4] sm:$0xf]  ;;  %v537_v19 = vunpack.c.l.b16 %v5599_v18  ;;  %v539_v24 = vunpack.c.l.b16 %v160_v10 }
  0x71   :  { %v4649_v36 = vor.u32 %v5220_v27, %v4648_v26  ;;  %v5152_v38 = vld [vmem:[#allocation6 + $0x84c] sm:$0xf0]  ;;  %v4504_v39 = vld [vmem:[#allocation6 + $0x940] sm:$0xf]  ;;  %v3690_v15 = vld [vmem:[#allocation6 + $0x2f0] sm:$0xf0]  ;;  %v3325_v26 = vor.u32 %v4886_v8, %v3322_v9  ;;  %v3565_v27 = vor.u32 %v4946_v11, %v3562_v12 }
  0x72   :  { %2442 = vmatpush.bf16.msra.mxu1 %v4537_v20  ;;  %2455 = vmatpush.bf16.msra.mxu2 %v4665_v21  ;;  %v5184_v41 = vld [vmem:[#allocation6 + $0x94c] sm:$0xf0]  ;;  %v4632_v42 = vld [vmem:[#allocation6 + $0xa40] sm:$0xf]  ;;  %v4377_v47 = vor.u32 %v5152_v38, %v4376_v37  ;;  %v5010_v16 = vld [vmem:[#allocation6 + $0x3e4] sm:$0xf]  ;;  %v3693_v30 = vor.u32 %v4978_v13, %v3690_v15  ;;  %v5603_v38 = vpack.c.b16 %v537_v19, %v537_v19 }
  0x73   :  { %2468 = vmatpush.bf16.msra.mxu3 %v3389_v25  ;;  %v5216_v43 = vld [vmem:[#allocation6 + $0xa4c] sm:$0xf0]  ;;  %v4505_v48 = vor.u32 %v5184_v41, %v4504_v39  ;;  %v4360_v53 = vld [vmem:[#allocation6 + $0x820] sm:$0xf]  ;;  %v3818_v17 = vld [vmem:[#allocation6 + $0x3f0] sm:$0xf0]  ;;  %v538_v25 = vunpack.c.h.b16 %v5599_v18 }
  0x74   :  { %2430 = vmatpush.bf16.msra.mxu0 %v4393_v32  ;;  %v4633_v51 = vor.u32 %v5216_v43, %v4632_v42  ;;  %v5148_v54 = vld [vmem:[#allocation6 + $0x82c] sm:$0xf0]  ;;  %v4488_v55 = vld [vmem:[#allocation6 + $0x920] sm:$0xf]  ;;  %v5042_v22 = vld [vmem:[#allocation6 + $0x4e4] sm:$0xf]  ;;  %v3821_v31 = vor.u32 %v5010_v16, %v3818_v17  ;;  %v5605_v42 = vpack.c.b16 %v539_v24, %v539_v24 }
  0x75   :  { %v5180_v57 = vld [vmem:[#allocation6 + $0x92c] sm:$0xf0]  ;;  %v4616_v58 = vld [vmem:[#allocation6 + $0xa20] sm:$0xf]  ;;  %v4361_v62 = vor.u32 %v5148_v54, %v4360_v53  ;;  %v3946_v23 = vld [vmem:[#allocation6 + $0x4f0] sm:$0xf0]  ;;  %v5607_v18 = vpack.c.b16 %v538_v25, %v538_v25 }
  0x76   :  { %2443 = vmatpush.bf16.msra.mxu1 %v4521_v33  ;;  %2456 = vmatpush.bf16.msra.mxu2 %v4649_v36  ;;  %v5212_v59 = vld [vmem:[#allocation6 + $0xa2c] sm:$0xf0]  ;;  %v4344_v63 = vld [vmem:[#allocation6 + $0x800] sm:$0xf]  ;;  %v4489_v2 = vor.u32 %v5180_v57, %v4488_v55  ;;  %v4942_v32 = vld [vmem:[#allocation6 + $0x1c4] sm:$0xf]  ;;  %v3949_v37 = vor.u32 %v5042_v22, %v3946_v23 }
  0x77   :  { %2469 = vmatpush.bf16.msra.mxu3 %v3373_v40  ;;  %v5144_v0 = vld [vmem:[#allocation6 + $0x80c] sm:$0xf0]  ;;  %v4472_v1 = vld [vmem:[#allocation6 + $0x900] sm:$0xf]  ;;  %v4617_v3 = vor.u32 %v5212_v59, %v4616_v58  ;;  %v3546_v33 = vld [vmem:[#allocation6 + $0x1d0] sm:$0xf0] }
  0x78   :  { %2431 = vmatpush.bf16.msra.mxu0 %v4377_v47  ;;  %v5176_v4 = vld [vmem:[#allocation6 + $0x90c] sm:$0xf0]  ;;  %v4600_v5 = vld [vmem:[#allocation6 + $0xa00] sm:$0xf]  ;;  %v4345_v14 = vor.u32 %v5144_v0, %v4344_v63  ;;  %v4974_v36 = vld [vmem:[#allocation6 + $0x2c4] sm:$0xf]  ;;  %v3549_v45 = vor.u32 %v4942_v32, %v3546_v33 }
  0x79   :  { %v5208_v6 = vld [vmem:[#allocation6 + $0xa0c] sm:$0xf0]  ;;  %v4473_v20 = vor.u32 %v5176_v4, %v4472_v1  ;;  %v3674_v39 = vld [vmem:[#allocation6 + $0x2d0] sm:$0xf0]  ;;  %v5006_v40 = vld [vmem:[#allocation6 + $0x3c4] sm:$0xf] }
  0x7a   :  { %2444 = vmatpush.bf16.msra.mxu1 %v4505_v48  ;;  %2457 = vmatpush.bf16.msra.mxu2 %v4633_v51  ;;  %v4601_v21 = vor.u32 %v5208_v6, %v4600_v5  ;;  %v3802_v41 = vld [vmem:[#allocation6 + $0x3d0] sm:$0xf0]  ;;  %v5038_v43 = vld [vmem:[#allocation6 + $0x4c4] sm:$0xf]  ;;  %v3677_v47 = vor.u32 %v4974_v36, %v3674_v39 }
  0x7b   :  { %2470 = vmatpush.bf16.msra.mxu3 %v3357_v56  ;;  %v3805_v48 = vor.u32 %v5006_v40, %v3802_v41  ;;  %v4938_v51 = vld [vmem:[#allocation6 + $0x1a4] sm:$0xf]  ;;  %v3530_v53 = vld [vmem:[#allocation6 + $0x1b0] sm:$0xf0]  ;;  %v3933_v55 = vor.u32 %v5038_v43, %v3930_v44 }
  0x7c   :  { %2432 = vmatpush.bf16.msra.mxu0 %v4361_v62  ;;  %v4970_v54 = vld [vmem:[#allocation6 + $0x2a4] sm:$0xf]  ;;  %v3658_v56 = vld [vmem:[#allocation6 + $0x2b0] sm:$0xf0]  ;;  %v3533_v61 = vor.u32 %v4938_v51, %v3530_v53 }
  0x7d   :  { %v5002_v57 = vld [vmem:[#allocation6 + $0x3a4] sm:$0xf]  ;;  %v3786_v58 = vld [vmem:[#allocation6 + $0x3b0] sm:$0xf0]  ;;  %v3661_v62 = vor.u32 %v4970_v54, %v3658_v56 }
  0x7e   :  { %2445 = vmatpush.bf16.msra.mxu1 %v4489_v2  ;;  %2458 = vmatpush.bf16.msra.mxu2 %v4617_v3  ;;  %v5034_v59 = vld [vmem:[#allocation6 + $0x4a4] sm:$0xf]  ;;  %v3914_v60 = vld [vmem:[#allocation6 + $0x4b0] sm:$0xf0]  ;;  %v3789_v63 = vor.u32 %v5002_v57, %v3786_v58 }
  0x7f   :  { %2471 = vmatpush.bf16.msra.mxu3 %v3341_v7  ;;  %v4934_v0 = vld [vmem:[#allocation6 + $0x184] sm:$0xf]  ;;  %v3514_v1 = vld [vmem:[#allocation6 + $0x190] sm:$0xf0]  ;;  %v3917_v3 = vor.u32 %v5034_v59, %v3914_v60 }
  0x80   :  { %2433 = vmatpush.bf16.msra.mxu0 %v4345_v14  ;;  %v4966_v2 = vld [vmem:[#allocation6 + $0x284] sm:$0xf]  ;;  %v3642_v4 = vld [vmem:[#allocation6 + $0x290] sm:$0xf0]  ;;  %v3517_v9 = vor.u32 %v4934_v0, %v3514_v1 }
  0x81   :  { %v4998_v5 = vld [vmem:[#allocation6 + $0x384] sm:$0xf]  ;;  %v3770_v6 = vld [vmem:[#allocation6 + $0x390] sm:$0xf0]  ;;  %v3645_v10 = vor.u32 %v4966_v2, %v3642_v4 }
  0x82   :  { %2446 = vmatpush.bf16.msra.mxu1 %v4473_v20  ;;  %2459 = vmatpush.bf16.msra.mxu2 %v4601_v21  ;;  %v5030_v7 = vld [vmem:[#allocation6 + $0x484] sm:$0xf]  ;;  %v3898_v8 = vld [vmem:[#allocation6 + $0x490] sm:$0xf0]  ;;  %v3773_v11 = vor.u32 %v4998_v5, %v3770_v6 }
  0x83   :  { %2472 = vmatpush.bf16.msra.mxu3 %v3325_v26  ;;  %2434 = vmatmul.bf16.vlgmr.msra.gmra.mxu0 %v5603_v38  ;;  %v4930_v12 = vld [vmem:[#allocation6 + $0x164] sm:$0xf]  ;;  %v3498_v13 = vld [vmem:[#allocation6 + $0x170] sm:$0xf0]  ;;  %v3901_v15 = vor.u32 %v5030_v7, %v3898_v8 }
  0x84   :  { %2478 = vmatpush.bf16.msrb.mxu0 %v3565_v27  ;;  %v4962_v14 = vld [vmem:[#allocation6 + $0x264] sm:$0xf]  ;;  %v3626_v16 = vld [vmem:[#allocation6 + $0x270] sm:$0xf0]  ;;  %v3501_v22 = vor.u32 %v4930_v12, %v3498_v13 }
  0x85   :  { %2460 = vmatmul.bf16.vlgmr.msra.gmra.mxu2 %v5605_v42  ;;  %2447 = vmatmul.bf16.vlgmr.msra.gmra.mxu1 %v5607_v18  ;;  %v4994_v17 = vld [vmem:[#allocation6 + $0x364] sm:$0xf]  ;;  %v3754_v19 = vld [vmem:[#allocation6 + $0x370] sm:$0xf0]  ;;  %v3629_v23 = vor.u32 %v4962_v14, %v3626_v16 }
  0x86   :  { %2491 = vmatpush.bf16.msrb.mxu1 %v3693_v30  ;;  %2504 = vmatpush.bf16.msrb.mxu2 %v3821_v31  ;;  %v5026_v20 = vld [vmem:[#allocation6 + $0x464] sm:$0xf]  ;;  %v3882_v21 = vld [vmem:[#allocation6 + $0x470] sm:$0xf0]  ;;  %v3757_v24 = vor.u32 %v4994_v17, %v3754_v19 }
  0x87   :  { %2517 = vmatpush.bf16.msrb.mxu3 %v3949_v37  ;;  %v4926_v25 = vld [vmem:[#allocation6 + $0x144] sm:$0xf]  ;;  %v3482_v26 = vld [vmem:[#allocation6 + $0x150] sm:$0xf0]  ;;  %v3885_v30 = vor.u32 %v5026_v20, %v3882_v21 }
  0x88   :  { %2479 = vmatpush.bf16.msrb.mxu0 %v3549_v45  ;;  %2473 = vmatmul.bf16.vlgmr.msra.gmra.mxu3 %v5574_v34  ;;  %v4958_v27 = vld [vmem:[#allocation6 + $0x244] sm:$0xf]  ;;  %v3610_v31 = vld [vmem:[#allocation6 + $0x250] sm:$0xf0]  ;;  %v3485_v39 = vor.u32 %v4926_v25, %v3482_v26 }
  0x89   :  { %v4990_v32 = vld [vmem:[#allocation6 + $0x344] sm:$0xf]  ;;  %v3738_v33 = vld [vmem:[#allocation6 + $0x350] sm:$0xf0]  ;;  %v3613_v40 = vor.u32 %v4958_v27, %v3610_v31 }
  0x8a   :  { %2492 = vmatpush.bf16.msrb.mxu1 %v3677_v47  ;;  %2505 = vmatpush.bf16.msrb.mxu2 %v3805_v48  ;;  %v5022_v36 = vld [vmem:[#allocation6 + $0x444] sm:$0xf]  ;;  %v3866_v37 = vld [vmem:[#allocation6 + $0x450] sm:$0xf0]  ;;  %v3741_v41 = vor.u32 %v4990_v32, %v3738_v33 }
  0x8b   :  { %2518 = vmatpush.bf16.msrb.mxu3 %v3933_v55  ;;  %v4922_v43 = vld [vmem:[#allocation6 + $0x124] sm:$0xf]  ;;  %v3466_v44 = vld [vmem:[#allocation6 + $0x130] sm:$0xf0]  ;;  %v3869_v47 = vor.u32 %v5022_v36, %v3866_v37 }
  0x8c   :  { %2480 = vmatpush.bf16.msrb.mxu0 %v3533_v61  ;;  %v4954_v45 = vld [vmem:[#allocation6 + $0x224] sm:$0xf]  ;;  %v3594_v48 = vld [vmem:[#allocation6 + $0x230] sm:$0xf0]  ;;  %v3469_v56 = vor.u32 %v4922_v43, %v3466_v44 }
  0x8d   :  { %v4986_v51 = vld [vmem:[#allocation6 + $0x324] sm:$0xf]  ;;  %v3722_v53 = vld [vmem:[#allocation6 + $0x330] sm:$0xf0]  ;;  %v3597_v59 = vor.u32 %v4954_v45, %v3594_v48 }
  0x8e   :  { %2493 = vmatpush.bf16.msrb.mxu1 %v3661_v62  ;;  %2506 = vmatpush.bf16.msrb.mxu2 %v3789_v63  ;;  %v5018_v54 = vld [vmem:[#allocation6 + $0x424] sm:$0xf]  ;;  %v3850_v55 = vld [vmem:[#allocation6 + $0x430] sm:$0xf0]  ;;  %v3725_v60 = vor.u32 %v4986_v51, %v3722_v53 }
  0x8f   :  { %2519 = vmatpush.bf16.msrb.mxu3 %v3917_v3  ;;  %v4918_v57 = vld [vmem:[#allocation6 + $0x104] sm:$0xf]  ;;  %v3450_v58 = vld [vmem:[#allocation6 + $0x110] sm:$0xf0]  ;;  %v3853_v0 = vor.u32 %v5018_v54, %v3850_v55 }
  0x90   :  { %2481 = vmatpush.bf16.msrb.mxu0 %v3517_v9  ;;  %v4950_v61 = vld [vmem:[#allocation6 + $0x204] sm:$0xf]  ;;  %v3578_v62 = vld [vmem:[#allocation6 + $0x210] sm:$0xf0]  ;;  %v3453_v7 = vor.u32 %v4918_v57, %v3450_v58 }
  0x91   :  { %v4982_v63 = vld [vmem:[#allocation6 + $0x304] sm:$0xf]  ;;  %v3706_v1 = vld [vmem:[#allocation6 + $0x310] sm:$0xf0] }
  0x92   :  { %2494 = vmatpush.bf16.msrb.mxu1 %v3645_v10  ;;  %2507 = vmatpush.bf16.msrb.mxu2 %v3773_v11  ;;  %v5014_v2 = vld [vmem:[#allocation6 + $0x404] sm:$0xf]  ;;  %v3834_v3 = vld [vmem:[#allocation6 + $0x410] sm:$0xf0]  ;;  %v3581_v11 = vor.u32 %v4950_v61, %v3578_v62  ;;  %v3709_v12 = vor.u32 %v4982_v63, %v3706_v1 }
  0x93   :  { %2520 = vmatpush.bf16.msrb.mxu3 %v3901_v15  ;;  %v5074_v4 = vld [vmem:[#allocation6 + $0x5e4] sm:$0xf]  ;;  %v4074_v5 = vld [vmem:[#allocation6 + $0x5f0] sm:$0xf0]  ;;  %v3837_v15 = vor.u32 %v5014_v2, %v3834_v3 }
  0x94   :  { %2482 = vmatpush.bf16.msrb.mxu0 %v3501_v22  ;;  %v5106_v6 = vld [vmem:[#allocation6 + $0x6e4] sm:$0xf]  ;;  %v4202_v8 = vld [vmem:[#allocation6 + $0x6f0] sm:$0xf0]  ;;  %v4077_v16 = vor.u32 %v5074_v4, %v4074_v5 }
  0x95   :  { %v5138_v9 = vld [vmem:[#allocation6 + $0x7e4] sm:$0xf]  ;;  %v4330_v10 = vld [vmem:[#allocation6 + $0x7f0] sm:$0xf0]  ;;  %v4205_v17 = vor.u32 %v5106_v6, %v4202_v8 }
  0x96   :  { %2495 = vmatpush.bf16.msrb.mxu1 %v3629_v23  ;;  %2508 = vmatpush.bf16.msrb.mxu2 %v3757_v24  ;;  %v5170_v13 = vld [vmem:[#allocation6 + $0x8e4] sm:$0xf]  ;;  %v4458_v14 = vld [vmem:[#allocation6 + $0x8f0] sm:$0xf0]  ;;  %v4333_v19 = vor.u32 %v5138_v9, %v4330_v10 }
  0x97   :  { %2521 = vmatpush.bf16.msrb.mxu3 %v3885_v30  ;;  %v5070_v20 = vld [vmem:[#allocation6 + $0x5c4] sm:$0xf]  ;;  %v4058_v21 = vld [vmem:[#allocation6 + $0x5d0] sm:$0xf0]  ;;  %v4461_v23 = vor.u32 %v5170_v13, %v4458_v14 }
  0x98   :  { %2483 = vmatpush.bf16.msrb.mxu0 %v3485_v39  ;;  %v5102_v22 = vld [vmem:[#allocation6 + $0x6c4] sm:$0xf]  ;;  %v4186_v24 = vld [vmem:[#allocation6 + $0x6d0] sm:$0xf0]  ;;  %v4061_v31 = vor.u32 %v5070_v20, %v4058_v21 }
  0x99   :  { %v5134_v25 = vld [vmem:[#allocation6 + $0x7c4] sm:$0xf]  ;;  %v4314_v26 = vld [vmem:[#allocation6 + $0x7d0] sm:$0xf0]  ;;  %v4189_v32 = vor.u32 %v5102_v22, %v4186_v24 }
  0x9a   :  { %2496 = vmatpush.bf16.msrb.mxu1 %v3613_v40  ;;  %2509 = vmatpush.bf16.msrb.mxu2 %v3741_v41  ;;  %v5166_v27 = vld [vmem:[#allocation6 + $0x8c4] sm:$0xf]  ;;  %v4442_v30 = vld [vmem:[#allocation6 + $0x8d0] sm:$0xf0]  ;;  %v4317_v33 = vor.u32 %v5134_v25, %v4314_v26 }
  0x9b   :  { %2522 = vmatpush.bf16.msrb.mxu3 %v3869_v47  ;;  %v5066_v36 = vld [vmem:[#allocation6 + $0x5a4] sm:$0xf]  ;;  %v4042_v37 = vld [vmem:[#allocation6 + $0x5b0] sm:$0xf0]  ;;  %v4445_v40 = vor.u32 %v5166_v27, %v4442_v30 }
  0x9c   :  { %2484 = vmatpush.bf16.msrb.mxu0 %v3469_v56  ;;  %v5098_v39 = vld [vmem:[#allocation6 + $0x6a4] sm:$0xf]  ;;  %v4170_v41 = vld [vmem:[#allocation6 + $0x6b0] sm:$0xf0]  ;;  %v4045_v48 = vor.u32 %v5066_v36, %v4042_v37 }
  0x9d   :  { %v5130_v43 = vld [vmem:[#allocation6 + $0x7a4] sm:$0xf]  ;;  %v4298_v44 = vld [vmem:[#allocation6 + $0x7b0] sm:$0xf0]  ;;  %v4173_v51 = vor.u32 %v5098_v39, %v4170_v41 }
  0x9e   :  { %2497 = vmatpush.bf16.msrb.mxu1 %v3597_v59  ;;  %2510 = vmatpush.bf16.msrb.mxu2 %v3725_v60  ;;  %v5162_v45 = vld [vmem:[#allocation6 + $0x8a4] sm:$0xf]  ;;  %v4426_v47 = vld [vmem:[#allocation6 + $0x8b0] sm:$0xf0]  ;;  %v4301_v53 = vor.u32 %v5130_v43, %v4298_v44 }
  0x9f   :  { %2523 = vmatpush.bf16.msrb.mxu3 %v3853_v0  ;;  %v5062_v54 = vld [vmem:[#allocation6 + $0x584] sm:$0xf]  ;;  %v4026_v55 = vld [vmem:[#allocation6 + $0x590] sm:$0xf0]  ;;  %v4429_v57 = vor.u32 %v5162_v45, %v4426_v47 }
  0xa0   :  { %2485 = vmatpush.bf16.msrb.mxu0 %v3453_v7  ;;  %v5094_v56 = vld [vmem:[#allocation6 + $0x684] sm:$0xf]  ;;  %v4154_v58 = vld [vmem:[#allocation6 + $0x690] sm:$0xf0]  ;;  %v4029_v63 = vor.u32 %v5062_v54, %v4026_v55 }
  0xa1   :  { %v5126_v59 = vld [vmem:[#allocation6 + $0x784] sm:$0xf]  ;;  %v4282_v60 = vld [vmem:[#allocation6 + $0x790] sm:$0xf0]  ;;  %v4157_v0 = vor.u32 %v5094_v56, %v4154_v58 }
  0xa2   :  { %2498 = vmatpush.bf16.msrb.mxu1 %v3581_v11  ;;  %2511 = vmatpush.bf16.msrb.mxu2 %v3709_v12  ;;  %v5158_v61 = vld [vmem:[#allocation6 + $0x884] sm:$0xf]  ;;  %v4410_v62 = vld [vmem:[#allocation6 + $0x890] sm:$0xf0]  ;;  %v4285_v1 = vor.u32 %v5126_v59, %v4282_v60 }
  0xa3   :  { %2524 = vmatpush.bf16.msrb.mxu3 %v3837_v15  ;;  %2486 = vmatmul.bf16.vlgmr.msrb.gmra.mxu0 %v5576_v35  ;;  %v5058_v2 = vld [vmem:[#allocation6 + $0x564] sm:$0xf]  ;;  %v4010_v3 = vld [vmem:[#allocation6 + $0x570] sm:$0xf0]  ;;  %v4413_v5 = vor.u32 %v5158_v61, %v4410_v62 }
  0xa4   :  { %2530 = vmatpush.bf16.msra.mxu0 %v4077_v16  ;;  %v5090_v4 = vld [vmem:[#allocation6 + $0x664] sm:$0xf]  ;;  %v4138_v6 = vld [vmem:[#allocation6 + $0x670] sm:$0xf0]  ;;  %v4013_v11 = vor.u32 %v5058_v2, %v4010_v3  ;;  %v3568_v3 = vld [vmem:[#allocation6 + $0x1e8] sm:$0xf] }
  0xa5   :  { %2512 = vmatmul.bf16.vlgmr.msrb.gmra.mxu2 %v5572_v29  ;;  %2499 = vmatmul.bf16.vlgmr.msrb.gmra.mxu1 %v5570_v28  ;;  %v5122_v7 = vld [vmem:[#allocation6 + $0x764] sm:$0xf]  ;;  %v4266_v8 = vld [vmem:[#allocation6 + $0x770] sm:$0xf0]  ;;  %v4141_v12 = vor.u32 %v5090_v4, %v4138_v6  ;;  %v4949_v4 = vld [vmem:[#allocation6 + $0x1f4] sm:$0xf0] }
  0xa6   :  { %2543 = vmatpush.bf16.msra.mxu1 %v4205_v17  ;;  %2556 = vmatpush.bf16.msra.mxu2 %v4333_v19  ;;  %v5154_v9 = vld [vmem:[#allocation6 + $0x864] sm:$0xf]  ;;  %v4394_v10 = vld [vmem:[#allocation6 + $0x870] sm:$0xf0]  ;;  %v4269_v13 = vor.u32 %v5122_v7, %v4266_v8 }
  0xa7   :  { %2569 = vmatpush.bf16.msra.mxu3 %v4461_v23  ;;  %v5054_v14 = vld [vmem:[#allocation6 + $0x544] sm:$0xf]  ;;  %v3994_v15 = vld [vmem:[#allocation6 + $0x550] sm:$0xf0]  ;;  %v4397_v17 = vor.u32 %v5154_v9, %v4394_v10 }
  0xa8   :  { %2525 = vmatmul.bf16.vlgmr.msrb.gmra.mxu3 %v5588_v49  ;;  %2531 = vmatpush.bf16.msra.mxu0 %v4061_v31  ;;  %v5086_v16 = vld [vmem:[#allocation6 + $0x644] sm:$0xf]  ;;  %v4122_v19 = vld [vmem:[#allocation6 + $0x650] sm:$0xf0]  ;;  %v3997_v24 = vor.u32 %v5054_v14, %v3994_v15  ;;  %v3424_v14 = vld [vmem:[#allocation6 + $0xc8] sm:$0xf] }
  0xa9   :  { %v5118_v20 = vld [vmem:[#allocation6 + $0x744] sm:$0xf]  ;;  %v4250_v21 = vld [vmem:[#allocation6 + $0x750] sm:$0xf0]  ;;  %v4125_v25 = vor.u32 %v5086_v16, %v4122_v19  ;;  %v4913_v15 = vld [vmem:[#allocation6 + $0xd4] sm:$0xf0] }
  0xaa   :  { %2544 = vmatpush.bf16.msra.mxu1 %v4189_v32  ;;  %2557 = vmatpush.bf16.msra.mxu2 %v4317_v33  ;;  %v5150_v22 = vld [vmem:[#allocation6 + $0x844] sm:$0xf]  ;;  %v4378_v23 = vld [vmem:[#allocation6 + $0x850] sm:$0xf0]  ;;  %v4253_v26 = vor.u32 %v5118_v20, %v4250_v21  ;;  %v3552_v16 = vld [vmem:[#allocation6 + $0x1c8] sm:$0xf]  ;;  %v3425_v21 = vor.u32 %v4913_v15, %v3424_v14 }
  0xab   :  { %2570 = vmatpush.bf16.msra.mxu3 %v4445_v40  ;;  %v5050_v27 = vld [vmem:[#allocation6 + $0x524] sm:$0xf]  ;;  %v3978_v30 = vld [vmem:[#allocation6 + $0x530] sm:$0xf0]  ;;  %v4381_v32 = vor.u32 %v5150_v22, %v4378_v23 }
  0xac   :  { %2532 = vmatpush.bf16.msra.mxu0 %v4045_v48  ;;  %v5082_v31 = vld [vmem:[#allocation6 + $0x624] sm:$0xf]  ;;  %v4106_v33 = vld [vmem:[#allocation6 + $0x630] sm:$0xf0]  ;;  %v3981_v41 = vor.u32 %v5050_v27, %v3978_v30  ;;  %v3408_v27 = vld [vmem:[#allocation6 + $0xa8] sm:$0xf] }
  0xad   :  { %v5114_v36 = vld [vmem:[#allocation6 + $0x724] sm:$0xf]  ;;  %v4234_v37 = vld [vmem:[#allocation6 + $0x730] sm:$0xf0]  ;;  %v4109_v45 = vor.u32 %v5082_v31, %v4106_v33  ;;  %v4909_v30 = vld [vmem:[#allocation6 + $0xb4] sm:$0xf0] }
  0xae   :  { %2545 = vmatpush.bf16.msra.mxu1 %v4173_v51  ;;  %2558 = vmatpush.bf16.msra.mxu2 %v4301_v53  ;;  %v5146_v39 = vld [vmem:[#allocation6 + $0x824] sm:$0xf]  ;;  %v4362_v40 = vld [vmem:[#allocation6 + $0x830] sm:$0xf0]  ;;  %v4237_v47 = vor.u32 %v5114_v36, %v4234_v37  ;;  %v3536_v31 = vld [vmem:[#allocation6 + $0x1a8] sm:$0xf]  ;;  %v3409_v37 = vor.u32 %v4909_v30, %v3408_v27 }
  0xaf   :  { %2571 = vmatpush.bf16.msra.mxu3 %v4429_v57  ;;  %v5046_v43 = vld [vmem:[#allocation6 + $0x504] sm:$0xf]  ;;  %v3962_v44 = vld [vmem:[#allocation6 + $0x510] sm:$0xf0]  ;;  %v4365_v54 = vor.u32 %v5146_v39, %v4362_v40  ;;  %v3472_v27 = vld [vmem:[#allocation6 + $0x128] sm:$0xf] }
  0xb0   :  { %2533 = vmatpush.bf16.msra.mxu0 %v4029_v63  ;;  %v5078_v48 = vld [vmem:[#allocation6 + $0x604] sm:$0xf]  ;;  %v4090_v51 = vld [vmem:[#allocation6 + $0x610] sm:$0xf0]  ;;  %v3965_v61 = vor.u32 %v5046_v43, %v3962_v44  ;;  %v3440_v63 = vld [vmem:[#allocation6 + $0xe8] sm:$0xf] }
  0xb1   :  { %v5110_v53 = vld [vmem:[#allocation6 + $0x704] sm:$0xf]  ;;  %v4218_v55 = vld [vmem:[#allocation6 + $0x710] sm:$0xf0]  ;;  %v4925_v30 = vld [vmem:[#allocation6 + $0x134] sm:$0xf0] }
  0xb2   :  { %2546 = vmatpush.bf16.msra.mxu1 %v4157_v0  ;;  %2559 = vmatpush.bf16.msra.mxu2 %v4285_v1  ;;  %v5142_v56 = vld [vmem:[#allocation6 + $0x804] sm:$0xf]  ;;  %v4346_v57 = vld [vmem:[#allocation6 + $0x810] sm:$0xf0]  ;;  %v4917_v0 = vld [vmem:[#allocation6 + $0xf4] sm:$0xf0]  ;;  %v4093_v1 = vor.u32 %v5078_v48, %v4090_v51  ;;  %v4221_v2 = vor.u32 %v5110_v53, %v4218_v55 }
  0xb3   :  { %2572 = vmatpush.bf16.msra.mxu3 %v4413_v5  ;;  %v5202_v58 = vld [vmem:[#allocation6 + $0x9e4] sm:$0xf]  ;;  %v4586_v59 = vld [vmem:[#allocation6 + $0x9f0] sm:$0xf0]  ;;  %v4349_v5 = vor.u32 %v5142_v56, %v4346_v57  ;;  %v3441_v8 = vor.u32 %v4917_v0, %v3440_v63  ;;  %v3520_v48 = vld [vmem:[#allocation6 + $0x188] sm:$0xf] }
  0xb4   :  { %2534 = vmatpush.bf16.msra.mxu0 %v4013_v11  ;;  %v5234_v60 = vld [vmem:[#allocation6 + $0xae4] sm:$0xf]  ;;  %v4714_v62 = vld [vmem:[#allocation6 + $0xaf0] sm:$0xf0]  ;;  %v4589_v6 = vor.u32 %v5202_v58, %v4586_v59  ;;  %v4937_v51 = vld [vmem:[#allocation6 + $0x194] sm:$0xf0] }
  0xb5   :  { %v4717_v7 = vor.u32 %v5234_v60, %v4714_v62  ;;  %v5198_v9 = vld [vmem:[#allocation6 + $0x9c4] sm:$0xf]  ;;  %v4570_v10 = vld [vmem:[#allocation6 + $0x9d0] sm:$0xf0]  ;;  %v3521_v59 = vor.u32 %v4937_v51, %v3520_v48  ;;  %v4901_v62 = vld [vmem:[#allocation6 + $0x74] sm:$0xf0] }
  0xb6   :  { %2547 = vmatpush.bf16.msra.mxu1 %v4141_v12  ;;  %2560 = vmatpush.bf16.msra.mxu2 %v4269_v13  ;;  %v5230_v11 = vld [vmem:[#allocation6 + $0xac4] sm:$0xf]  ;;  %v3569_v12 = vor.u32 %v4949_v4, %v3568_v3  ;;  %v4698_v13 = vld [vmem:[#allocation6 + $0xad0] sm:$0xf0]  ;;  %v4573_v19 = vor.u32 %v5198_v9, %v4570_v10  ;;  %v3504_v63 = vld [vmem:[#allocation6 + $0x168] sm:$0xf] }
  0xb7   :  { %2573 = vmatpush.bf16.msra.mxu3 %v4397_v17  ;;  %v4945_v17 = vld [vmem:[#allocation6 + $0x1d4] sm:$0xf0]  ;;  %v4701_v20 = vor.u32 %v5230_v11, %v4698_v13  ;;  %v5194_v22 = vld [vmem:[#allocation6 + $0x9a4] sm:$0xf]  ;;  %v4554_v23 = vld [vmem:[#allocation6 + $0x9b0] sm:$0xf0] }
  0xb8   :  { %2535 = vmatpush.bf16.msra.mxu0 %v3997_v24  ;;  %v5226_v24 = vld [vmem:[#allocation6 + $0xaa4] sm:$0xf]  ;;  %v4557_v33 = vor.u32 %v5194_v22, %v4554_v23  ;;  %v4538_v40 = vld [vmem:[#allocation6 + $0x990] sm:$0xf0]  ;;  %v4933_v0 = vld [vmem:[#allocation6 + $0x174] sm:$0xf0] }
  0xb9   :  { %v5190_v39 = vld [vmem:[#allocation6 + $0x984] sm:$0xf]  ;;  %v4666_v44 = vld [vmem:[#allocation6 + $0xa90] sm:$0xf0]  ;;  %v3360_v10 = vld [vmem:[#allocation6 + $0x48] sm:$0xf] }
  0xba   :  { %2548 = vmatpush.bf16.msra.mxu1 %v4125_v25  ;;  %2561 = vmatpush.bf16.msra.mxu2 %v4253_v26  ;;  %v3553_v25 = vor.u32 %v4945_v17, %v3552_v16  ;;  %v4682_v26 = vld [vmem:[#allocation6 + $0xab0] sm:$0xf0]  ;;  %v4541_v53 = vor.u32 %v5190_v39, %v4538_v40  ;;  %v5186_v56 = vld [vmem:[#allocation6 + $0x964] sm:$0xf]  ;;  %v4897_v11 = vld [vmem:[#allocation6 + $0x54] sm:$0xf0] }
  0xbb   :  { %2574 = vmatpush.bf16.msra.mxu3 %v4381_v32  ;;  %v4941_v32 = vld [vmem:[#allocation6 + $0x1b4] sm:$0xf0]  ;;  %v4685_v36 = vor.u32 %v5226_v24, %v4682_v26  ;;  %v4522_v57 = vld [vmem:[#allocation6 + $0x970] sm:$0xf0]  ;;  %v5218_v58 = vld [vmem:[#allocation6 + $0xa64] sm:$0xf]  ;;  %v3361_v17 = vor.u32 %v4897_v11, %v3360_v10 }
  0xbc   :  { %2536 = vmatpush.bf16.msra.mxu0 %v3981_v41  ;;  %v5222_v41 = vld [vmem:[#allocation6 + $0xa84] sm:$0xf]  ;;  %v3537_v43 = vor.u32 %v4941_v32, %v3536_v31  ;;  %v4650_v60 = vld [vmem:[#allocation6 + $0xa70] sm:$0xf0]  ;;  %v4929_v13 = vld [vmem:[#allocation6 + $0x154] sm:$0xf0] }
  0xbd   :  { %v4653_v3 = vor.u32 %v5218_v58, %v4650_v60  ;;  %v4634_v9 = vld [vmem:[#allocation6 + $0xa50] sm:$0xf0]  ;;  %v4893_v26 = vld [vmem:[#allocation6 + $0x34] sm:$0xf0]  ;;  %v3456_v48 = vld [vmem:[#allocation6 + $0x108] sm:$0xf] }
  0xbe   :  { %2549 = vmatpush.bf16.msra.mxu1 %v4109_v45  ;;  %2562 = vmatpush.bf16.msra.mxu2 %v4237_v47  ;;  %v3392_v45 = vld [vmem:[#allocation6 + $0x88] sm:$0xf]  ;;  %v4905_v47 = vld [vmem:[#allocation6 + $0x94] sm:$0xf0]  ;;  %v4618_v24 = vld [vmem:[#allocation6 + $0xa30] sm:$0xf0] }
  0xbf   :  { %2575 = vmatpush.bf16.msra.mxu3 %v4365_v54  ;;  %v4669_v54 = vor.u32 %v5222_v41, %v4666_v44  ;;  %v3393_v55 = vor.u32 %v4905_v47, %v3392_v45  ;;  %v5206_v41 = vld [vmem:[#allocation6 + $0xa04] sm:$0xf]  ;;  %v3328_v44 = vld [vmem:[#allocation6 + $0x8] sm:$0xf]  ;;  %v3473_v45 = vor.u32 %v4925_v30, %v3472_v27  ;;  %v4889_v47 = vld [vmem:[#allocation6 + $0x14] sm:$0xf0] }
  0xc0   :  { %2537 = vmatpush.bf16.msra.mxu0 %v3965_v61  ;;  %v3376_v61 = vld [vmem:[#allocation6 + $0x68] sm:$0xf]  ;;  %v4921_v51 = vld [vmem:[#allocation6 + $0x114] sm:$0xf0] }
  0xc1   :  { %v3377_v4 = vor.u32 %v4901_v62, %v3376_v61  ;;  %v3824_v58 = vld [vmem:[#allocation6 + $0x3e8] sm:$0xf]  ;;  %v5013_v60 = vld [vmem:[#allocation6 + $0x3f4] sm:$0xf0] }
  0xc2   :  { %2550 = vmatpush.bf16.msra.mxu1 %v4093_v1  ;;  %2563 = vmatpush.bf16.msra.mxu2 %v4221_v2  ;;  %v4525_v1 = vor.u32 %v5186_v56, %v4522_v57  ;;  %v5182_v2 = vld [vmem:[#allocation6 + $0x944] sm:$0xf]  ;;  %v3696_v56 = vld [vmem:[#allocation6 + $0x2e8] sm:$0xf]  ;;  %v4981_v57 = vld [vmem:[#allocation6 + $0x2f4] sm:$0xf0] }
  0xc3   :  { %2576 = vmatpush.bf16.msra.mxu3 %v4349_v5  ;;  %2538 = vmatmul.bf16.vlgmr.msra.gmra.mxu0 %v5592_v52  ;;  %v4506_v5 = vld [vmem:[#allocation6 + $0x950] sm:$0xf0]  ;;  %v3952_v61 = vld [vmem:[#allocation6 + $0x4e8] sm:$0xf]  ;;  %v5045_v62 = vld [vmem:[#allocation6 + $0x4f4] sm:$0xf0] }
  0xc4   :  { %2582 = vmatpush.bf16.msrb.mxu0 %v4589_v6  ;;  %v5214_v6 = vld [vmem:[#allocation6 + $0xa44] sm:$0xf]  ;;  %v4509_v14 = vor.u32 %v5182_v2, %v4506_v5  ;;  %v4080_v2 = vld [vmem:[#allocation6 + $0x5e8] sm:$0xf]  ;;  %v3457_v5 = vor.u32 %v4921_v51, %v3456_v48  ;;  %v3953_v10 = vor.u32 %v5045_v62, %v3952_v61  ;;  %v4973_v30 = vld [vmem:[#allocation6 + $0x2b4] sm:$0xf0] }
  0xc5   :  { %2564 = vmatmul.bf16.vlgmr.msra.gmra.mxu2 %v5590_v50  ;;  %2551 = vmatmul.bf16.vlgmr.msra.gmra.mxu1 %v5586_v46  ;;  %v4637_v16 = vor.u32 %v5214_v6, %v4634_v9  ;;  %v3697_v6 = vor.u32 %v4981_v57, %v3696_v56  ;;  %v3825_v9 = vor.u32 %v5013_v60, %v3824_v58  ;;  %v3680_v11 = vld [vmem:[#allocation6 + $0x2c8] sm:$0xf]  ;;  %v5065_v57 = vld [vmem:[#allocation6 + $0x594] sm:$0xf0] }
  0xc6   :  { %2595 = vmatpush.bf16.msrb.mxu1 %v4717_v7  ;;  %2608 = vmatpush.bf16.msrb.mxu2 %v3441_v8  ;;  %v5621_v7 = vld [vmem:[#allocation8] sm:$0xf]  ;;  %v3505_v8 = vor.u32 %v4933_v0, %v3504_v63  ;;  %v3664_v27 = vld [vmem:[#allocation6 + $0x2a8] sm:$0xf] }
  0xc7   :  { %2621 = vmatpush.bf16.msrb.mxu3 %v3569_v12  ;;  %v3488_v12 = vld [vmem:[#allocation6 + $0x148] sm:$0xf]  ;;  %v515_v15 = vperm.slane %v5621_v7, 0 }
  0xc8   :  { %2577 = vmatmul.bf16.vlgmr.msra.gmra.mxu3 %v5603_v38  ;;  %2583 = vmatpush.bf16.msrb.mxu0 %v4573_v19  ;;  %v5178_v19 = vld [vmem:[#allocation6 + $0x924] sm:$0xf]  ;;  %v3489_v23 = vor.u32 %v4929_v13, %v3488_v12  ;;  %v4977_v12 = vld [vmem:[#allocation6 + $0x2d4] sm:$0xf0]  ;;  %v3808_v13 = vld [vmem:[#allocation6 + $0x3c8] sm:$0xf] }
  0xc9   :  { %v3776_v48 = vld [vmem:[#allocation6 + $0x388] sm:$0xf] }
  0xca   :  { %2596 = vmatpush.bf16.msrb.mxu1 %v4701_v20  ;;  %2609 = vmatpush.bf16.msrb.mxu2 %v3425_v21  ;;  %v4490_v20 = vld [vmem:[#allocation6 + $0x930] sm:$0xf0]  ;;  %v5210_v21 = vld [vmem:[#allocation6 + $0xa24] sm:$0xf]  ;;  %v4032_v56 = vld [vmem:[#allocation6 + $0x588] sm:$0xf] }
  0xcb   :  { %2622 = vmatpush.bf16.msrb.mxu3 %v3553_v25  ;;  %v3344_v25 = vld [vmem:[#allocation6 + $0x28] sm:$0xf]  ;;  %v4493_v32 = vor.u32 %v5178_v19, %v4490_v20  ;;  %v4621_v39 = vor.u32 %v5210_v21, %v4618_v24  ;;  %v5041_v19 = vld [vmem:[#allocation6 + $0x4d4] sm:$0xf0] }
  0xcc   :  { %2584 = vmatpush.bf16.msrb.mxu0 %v4557_v33  ;;  %v5174_v33 = vld [vmem:[#allocation6 + $0x904] sm:$0xf]  ;;  %v3345_v40 = vor.u32 %v4893_v26, %v3344_v25  ;;  %v4064_v20 = vld [vmem:[#allocation6 + $0x5c8] sm:$0xf]  ;;  %v5073_v21 = vld [vmem:[#allocation6 + $0x5d4] sm:$0xf0] }
  0xcd   :  { %v3632_v62 = vld [vmem:[#allocation6 + $0x268] sm:$0xf] }
  0xce   :  { %2597 = vmatpush.bf16.msrb.mxu1 %v4685_v36  ;;  %2610 = vmatpush.bf16.msrb.mxu2 %v3409_v37  ;;  %v4474_v36 = vld [vmem:[#allocation6 + $0x910] sm:$0xf0] }
  0xcf   :  { %2623 = vmatpush.bf16.msrb.mxu3 %v3537_v43  ;;  %v4602_v43 = vld [vmem:[#allocation6 + $0xa10] sm:$0xf0] }
  0xd0   :  { %2585 = vmatpush.bf16.msrb.mxu0 %v4541_v53  ;;  %v4605_v0 = vor.u32 %v5206_v41, %v4602_v43  ;;  %v3665_v41 = vor.u32 %v4973_v30, %v3664_v27 }
  0xd2   :  { %2598 = vmatpush.bf16.msrb.mxu1 %v4669_v54  ;;  %2611 = vmatpush.bf16.msrb.mxu2 %v3393_v55  ;;  %v2344_v22 = vpop.f32.mrf.mxu1  ;;  %v2331_v31 = vpop.f32.mrf.mxu0 }
  0xd3   :  { %2624 = vmatpush.bf16.msrb.mxu3 %v3521_v59  ;;  %v2332_v37 = vadd.f32 %v2331_v31, %v515_v15  ;;  %v4477_v59 = vor.u32 %v5174_v33, %v4474_v36  ;;  %v3792_v31 = vld [vmem:[#allocation6 + $0x3a8] sm:$0xf]  ;;  %v5005_v33 = vld [vmem:[#allocation6 + $0x3b4] sm:$0xf0] }
  0xd4   :  { %2586 = vmatpush.bf16.msrb.mxu0 %v4525_v1  ;;  %v3329_v1 = vor.u32 %v4889_v47, %v3328_v44  ;;  %v3920_v36 = vld [vmem:[#allocation6 + $0x4a8] sm:$0xf]  ;;  %v3793_v43 = vor.u32 %v5005_v33, %v3792_v31  ;;  %v4969_v47 = vld [vmem:[#allocation6 + $0x294] sm:$0xf0] }
  0xd5   :  { %v2345_v53 = vadd.f32 %v2344_v22, %v2332_v37  ;;  %v3681_v22 = vor.u32 %v4977_v12, %v3680_v11  ;;  %v5037_v37 = vld [vmem:[#allocation6 + $0x4b4] sm:$0xf0] }
  0xd6   :  { %2599 = vmatpush.bf16.msrb.mxu1 %v4653_v3  ;;  %2612 = vmatpush.bf16.msrb.mxu2 %v3377_v4  ;;  %v5077_v3 = vld [vmem:[#allocation6 + $0x5f4] sm:$0xf0]  ;;  %v3921_v44 = vor.u32 %v5037_v37, %v3920_v36  ;;  %v3600_v36 = vld [vmem:[#allocation6 + $0x228] sm:$0xf] }
  0xd7   :  { %2625 = vmatpush.bf16.msrb.mxu3 %v3505_v8  ;;  %v2357_v54 = vpop.f32.mrf.mxu2  ;;  %v2370_v55 = vpop.f32.mrf.mxu3  ;;  %v4081_v15 = vor.u32 %v5077_v3, %v4080_v2  ;;  %v4033_v3 = vor.u32 %v5065_v57, %v4032_v56  ;;  %v4957_v37 = vld [vmem:[#allocation6 + $0x234] sm:$0xf0]  ;;  %v3712_v57 = vld [vmem:[#allocation6 + $0x308] sm:$0xf] }
  0xd8   :  { %2587 = vmatpush.bf16.msrb.mxu0 %v4509_v14  ;;  %v2358_v63 = vadd.f32 %v2357_v54, %v2345_v53  ;;  %v5001_v53 = vld [vmem:[#allocation6 + $0x394] sm:$0xf0]  ;;  %v3904_v54 = vld [vmem:[#allocation6 + $0x488] sm:$0xf] }
  0xd9   :  { %v3777_v60 = vor.u32 %v5001_v53, %v3776_v48  ;;  %v5053_v48 = vld [vmem:[#allocation6 + $0x534] sm:$0xf0]  ;;  %v3584_v53 = vld [vmem:[#allocation6 + $0x208] sm:$0xf] }
  0xda   :  { %2600 = vmatpush.bf16.msrb.mxu1 %v4637_v16  ;;  %2613 = vmatpush.bf16.msrb.mxu2 %v3361_v17  ;;  %v2346_v4 = vpop.f32.mrf.mxu1  ;;  %v5624_v8 = vadd.f32 %v2370_v55, %v2358_v63  ;;  %v2333_v14 = vpop.f32.mrf.mxu0  ;;  %v5009_v16 = vld [vmem:[#allocation6 + $0x3d4] sm:$0xf0]  ;;  %v3936_v17 = vld [vmem:[#allocation6 + $0x4c8] sm:$0xf] }
  0xdb   :  { %2626 = vmatpush.bf16.msrb.mxu3 %v3489_v23  ;;  %v3809_v25 = vor.u32 %v5009_v16, %v3808_v13  ;;  %v3937_v26 = vor.u32 %v5041_v19, %v3936_v17  ;;  %v5033_v55 = vld [vmem:[#allocation6 + $0x494] sm:$0xf0]  ;;  %v3744_v17 = vld [vmem:[#allocation6 + $0x348] sm:$0xf] }
  0xdc   :  { %2588 = vmatpush.bf16.msrb.mxu0 %v4493_v32  ;;  %v4065_v32 = vor.u32 %v5073_v21, %v4064_v20  ;;  %v3905_v61 = vor.u32 %v5033_v55, %v3904_v54  ;;  %v4965_v63 = vld [vmem:[#allocation6 + $0x274] sm:$0xf0]  ;;  %v3872_v21 = vld [vmem:[#allocation6 + $0x448] sm:$0xf] }
  0xdd   :  { %v4997_v4 = vld [vmem:[#allocation6 + $0x374] sm:$0xf0]  ;;  %v3633_v12 = vor.u32 %v4965_v63, %v3632_v62  ;;  %v3968_v63 = vld [vmem:[#allocation6 + $0x508] sm:$0xf] }
  0xde   :  { %2601 = vmatpush.bf16.msrb.mxu1 %v4621_v39  ;;  %2614 = vmatpush.bf16.msrb.mxu2 %v3345_v40  ;;  %v4048_v39 = vld [vmem:[#allocation6 + $0x5a8] sm:$0xf]  ;;  %v5069_v40 = vld [vmem:[#allocation6 + $0x5b4] sm:$0xf0] }
  0xdf   :  { %2627 = vmatpush.bf16.msrb.mxu3 %v3473_v45  ;;  %v2359_v23 = vpop.f32.mrf.mxu2  ;;  %v2372_v24 = vpop.f32.mrf.mxu3  ;;  %v3648_v45 = vld [vmem:[#allocation6 + $0x288] sm:$0xf]  ;;  %v4049_v51 = vor.u32 %v5069_v40, %v4048_v39  ;;  %v4961_v16 = vld [vmem:[#allocation6 + $0x254] sm:$0xf0] }
  0xe0   :  { %2589 = vmatpush.bf16.msrb.mxu0 %v4477_v59  ;;  %v3649_v58 = vor.u32 %v4969_v47, %v3648_v45  ;;  %v4993_v20 = vld [vmem:[#allocation6 + $0x354] sm:$0xf0]  ;;  %v3728_v39 = vld [vmem:[#allocation6 + $0x328] sm:$0xf] }
  0xe1   :  { %v5021_v45 = vld [vmem:[#allocation6 + $0x434] sm:$0xf0]  ;;  %v3984_v47 = vld [vmem:[#allocation6 + $0x528] sm:$0xf] }
  0xe2   :  { %2602 = vmatpush.bf16.msrb.mxu1 %v4605_v0  ;;  %2615 = vmatpush.bf16.msrb.mxu2 %v3329_v1  ;;  %v2383_v59 = vpop.f32.mrf.mxu0  ;;  %v3760_v0 = vld [vmem:[#allocation6 + $0x368] sm:$0xf]  ;;  %v4953_v54 = vld [vmem:[#allocation6 + $0x214] sm:$0xf0] }
  0xe3   :  { %2628 = vmatpush.bf16.msrb.mxu3 %v3457_v5  ;;  %2590 = vmatmul.bf16.vlgmr.msrb.gmra.mxu0 %v5607_v18  ;;  %v2384_v1 = vadd.f32 %v2383_v59, %v5624_v8  ;;  %v3888_v5 = vld [vmem:[#allocation6 + $0x468] sm:$0xf]  ;;  %v3761_v13 = vor.u32 %v4997_v4, %v3760_v0  ;;  %v5017_v62 = vld [vmem:[#allocation6 + $0x414] sm:$0xf0] }
  0xe4   :  { %2634 = vmatpush.bf16.msra.mxu0 %v3697_v6  ;;  %v2396_v2 = vpop.f32.mrf.mxu1  ;;  %v5029_v6 = vld [vmem:[#allocation6 + $0x474] sm:$0xf0]  ;;  %v3840_v59 = vld [vmem:[#allocation6 + $0x408] sm:$0xf] }
  0xe5   :  { %2603 = vmatmul.bf16.vlgmr.msrb.gmra.mxu1 %v5605_v42  ;;  %2616 = vmatmul.bf16.vlgmr.msrb.gmra.mxu2 %v5574_v34  ;;  %v2397_v11 = vadd.f32 %v2396_v2, %v2384_v1  ;;  %v3889_v14 = vor.u32 %v5029_v6, %v3888_v5  ;;  %v5049_v0 = vld [vmem:[#allocation6 + $0x514] sm:$0xf0]  ;;  %v4208_v2 = vld [vmem:[#allocation6 + $0x6e8] sm:$0xf]  ;;  %v3585_v5 = vor.u32 %v4953_v54, %v3584_v53 }
  0xe6   :  { %2647 = vmatpush.bf16.msra.mxu1 %v3825_v9  ;;  %2660 = vmatpush.bf16.msra.mxu2 %v3953_v10  ;;  %v4016_v9 = vld [vmem:[#allocation6 + $0x568] sm:$0xf]  ;;  %v5061_v10 = vld [vmem:[#allocation6 + $0x574] sm:$0xf0] }
  0xe7   :  { %2673 = vmatpush.bf16.msra.mxu3 %v4081_v15  ;;  %v3616_v15 = vld [vmem:[#allocation6 + $0x248] sm:$0xf]  ;;  %v4017_v8 = vor.u32 %v5061_v10, %v4016_v9  ;;  %v5141_v6 = vld [vmem:[#allocation6 + $0x7f4] sm:$0xf0] }
  0xe8   :  { %2635 = vmatpush.bf16.msra.mxu0 %v3681_v22  ;;  %2629 = vmatmul.bf16.vlgmr.msrb.gmra.mxu3 %v5576_v35  ;;  %v2409_v19 = vpop.f32.mrf.mxu2  ;;  %v5025_v22 = vld [vmem:[#allocation6 + $0x454] sm:$0xf0]  ;;  %v3617_v27 = vor.u32 %v4961_v16, %v3616_v15  ;;  %v4336_v4 = vld [vmem:[#allocation6 + $0x7e8] sm:$0xf]  ;;  %v3969_v15 = vor.u32 %v5049_v0, %v3968_v63 }
  0xe9   :  { %v2410_v23 = vadd.f32 %v2409_v19, %v2397_v11  ;;  %v3873_v33 = vor.u32 %v5025_v22, %v3872_v21  ;;  %v4464_v9 = vld [vmem:[#allocation6 + $0x8e8] sm:$0xf]  ;;  %v5173_v10 = vld [vmem:[#allocation6 + $0x8f4] sm:$0xf0] }
  0xea   :  { %2648 = vmatpush.bf16.msra.mxu1 %v3809_v25  ;;  %2661 = vmatpush.bf16.msra.mxu2 %v3937_v26  ;;  %v4000_v25 = vld [vmem:[#allocation6 + $0x548] sm:$0xf]  ;;  %v5057_v26 = vld [vmem:[#allocation6 + $0x554] sm:$0xf0]  ;;  %v2385_v31 = vpop.f32.mrf.mxu0  ;;  %v4465_v19 = vor.u32 %v5173_v10, %v4464_v9 }
  0xeb   :  { %2674 = vmatpush.bf16.msra.mxu3 %v4065_v32  ;;  %v2422_v24 = vpop.f32.mrf.mxu3  ;;  %v3745_v32 = vor.u32 %v4993_v20, %v3744_v17  ;;  %v4337_v17 = vor.u32 %v5141_v6, %v4336_v4  ;;  %v5105_v20 = vld [vmem:[#allocation6 + $0x6d4] sm:$0xf0]  ;;  %v4320_v21 = vld [vmem:[#allocation6 + $0x7c8] sm:$0xf] }
  0xec   :  { %2636 = vmatpush.bf16.msra.mxu0 %v3665_v41  ;;  %v5631_v30 = vadd.f32 %v2422_v24, %v2410_v23  ;;  %v2398_v40 = vpop.f32.mrf.mxu1  ;;  %v4001_v41 = vor.u32 %v5057_v26, %v4000_v25  ;;  %v5137_v23 = vld [vmem:[#allocation6 + $0x7d4] sm:$0xf0]  ;;  %v4448_v24 = vld [vmem:[#allocation6 + $0x8c8] sm:$0xf] }
  0xed   :  { %v5169_v25 = vld [vmem:[#allocation6 + $0x8d4] sm:$0xf0]  ;;  %v4576_v26 = vld [vmem:[#allocation6 + $0x9c8] sm:$0xf] }
  0xee   :  { %2649 = vmatpush.bf16.msra.mxu1 %v3793_v43  ;;  %2662 = vmatpush.bf16.msra.mxu2 %v3921_v44  ;;  %v4989_v43 = vld [vmem:[#allocation6 + $0x334] sm:$0xf0]  ;;  %v3856_v44 = vld [vmem:[#allocation6 + $0x428] sm:$0xf] }
  0xef   :  { %2675 = vmatpush.bf16.msra.mxu3 %v4049_v51  ;;  %v3601_v51 = vor.u32 %v4957_v37, %v3600_v36  ;;  %v3729_v55 = vor.u32 %v4989_v43, %v3728_v39  ;;  %v3857_v56 = vor.u32 %v5021_v45, %v3856_v44  ;;  %v4176_v36 = vld [vmem:[#allocation6 + $0x6a8] sm:$0xf]  ;;  %v5101_v37 = vld [vmem:[#allocation6 + $0x6b4] sm:$0xf0] }
  0xf0   :  { %2637 = vmatpush.bf16.msra.mxu0 %v3649_v58  ;;  %v4985_v58 = vld [vmem:[#allocation6 + $0x314] sm:$0xf0]  ;;  %v4304_v39 = vld [vmem:[#allocation6 + $0x7a8] sm:$0xf] }
  0xf1   :  { %v3713_v11 = vor.u32 %v4985_v58, %v3712_v57  ;;  %v4432_v43 = vld [vmem:[#allocation6 + $0x8a8] sm:$0xf]  ;;  %v5165_v44 = vld [vmem:[#allocation6 + $0x8b4] sm:$0xf0] }
  0xf2   :  { %2650 = vmatpush.bf16.msra.mxu1 %v3777_v60  ;;  %2663 = vmatpush.bf16.msra.mxu2 %v3905_v61  ;;  %v2411_v60 = vpop.f32.mrf.mxu2  ;;  %v3985_v61 = vor.u32 %v5053_v48, %v3984_v47  ;;  %v4560_v45 = vld [vmem:[#allocation6 + $0x9a8] sm:$0xf]  ;;  %v5197_v47 = vld [vmem:[#allocation6 + $0x9b4] sm:$0xf0]  ;;  %v4177_v48 = vor.u32 %v5101_v37, %v4176_v36  ;;  %v4433_v53 = vor.u32 %v5165_v44, %v4432_v43 }
  0xf3   :  { %2676 = vmatpush.bf16.msra.mxu3 %v4033_v3  ;;  %v2424_v1 = vpop.f32.mrf.mxu3  ;;  %v5109_v3 = vld [vmem:[#allocation6 + $0x6f4] sm:$0xf0]  ;;  %v4160_v54 = vld [vmem:[#allocation6 + $0x688] sm:$0xf]  ;;  %v4561_v57 = vor.u32 %v5197_v47, %v4560_v45 }
  0xf4   :  { %2638 = vmatpush.bf16.msra.mxu0 %v3633_v12  ;;  %v3841_v12 = vor.u32 %v5017_v62, %v3840_v59  ;;  %v4209_v16 = vor.u32 %v5109_v3, %v4208_v2  ;;  %v5129_v58 = vld [vmem:[#allocation6 + $0x794] sm:$0xf0]  ;;  %v4416_v59 = vld [vmem:[#allocation6 + $0x888] sm:$0xf] }
  0xf5   :  { %v5161_v60 = vld [vmem:[#allocation6 + $0x894] sm:$0xf0]  ;;  %v4544_v62 = vld [vmem:[#allocation6 + $0x988] sm:$0xf] }
  0xf6   :  { %2651 = vmatpush.bf16.msra.mxu1 %v3761_v13  ;;  %2664 = vmatpush.bf16.msra.mxu2 %v3889_v14  ;;  %v4592_v13 = vld [vmem:[#allocation6 + $0x9e8] sm:$0xf]  ;;  %v5205_v14 = vld [vmem:[#allocation6 + $0x9f4] sm:$0xf0]  ;;  %v4417_v4 = vor.u32 %v5161_v60, %v4416_v59 }
  0xf7   :  { %2677 = vmatpush.bf16.msra.mxu3 %v4017_v8  ;;  %v4192_v8 = vld [vmem:[#allocation6 + $0x6c8] sm:$0xf]  ;;  %v4593_v22 = vor.u32 %v5205_v14, %v4592_v13  ;;  %v5193_v63 = vld [vmem:[#allocation6 + $0x994] sm:$0xf0] }
  0xf8   :  { %2639 = vmatpush.bf16.msra.mxu0 %v3617_v27  ;;  %v5201_v27 = vld [vmem:[#allocation6 + $0x9d4] sm:$0xf0]  ;;  %v4193_v31 = vor.u32 %v5105_v20, %v4192_v8  ;;  %v4272_v9 = vld [vmem:[#allocation6 + $0x768] sm:$0xf]  ;;  %v4545_v10 = vor.u32 %v5193_v63, %v4544_v62 }
  0xf9   :  { %v4577_v40 = vor.u32 %v5201_v27, %v4576_v26  ;;  %v5093_v6 = vld [vmem:[#allocation6 + $0x674] sm:$0xf0]  ;;  %v4400_v13 = vld [vmem:[#allocation6 + $0x868] sm:$0xf] }
  0xfa   :  { %2652 = vmatpush.bf16.msra.mxu1 %v3745_v32  ;;  %2665 = vmatpush.bf16.msra.mxu2 %v3873_v33  ;;  %v4321_v32 = vor.u32 %v5137_v23, %v4320_v21  ;;  %v4449_v33 = vor.u32 %v5169_v25, %v4448_v24  ;;  %v5157_v14 = vld [vmem:[#allocation6 + $0x874] sm:$0xf0]  ;;  %v4128_v8 = vld [vmem:[#allocation6 + $0x648] sm:$0xf] }
  0xfb   :  { %2678 = vmatpush.bf16.msra.mxu3 %v4001_v41  ;;  %v5133_v41 = vld [vmem:[#allocation6 + $0x7b4] sm:$0xf0]  ;;  %v4256_v21 = vld [vmem:[#allocation6 + $0x748] sm:$0xf] }
  0xfc   :  { %2640 = vmatpush.bf16.msra.mxu0 %v3601_v51  ;;  %v4305_v51 = vor.u32 %v5133_v41, %v4304_v39  ;;  %v5089_v20 = vld [vmem:[#allocation6 + $0x654] sm:$0xf0]  ;;  %v4384_v25 = vld [vmem:[#allocation6 + $0x848] sm:$0xf] }
  0xfd   :  { %v5121_v24 = vld [vmem:[#allocation6 + $0x754] sm:$0xf0]  ;;  %v4129_v37 = vor.u32 %v5089_v20, %v4128_v8  ;;  %v4112_v43 = vld [vmem:[#allocation6 + $0x628] sm:$0xf] }
  0xfe   :  { %2653 = vmatpush.bf16.msra.mxu1 %v3729_v55  ;;  %2666 = vmatpush.bf16.msra.mxu2 %v3857_v56  ;;  %v5097_v55 = vld [vmem:[#allocation6 + $0x694] sm:$0xf0]  ;;  %v4288_v56 = vld [vmem:[#allocation6 + $0x788] sm:$0xf] }
  0xff   :  { %2679 = vmatpush.bf16.msra.mxu3 %v3985_v61  ;;  %v4161_v1 = vor.u32 %v5097_v55, %v4160_v54  ;;  %v4289_v3 = vor.u32 %v5129_v58, %v4288_v56  ;;  %v5153_v26 = vld [vmem:[#allocation6 + $0x854] sm:$0xf0]  ;;  %v4240_v45 = vld [vmem:[#allocation6 + $0x728] sm:$0xf] }
 0x100   :  { %2641 = vmatpush.bf16.msra.mxu0 %v3585_v5  ;;  %v2435_v61 = vpop.f32.mrf.mxu0  ;;  %v4144_v5 = vld [vmem:[#allocation6 + $0x668] sm:$0xf]  ;;  %v4385_v41 = vor.u32 %v5153_v26, %v4384_v25  ;;  %v5085_v44 = vld [vmem:[#allocation6 + $0x634] sm:$0xf0]  ;;  %v3426_v26 = vld [vmem:[#allocation6 + $0xd8] sm:$0xf0] }
 0x101   :  { %v2436_v0 = vadd.f32 %v2435_v61, %v5631_v30  ;;  %v4496_v54 = vld [vmem:[#allocation6 + $0x928] sm:$0xf]  ;;  %v5181_v55 = vld [vmem:[#allocation6 + $0x934] sm:$0xf0]  ;;  %v4113_v56 = vor.u32 %v5085_v44, %v4112_v43 }
 0x102   :  { %2654 = vmatpush.bf16.msra.mxu1 %v3713_v11  ;;  %2667 = vmatpush.bf16.msra.mxu2 %v3841_v12  ;;  %v2448_v2 = vpop.f32.mrf.mxu1  ;;  %v5125_v12 = vld [vmem:[#allocation6 + $0x774] sm:$0xf0]  ;;  %v4224_v61 = vld [vmem:[#allocation6 + $0x708] sm:$0xf] }
 0x103   :  { %2680 = vmatpush.bf16.msra.mxu3 %v3969_v15  ;;  %2642 = vmatmul.bf16.vlgmr.msra.gmra.mxu0 %v5570_v28  ;;  %v2449_v11 = vadd.f32 %v2448_v2, %v2436_v0  ;;  %v4528_v15 = vld [vmem:[#allocation6 + $0x968] sm:$0xf]  ;;  %v4273_v30 = vor.u32 %v5125_v12, %v4272_v9  ;;  %v5081_v58 = vld [vmem:[#allocation6 + $0x614] sm:$0xf0]  ;;  %v4497_v0 = vor.u32 %v5181_v55, %v4496_v54  ;;  %v4915_v9 = vld [vmem:[#allocation6 + $0xec] sm:$0xf] }
 0x104   :  { %2686 = vmatpush.bf16.msrb.mxu0 %v4209_v16  ;;  %v5189_v16 = vld [vmem:[#allocation6 + $0x974] sm:$0xf0]  ;;  %v4352_v63 = vld [vmem:[#allocation6 + $0x808] sm:$0xf]  ;;  %v3442_v12 = vld [vmem:[#allocation6 + $0xf8] sm:$0xf0] }
 0x105   :  { %2668 = vmatmul.bf16.vlgmr.msra.gmra.mxu2 %v5588_v49  ;;  %2655 = vmatmul.bf16.vlgmr.msra.gmra.mxu1 %v5572_v29  ;;  %v5113_v62 = vld [vmem:[#allocation6 + $0x714] sm:$0xf0]  ;;  %v4480_v2 = vld [vmem:[#allocation6 + $0x908] sm:$0xf]  ;;  %v3445_v20 = vor.u32 %v4915_v9, %v3442_v12  ;;  %v3538_v54 = vld [vmem:[#allocation6 + $0x1b8] sm:$0xf0] }
 0x106   :  { %2699 = vmatpush.bf16.msrb.mxu1 %v4337_v17  ;;  %2712 = vmatpush.bf16.msrb.mxu2 %v4465_v19  ;;  %v4145_v17 = vor.u32 %v5093_v6, %v4144_v5  ;;  %v4401_v19 = vor.u32 %v5157_v14, %v4400_v13  ;;  %v4720_v5 = vld [vmem:[#allocation6 + $0xae8] sm:$0xf]  ;;  %v5237_v6 = vld [vmem:[#allocation6 + $0xaf4] sm:$0xf0]  ;;  %v4947_v13 = vld [vmem:[#allocation6 + $0x1ec] sm:$0xf] }
 0x107   :  { %2725 = vmatpush.bf16.msrb.mxu3 %v4593_v22  ;;  %v4529_v22 = vor.u32 %v5189_v16, %v4528_v15  ;;  %v3570_v14 = vld [vmem:[#allocation6 + $0x1f8] sm:$0xf0]  ;;  %v4225_v15 = vor.u32 %v5113_v62, %v4224_v61  ;;  %v4721_v8 = vor.u32 %v5237_v6, %v4720_v5  ;;  %v5229_v44 = vld [vmem:[#allocation6 + $0xab4] sm:$0xf0]  ;;  %v4971_v55 = vld [vmem:[#allocation6 + $0x2ac] sm:$0xf] }
 0x108   :  { %2681 = vmatmul.bf16.vlgmr.msra.gmra.mxu3 %v5592_v52  ;;  %2687 = vmatpush.bf16.msrb.mxu0 %v4193_v31  ;;  %v2461_v23 = vpop.f32.mrf.mxu2  ;;  %v4512_v31 = vld [vmem:[#allocation6 + $0x948] sm:$0xf]  ;;  %v2437_v36 = vpop.f32.mrf.mxu0  ;;  %v5225_v61 = vld [vmem:[#allocation6 + $0xa94] sm:$0xf0]  ;;  %v4903_v62 = vld [vmem:[#allocation6 + $0x8c] sm:$0xf] }
 0x109   :  { %v5638_v27 = vadd.f32 %v2461_v23, %v2449_v11  ;;  %v5233_v23 = vld [vmem:[#allocation6 + $0xad4] sm:$0xf0]  ;;  %v4975_v36 = vld [vmem:[#allocation6 + $0x2cc] sm:$0xf] }
 0x10a   :  { %2700 = vmatpush.bf16.msrb.mxu1 %v4321_v32  ;;  %2713 = vmatpush.bf16.msrb.mxu2 %v4449_v33  ;;  %v5185_v32 = vld [vmem:[#allocation6 + $0x954] sm:$0xf0]  ;;  %v2450_v39 = vpop.f32.mrf.mxu1 }
 0x10b   :  { %2726 = vmatpush.bf16.msrb.mxu3 %v4577_v40  ;;  %v5640_v33 = vpop.f32.mrf.mxu3  ;;  %v4257_v40 = vor.u32 %v5121_v24, %v4256_v21  ;;  %v4513_v47 = vor.u32 %v5185_v32, %v4512_v31  ;;  %v3573_v21 = vor.u32 %v4947_v13, %v3570_v14  ;;  %v4911_v24 = vld [vmem:[#allocation6 + $0xcc] sm:$0xf]  ;;  %v3554_v32 = vld [vmem:[#allocation6 + $0x1d8] sm:$0xf0]  ;;  %v5221_v12 = vld [vmem:[#allocation6 + $0xa74] sm:$0xf0] }
 0x10c   :  { %2688 = vmatpush.bf16.msrb.mxu0 %v4177_v48  ;;  %v5117_v48 = vld [vmem:[#allocation6 + $0x734] sm:$0xf0]  ;;  %v4943_v31 = vld [vmem:[#allocation6 + $0x1cc] sm:$0xf] }
 0x10d   :  { %v4241_v59 = vor.u32 %v5117_v48, %v4240_v45  ;;  %v3557_v43 = vor.u32 %v4943_v31, %v3554_v32  ;;  %v4907_v45 = vld [vmem:[#allocation6 + $0xac] sm:$0xf] }
 0x10e   :  { %2701 = vmatpush.bf16.msrb.mxu1 %v4305_v51  ;;  %2714 = vmatpush.bf16.msrb.mxu2 %v4433_v53  ;;  %v4368_v51 = vld [vmem:[#allocation6 + $0x828] sm:$0xf]  ;;  %v5149_v53 = vld [vmem:[#allocation6 + $0x834] sm:$0xf0] }
 0x10f   :  { %2727 = vmatpush.bf16.msrb.mxu3 %v4561_v57  ;;  %v4096_v57 = vld [vmem:[#allocation6 + $0x608] sm:$0xf]  ;;  %v4369_v60 = vor.u32 %v5149_v53, %v4368_v51  ;;  %v3410_v51 = vld [vmem:[#allocation6 + $0xb8] sm:$0xf0]  ;;  %v4939_v53 = vld [vmem:[#allocation6 + $0x1ac] sm:$0xf] }
 0x110   :  { %2689 = vmatpush.bf16.msrb.mxu0 %v4161_v1  ;;  %v5145_v1 = vld [vmem:[#allocation6 + $0x814] sm:$0xf0]  ;;  %v4097_v11 = vor.u32 %v5081_v58, %v4096_v57  ;;  %v3541_v58 = vor.u32 %v4939_v53, %v3538_v54  ;;  %v4624_v54 = vld [vmem:[#allocation6 + $0xa28] sm:$0xf] }
 0x111   :  { %v4353_v16 = vor.u32 %v5145_v1, %v4352_v63  ;;  %v4935_v1 = vld [vmem:[#allocation6 + $0x18c] sm:$0xf] }
 0x112   :  { %2702 = vmatpush.bf16.msrb.mxu1 %v4289_v3  ;;  %2715 = vmatpush.bf16.msrb.mxu2 %v4417_v4  ;;  %v5177_v3 = vld [vmem:[#allocation6 + $0x914] sm:$0xf0]  ;;  %v2463_v4 = vpop.f32.mrf.mxu2 }
 0x113   :  { %2728 = vmatpush.bf16.msrb.mxu3 %v4545_v10  ;;  %v2476_v10 = vpop.f32.mrf.mxu3  ;;  %v3650_v4 = vld [vmem:[#allocation6 + $0x298] sm:$0xf0] }
 0x114   :  { %2690 = vmatpush.bf16.msrb.mxu0 %v4145_v17  ;;  %v4979_v17 = vld [vmem:[#allocation6 + $0x2ec] sm:$0xf] }
 0x116   :  { %2703 = vmatpush.bf16.msrb.mxu1 %v4273_v30  ;;  %2716 = vmatpush.bf16.msrb.mxu2 %v4401_v19  ;;  %v3698_v30 = vld [vmem:[#allocation6 + $0x2f8] sm:$0xf0]  ;;  %v4481_v19 = vor.u32 %v5177_v3, %v4480_v2  ;;  %v4967_v3 = vld [vmem:[#allocation6 + $0x28c] sm:$0xf] }
 0x117   :  { %2729 = vmatpush.bf16.msrb.mxu3 %v4529_v22  ;;  %v4704_v22 = vld [vmem:[#allocation6 + $0xac8] sm:$0xf]  ;;  %v3701_v25 = vor.u32 %v4979_v17, %v3698_v30  ;;  %v3522_v2 = vld [vmem:[#allocation6 + $0x198] sm:$0xf0]  ;;  %v4931_v17 = vld [vmem:[#allocation6 + $0x16c] sm:$0xf] }
 0x118   :  { %2691 = vmatpush.bf16.msrb.mxu0 %v4129_v37  ;;  %v3682_v37 = vld [vmem:[#allocation6 + $0x2d8] sm:$0xf0]  ;;  %v4705_v39 = vor.u32 %v5233_v23, %v4704_v22  ;;  %v3525_v10 = vor.u32 %v4935_v1, %v3522_v2  ;;  %v5209_v1 = vld [vmem:[#allocation6 + $0xa14] sm:$0xf0] }
 0x119   :  { %v3685_v48 = vor.u32 %v4975_v36, %v3682_v37  ;;  %v3506_v30 = vld [vmem:[#allocation6 + $0x178] sm:$0xf0]  ;;  %v4927_v37 = vld [vmem:[#allocation6 + $0x14c] sm:$0xf] }
 0x11a   :  { %2704 = vmatpush.bf16.msrb.mxu1 %v4257_v40  ;;  %2717 = vmatpush.bf16.msrb.mxu2 %v4385_v41  ;;  %v4688_v40 = vld [vmem:[#allocation6 + $0xaa8] sm:$0xf]  ;;  %v3429_v41 = vor.u32 %v4911_v24, %v3426_v26  ;;  %v3509_v23 = vor.u32 %v4931_v17, %v3506_v30  ;;  %v4895_v26 = vld [vmem:[#allocation6 + $0x4c] sm:$0xf]  ;;  %v3362_v36 = vld [vmem:[#allocation6 + $0x58] sm:$0xf0] }
 0x11b   :  { %2730 = vmatpush.bf16.msrb.mxu3 %v4513_v47  ;;  %v516_v47 = vperm.slane %v5621_v7, 1  ;;  %v4689_v57 = vor.u32 %v5229_v44, %v4688_v40  ;;  %v3413_v7 = vor.u32 %v4907_v45, %v3410_v51  ;;  %v4640_v24 = vld [vmem:[#allocation6 + $0xa48] sm:$0xf]  ;;  %v3618_v44 = vld [vmem:[#allocation6 + $0x258] sm:$0xf0]  ;;  %v3365_v51 = vor.u32 %v4895_v26, %v3362_v36 }
 0x11c   :  { %2692 = vmatpush.bf16.msrb.mxu0 %v4113_v56  ;;  %v3666_v56 = vld [vmem:[#allocation6 + $0x2b8] sm:$0xf0] }
 0x11d   :  { %v3669_v63 = vor.u32 %v4971_v55, %v3666_v56  ;;  %v5213_v55 = vld [vmem:[#allocation6 + $0xa34] sm:$0xf0]  ;;  %v4891_v56 = vld [vmem:[#allocation6 + $0x2c] sm:$0xf]  ;;  %v3954_v30 = vld [vmem:[#allocation6 + $0x4f8] sm:$0xf0] }
 0x11e   :  { %2705 = vmatpush.bf16.msrb.mxu1 %v4241_v59  ;;  %2718 = vmatpush.bf16.msrb.mxu2 %v4369_v60  ;;  %v2475_v59 = vadd.f32 %v5640_v33, %v516_v47  ;;  %v4672_v60 = vld [vmem:[#allocation6 + $0xa88] sm:$0xf]  ;;  %v4899_v33 = vld [vmem:[#allocation6 + $0x6c] sm:$0xf]  ;;  %v3810_v36 = vld [vmem:[#allocation6 + $0x3d8] sm:$0xf0] }
 0x11f   :  { %2731 = vmatpush.bf16.msrb.mxu3 %v4497_v0  ;;  %v3394_v0 = vld [vmem:[#allocation6 + $0x98] sm:$0xf0]  ;;  %v4673_v5 = vor.u32 %v5225_v61, %v4672_v60  ;;  %v4955_v61 = vld [vmem:[#allocation6 + $0x22c] sm:$0xf] }
 0x120   :  { %2693 = vmatpush.bf16.msrb.mxu0 %v4097_v11  ;;  %v2487_v6 = vpop.f32.mrf.mxu0  ;;  %v3397_v9 = vor.u32 %v4903_v62, %v3394_v0  ;;  %v4656_v11 = vld [vmem:[#allocation6 + $0xa68] sm:$0xf]  ;;  %v3474_v60 = vld [vmem:[#allocation6 + $0x138] sm:$0xf0] }
 0x121   :  { %v2488_v13 = vadd.f32 %v2487_v6, %v2475_v59  ;;  %v4923_v59 = vld [vmem:[#allocation6 + $0x12c] sm:$0xf]  ;;  %v3602_v62 = vld [vmem:[#allocation6 + $0x238] sm:$0xf0]  ;;  %v4608_v0 = vld [vmem:[#allocation6 + $0xa08] sm:$0xf] }
 0x122   :  { %2706 = vmatpush.bf16.msrb.mxu1 %v4225_v15  ;;  %2719 = vmatpush.bf16.msrb.mxu2 %v4353_v16  ;;  %v2500_v14 = vpop.f32.mrf.mxu1  ;;  %v3653_v15 = vor.u32 %v4967_v3, %v3650_v4  ;;  %v3378_v16 = vld [vmem:[#allocation6 + $0x78] sm:$0xf0]  ;;  %v3477_v3 = vor.u32 %v4923_v59, %v3474_v60  ;;  %v4887_v4 = vld [vmem:[#allocation6 + $0xc] sm:$0xf]  ;;  %v4609_v17 = vor.u32 %v5209_v1, %v4608_v0 }
 0x123   :  { %2732 = vmatpush.bf16.msrb.mxu3 %v4481_v19  ;;  %2694 = vmatmul.bf16.vlgmr.msrb.gmra.mxu0 %v5586_v46  ;;  %v4963_v19 = vld [vmem:[#allocation6 + $0x26c] sm:$0xf]  ;;  %v3381_v22 = vor.u32 %v4899_v33, %v3378_v16  ;;  %v3586_v33 = vld [vmem:[#allocation6 + $0x218] sm:$0xf0] }
 0x124   :  { %2738 = vmatpush.bf16.msra.mxu0 %v4721_v8  ;;  %v3634_v8 = vld [vmem:[#allocation6 + $0x278] sm:$0xf0]  ;;  %v4919_v6 = vld [vmem:[#allocation6 + $0x10c] sm:$0xf] }
 0x125   :  { %2720 = vmatmul.bf16.vlgmr.msrb.gmra.mxu2 %v5603_v38  ;;  %2707 = vmatmul.bf16.vlgmr.msrb.gmra.mxu1 %v5590_v50  ;;  %v3637_v32 = vor.u32 %v4963_v19, %v3634_v8  ;;  %v5043_v16 = vld [vmem:[#allocation6 + $0x4ec] sm:$0xf]  ;;  %v4082_v8 = vld [vmem:[#allocation6 + $0x5f8] sm:$0xf0] }
 0x126   :  { %2751 = vmatpush.bf16.msra.mxu1 %v3445_v20  ;;  %2764 = vmatpush.bf16.msra.mxu2 %v3573_v21  ;;  %v2501_v20 = vadd.f32 %v2500_v14, %v2488_v13  ;;  %v4657_v21 = vor.u32 %v5221_v12, %v4656_v11  ;;  %v3458_v11 = vld [vmem:[#allocation6 + $0x118] sm:$0xf0]  ;;  %v4951_v12 = vld [vmem:[#allocation6 + $0x20c] sm:$0xf]  ;;  %v3957_v26 = vor.u32 %v5043_v16, %v3954_v30 }
 0x127   :  { %2777 = vmatpush.bf16.msra.mxu3 %v3701_v25  ;;  %v5217_v25 = vld [vmem:[#allocation6 + $0xa54] sm:$0xf0]  ;;  %v5011_v14 = vld [vmem:[#allocation6 + $0x3ec] sm:$0xf]  ;;  %v4050_v59 = vld [vmem:[#allocation6 + $0x5b8] sm:$0xf0] }
 0x128   :  { %2733 = vmatmul.bf16.vlgmr.msrb.gmra.mxu3 %v5607_v18  ;;  %2739 = vmatpush.bf16.msra.mxu0 %v4705_v39  ;;  %v2513_v31 = vpop.f32.mrf.mxu2  ;;  %v3490_v39 = vld [vmem:[#allocation6 + $0x158] sm:$0xf0]  ;;  %v4641_v45 = vor.u32 %v5217_v25, %v4640_v24  ;;  %v5075_v19 = vld [vmem:[#allocation6 + $0x5ec] sm:$0xf]  ;;  %v3589_v24 = vor.u32 %v4951_v12, %v3586_v33 }
 0x129   :  { %v2514_v40 = vadd.f32 %v2513_v31, %v2501_v20  ;;  %v3493_v53 = vor.u32 %v4927_v37, %v3490_v39  ;;  %v4085_v31 = vor.u32 %v5075_v19, %v4082_v8  ;;  %v5039_v37 = vld [vmem:[#allocation6 + $0x4cc] sm:$0xf]  ;;  %v3890_v19 = vld [vmem:[#allocation6 + $0x478] sm:$0xf0] }
 0x12a   :  { %2752 = vmatpush.bf16.msra.mxu1 %v3429_v41  ;;  %2765 = vmatpush.bf16.msra.mxu2 %v3557_v43  ;;  %v4959_v43 = vld [vmem:[#allocation6 + $0x24c] sm:$0xf] }
 0x12b   :  { %2778 = vmatpush.bf16.msra.mxu3 %v3685_v48  ;;  %v2526_v41 = vpop.f32.mrf.mxu3  ;;  %v2489_v48 = vpop.f32.mrf.mxu0  ;;  %v5099_v60 = vld [vmem:[#allocation6 + $0x6ac] sm:$0xf] }
 0x12c   :  { %2740 = vmatpush.bf16.msra.mxu0 %v4689_v57  ;;  %v5648_v47 = vadd.f32 %v2526_v41, %v2514_v40  ;;  %v2502_v57 = vpop.f32.mrf.mxu1  ;;  %v3938_v40 = vld [vmem:[#allocation6 + $0x4d8] sm:$0xf0]  ;;  %v5071_v41 = vld [vmem:[#allocation6 + $0x5cc] sm:$0xf] }
 0x12d   :  { %v4999_v1 = vld [vmem:[#allocation6 + $0x38c] sm:$0xf] }
 0x12e   :  { %2753 = vmatpush.bf16.msra.mxu1 %v3413_v7  ;;  %2766 = vmatpush.bf16.msra.mxu2 %v3541_v58  ;;  %v3621_v7 = vor.u32 %v4959_v43, %v3618_v44  ;;  %v3346_v58 = vld [vmem:[#allocation6 + $0x38] sm:$0xf0]  ;;  %v5103_v44 = vld [vmem:[#allocation6 + $0x6cc] sm:$0xf] }
 0x12f   :  { %2779 = vmatpush.bf16.msra.mxu3 %v3669_v63  ;;  %v4625_v63 = vor.u32 %v5213_v55, %v4624_v54  ;;  %v3349_v2 = vor.u32 %v4891_v56, %v3346_v58  ;;  %v4066_v43 = vld [vmem:[#allocation6 + $0x5d8] sm:$0xf0]  ;;  %v5003_v54 = vld [vmem:[#allocation6 + $0x3ac] sm:$0xf] }
 0x130   :  { %2741 = vmatpush.bf16.msra.mxu0 %v4673_v5  ;;  %v3330_v5 = vld [vmem:[#allocation6 + $0x18] sm:$0xf0]  ;;  %v5035_v56 = vld [vmem:[#allocation6 + $0x4ac] sm:$0xf] }
 0x131   :  { %v3333_v20 = vor.u32 %v4887_v4, %v3330_v5  ;;  %v3794_v55 = vld [vmem:[#allocation6 + $0x3b8] sm:$0xf0]  ;;  %v5067_v58 = vld [vmem:[#allocation6 + $0x5ac] sm:$0xf] }
 0x132   :  { %2754 = vmatpush.bf16.msra.mxu1 %v3397_v9  ;;  %2767 = vmatpush.bf16.msra.mxu2 %v3525_v10  ;;  %v2515_v9 = vpop.f32.mrf.mxu2  ;;  %v3605_v10 = vor.u32 %v4955_v61, %v3602_v62  ;;  %v4178_v61 = vld [vmem:[#allocation6 + $0x6b8] sm:$0xf0]  ;;  %v3797_v62 = vor.u32 %v5003_v54, %v3794_v55  ;;  %v4053_v0 = vor.u32 %v5067_v58, %v4050_v59  ;;  %v5027_v16 = vld [vmem:[#allocation6 + $0x46c] sm:$0xf] }
 0x133   :  { %2780 = vmatpush.bf16.msra.mxu3 %v3653_v15  ;;  %v2528_v13 = vpop.f32.mrf.mxu3  ;;  %v3826_v15 = vld [vmem:[#allocation6 + $0x3f8] sm:$0xf0]  ;;  %v4181_v4 = vor.u32 %v5099_v60, %v4178_v61  ;;  %v5059_v8 = vld [vmem:[#allocation6 + $0x56c] sm:$0xf] }
 0x134   :  { %2742 = vmatpush.bf16.msra.mxu0 %v4657_v21  ;;  %v3461_v21 = vor.u32 %v4919_v6, %v3458_v11  ;;  %v3829_v25 = vor.u32 %v5011_v14, %v3826_v15  ;;  %v3906_v5 = vld [vmem:[#allocation6 + $0x498] sm:$0xf0]  ;;  %v5063_v6 = vld [vmem:[#allocation6 + $0x58c] sm:$0xf] }
 0x135   :  { %v4034_v9 = vld [vmem:[#allocation6 + $0x598] sm:$0xf0]  ;;  %v4995_v14 = vld [vmem:[#allocation6 + $0x36c] sm:$0xf] }
 0x136   :  { %2755 = vmatpush.bf16.msra.mxu1 %v3381_v22  ;;  %2768 = vmatpush.bf16.msra.mxu2 %v3509_v23  ;;  %v5107_v22 = vld [vmem:[#allocation6 + $0x6ec] sm:$0xf]  ;;  %v4210_v23 = vld [vmem:[#allocation6 + $0x6f8] sm:$0xf0]  ;;  %v4037_v13 = vor.u32 %v5063_v6, %v4034_v9 }
 0x137   :  { %2781 = vmatpush.bf16.msra.mxu3 %v3637_v32  ;;  %v5007_v32 = vld [vmem:[#allocation6 + $0x3cc] sm:$0xf]  ;;  %v4213_v39 = vor.u32 %v5107_v22, %v4210_v23  ;;  %v4162_v11 = vld [vmem:[#allocation6 + $0x698] sm:$0xf0] }
 0x138   :  { %2743 = vmatpush.bf16.msra.mxu0 %v4641_v45  ;;  %v4194_v45 = vld [vmem:[#allocation6 + $0x6d8] sm:$0xf0]  ;;  %v3813_v48 = vor.u32 %v5007_v32, %v3810_v36  ;;  %v5019_v58 = vld [vmem:[#allocation6 + $0x42c] sm:$0xf] }
 0x139   :  { %v4197_v57 = vor.u32 %v5103_v44, %v4194_v45  ;;  %v3762_v15 = vld [vmem:[#allocation6 + $0x378] sm:$0xf0]  ;;  %v5087_v44 = vld [vmem:[#allocation6 + $0x64c] sm:$0xf] }
 0x13a   :  { %2756 = vmatpush.bf16.msra.mxu1 %v3365_v51  ;;  %2769 = vmatpush.bf16.msra.mxu2 %v3493_v53  ;;  %v3941_v51 = vor.u32 %v5039_v37, %v3938_v40  ;;  %v4069_v53 = vor.u32 %v5071_v41, %v4066_v43  ;;  %v4146_v22 = vld [vmem:[#allocation6 + $0x678] sm:$0xf0]  ;;  %v3765_v23 = vor.u32 %v4995_v14, %v3762_v15  ;;  %v5051_v61 = vld [vmem:[#allocation6 + $0x52c] sm:$0xf] }
 0x13b   :  { %2782 = vmatpush.bf16.msra.mxu3 %v3621_v7  ;;  %v3922_v7 = vld [vmem:[#allocation6 + $0x4b8] sm:$0xf0]  ;;  %v5015_v6 = vld [vmem:[#allocation6 + $0x40c] sm:$0xf] }
 0x13c   :  { %2744 = vmatpush.bf16.msra.mxu0 %v4625_v63  ;;  %v3925_v63 = vor.u32 %v5035_v56, %v3922_v7  ;;  %v3874_v37 = vld [vmem:[#allocation6 + $0x458] sm:$0xf0]  ;;  %v5171_v14 = vld [vmem:[#allocation6 + $0x8ec] sm:$0xf] }
 0x13d   :  { %v4002_v40 = vld [vmem:[#allocation6 + $0x558] sm:$0xf0] }
 0x13e   :  { %2757 = vmatpush.bf16.msra.mxu1 %v3349_v2  ;;  %2770 = vmatpush.bf16.msra.mxu2 %v3477_v3  ;;  %v3778_v2 = vld [vmem:[#allocation6 + $0x398] sm:$0xf0]  ;;  %v5031_v3 = vld [vmem:[#allocation6 + $0x48c] sm:$0xf] }
 0x13f   :  { %2783 = vmatpush.bf16.msra.mxu3 %v3605_v10  ;;  %v3781_v12 = vor.u32 %v4999_v1, %v3778_v2  ;;  %v3909_v33 = vor.u32 %v5031_v3, %v3906_v5  ;;  %v4130_v45 = vld [vmem:[#allocation6 + $0x658] sm:$0xf0]  ;;  %v4983_v2 = vld [vmem:[#allocation6 + $0x30c] sm:$0xf] }
 0x140   :  { %2745 = vmatpush.bf16.msra.mxu0 %v4609_v17  ;;  %v2539_v10 = vpop.f32.mrf.mxu0  ;;  %v3730_v7 = vld [vmem:[#allocation6 + $0x338] sm:$0xf0]  ;;  %v4133_v59 = vor.u32 %v5087_v44, %v4130_v45 }
 0x141   :  { %v3858_v60 = vld [vmem:[#allocation6 + $0x438] sm:$0xf0] }
 0x142   :  { %2758 = vmatpush.bf16.msra.mxu1 %v3333_v20  ;;  %2771 = vmatpush.bf16.msra.mxu2 %v3461_v21  ;;  %v4018_v20 = vld [vmem:[#allocation6 + $0x578] sm:$0xf0]  ;;  %v5091_v21 = vld [vmem:[#allocation6 + $0x66c] sm:$0xf] }
 0x143   :  { %2784 = vmatpush.bf16.msra.mxu3 %v3589_v24  ;;  %2746 = vmatmul.bf16.vlgmr.msra.gmra.mxu0 %v5605_v42  ;;  %v4021_v24 = vor.u32 %v5059_v8, %v4018_v20  ;;  %v4149_v32 = vor.u32 %v5091_v21, %v4146_v22  ;;  %v3714_v3 = vld [vmem:[#allocation6 + $0x318] sm:$0xf0]  ;;  %v5235_v21 = vld [vmem:[#allocation6 + $0xaec] sm:$0xf] }
 0x144   :  { %2790 = vmatpush.bf16.msrb.mxu0 %v3829_v25  ;;  %v4991_v25 = vld [vmem:[#allocation6 + $0x34c] sm:$0xf]  ;;  %v3842_v9 = vld [vmem:[#allocation6 + $0x418] sm:$0xf0] }
 0x145   :  { %2772 = vmatmul.bf16.vlgmr.msra.gmra.mxu2 %v5576_v35  ;;  %2759 = vmatmul.bf16.vlgmr.msra.gmra.mxu1 %v5574_v34  ;;  %v5095_v35 = vld [vmem:[#allocation6 + $0x68c] sm:$0xf]  ;;  %v2552_v34 = vpop.f32.mrf.mxu1  ;;  %v3845_v8 = vor.u32 %v5015_v6, %v3842_v9  ;;  %v4722_v22 = vld [vmem:[#allocation6 + $0xaf8] sm:$0xf0] }
 0x146   :  { %2803 = vmatpush.bf16.msrb.mxu1 %v3957_v26  ;;  %2816 = vmatpush.bf16.msrb.mxu2 %v4085_v31  ;;  %v4165_v17 = vor.u32 %v5095_v35, %v4162_v11  ;;  %v3746_v26 = vld [vmem:[#allocation6 + $0x358] sm:$0xf0]  ;;  %v5023_v31 = vld [vmem:[#allocation6 + $0x44c] sm:$0xf] }
 0x147   :  { %2829 = vmatpush.bf16.msrb.mxu3 %v4213_v39  ;;  %v5055_v39 = vld [vmem:[#allocation6 + $0x54c] sm:$0xf]  ;;  %v3877_v55 = vor.u32 %v5023_v31, %v3874_v37  ;;  %v3970_v11 = vld [vmem:[#allocation6 + $0x518] sm:$0xf0] }
 0x148   :  { %2785 = vmatmul.bf16.vlgmr.msra.gmra.mxu3 %v5570_v28  ;;  %2791 = vmatpush.bf16.msrb.mxu0 %v3813_v48  ;;  %v2540_v28 = vadd.f32 %v2539_v10, %v5648_v47  ;;  %v3893_v47 = vor.u32 %v5027_v16, %v3890_v19  ;;  %v2565_v36 = vpop.f32.mrf.mxu2  ;;  %v2541_v48 = vpop.f32.mrf.mxu0  ;;  %v4005_v56 = vor.u32 %v5055_v39, %v4002_v40  ;;  %v5047_v10 = vld [vmem:[#allocation6 + $0x50c] sm:$0xf]  ;;  %v4594_v19 = vld [vmem:[#allocation6 + $0x9f8] sm:$0xf0] }
 0x149   :  { %v3717_v16 = vor.u32 %v4983_v2, %v3714_v3  ;;  %v3973_v20 = vor.u32 %v5047_v10, %v3970_v11  ;;  %v4322_v31 = vld [vmem:[#allocation6 + $0x7d8] sm:$0xf0]  ;;  %v5199_v39 = vld [vmem:[#allocation6 + $0x9cc] sm:$0xf] }
 0x14a   :  { %2804 = vmatpush.bf16.msrb.mxu1 %v3941_v51  ;;  %2817 = vmatpush.bf16.msrb.mxu2 %v4069_v53  ;;  %v2553_v30 = vadd.f32 %v2552_v34, %v2540_v28  ;;  %v3749_v51 = vor.u32 %v4991_v25, %v3746_v26  ;;  %v5079_v28 = vld [vmem:[#allocation6 + $0x60c] sm:$0xf]  ;;  %v4450_v37 = vld [vmem:[#allocation6 + $0x8d8] sm:$0xf0] }
 0x14b   :  { %2830 = vmatpush.bf16.msrb.mxu3 %v4197_v57  ;;  %v2578_v43 = vpop.f32.mrf.mxu3  ;;  %v4987_v57 = vld [vmem:[#allocation6 + $0x32c] sm:$0xf]  ;;  %v4578_v40 = vld [vmem:[#allocation6 + $0x9d8] sm:$0xf0] }
 0x14c   :  { %2792 = vmatpush.bf16.msrb.mxu0 %v3797_v62  ;;  %v2566_v41 = vadd.f32 %v2565_v36, %v2553_v30  ;;  %v3986_v62 = vld [vmem:[#allocation6 + $0x538] sm:$0xf0]  ;;  %v3733_v1 = vor.u32 %v4987_v57, %v3730_v7  ;;  %v5203_v30 = vld [vmem:[#allocation6 + $0x9ec] sm:$0xf]  ;;  %v4725_v36 = vor.u32 %v5235_v21, %v4722_v22  ;;  %v4581_v48 = vor.u32 %v5199_v39, %v4578_v40 }
 0x14d   :  { %v2554_v53 = vpop.f32.mrf.mxu1  ;;  %v3989_v5 = vor.u32 %v5051_v61, %v3986_v62  ;;  %v4597_v25 = vor.u32 %v5203_v30, %v4594_v19  ;;  %v5135_v26 = vld [vmem:[#allocation6 + $0x7cc] sm:$0xf]  ;;  %v4434_v57 = vld [vmem:[#allocation6 + $0x8b8] sm:$0xf0] }
 0x14e   :  { %2805 = vmatpush.bf16.msrb.mxu1 %v3925_v63  ;;  %2818 = vmatpush.bf16.msrb.mxu2 %v4053_v0  ;;  %v5655_v54 = vadd.f32 %v2578_v43, %v2566_v41  ;;  %v5083_v63 = vld [vmem:[#allocation6 + $0x62c] sm:$0xf]  ;;  %v4114_v0 = vld [vmem:[#allocation6 + $0x638] sm:$0xf0]  ;;  %v4325_v44 = vor.u32 %v5135_v26, %v4322_v31 }
 0x14f   :  { %2831 = vmatpush.bf16.msrb.mxu3 %v4181_v4  ;;  %v3861_v4 = vor.u32 %v5019_v58, %v3858_v60  ;;  %v4117_v35 = vor.u32 %v5083_v63, %v4114_v0  ;;  %v5231_v41 = vld [vmem:[#allocation6 + $0xacc] sm:$0xf]  ;;  %v4706_v43 = vld [vmem:[#allocation6 + $0xad8] sm:$0xf0] }
 0x150   :  { %2793 = vmatpush.bf16.msrb.mxu0 %v3781_v12  ;;  %v4098_v12 = vld [vmem:[#allocation6 + $0x618] sm:$0xf0]  ;;  %v2567_v34 = vpop.f32.mrf.mxu2  ;;  %v5195_v7 = vld [vmem:[#allocation6 + $0x9ac] sm:$0xf] }
 0x151   :  { %v4306_v53 = vld [vmem:[#allocation6 + $0x7b8] sm:$0xf0]  ;;  %v5127_v0 = vld [vmem:[#allocation6 + $0x78c] sm:$0xf] }
 0x152   :  { %2806 = vmatpush.bf16.msrb.mxu1 %v3909_v33  ;;  %2819 = vmatpush.bf16.msrb.mxu2 %v4037_v13  ;;  %v5139_v33 = vld [vmem:[#allocation6 + $0x7ec] sm:$0xf]  ;;  %v4338_v13 = vld [vmem:[#allocation6 + $0x7f8] sm:$0xf0] }
 0x153   :  { %2832 = vmatpush.bf16.msrb.mxu3 %v4165_v17  ;;  %v2580_v15 = vpop.f32.mrf.mxu3  ;;  %v4466_v17 = vld [vmem:[#allocation6 + $0x8f8] sm:$0xf0]  ;;  %v5123_v11 = vld [vmem:[#allocation6 + $0x76c] sm:$0xf] }
 0x154   :  { %2794 = vmatpush.bf16.msrb.mxu0 %v3765_v23  ;;  %v4101_v23 = vor.u32 %v5079_v28, %v4098_v12  ;;  %v4562_v58 = vld [vmem:[#allocation6 + $0x9b8] sm:$0xf0]  ;;  %v5155_v12 = vld [vmem:[#allocation6 + $0x86c] sm:$0xf] }
 0x155   :  { %v4690_v60 = vld [vmem:[#allocation6 + $0xab8] sm:$0xf0]  ;;  %v4565_v63 = vor.u32 %v5195_v7, %v4562_v58  ;;  %v5219_v15 = vld [vmem:[#allocation6 + $0xa6c] sm:$0xf] }
 0x156   :  { %2807 = vmatpush.bf16.msrb.mxu1 %v3893_v47  ;;  %2820 = vmatpush.bf16.msrb.mxu2 %v4021_v24  ;;  %v4341_v47 = vor.u32 %v5139_v33, %v4338_v13  ;;  %v4469_v24 = vor.u32 %v5171_v14, %v4466_v17  ;;  %v4418_v3 = vld [vmem:[#allocation6 + $0x898] sm:$0xf0]  ;;  %v5187_v13 = vld [vmem:[#allocation6 + $0x96c] sm:$0xf] }
 0x157   :  { %2833 = vmatpush.bf16.msrb.mxu3 %v4149_v32  ;;  %v5167_v32 = vld [vmem:[#allocation6 + $0x8cc] sm:$0xf]  ;;  %v4274_v28 = vld [vmem:[#allocation6 + $0x778] sm:$0xf0] }
 0x158   :  { %2795 = vmatpush.bf16.msrb.mxu0 %v3749_v51  ;;  %v4453_v45 = vor.u32 %v5167_v32, %v4450_v37  ;;  %v5131_v51 = vld [vmem:[#allocation6 + $0x7ac] sm:$0xf]  ;;  %v4402_v33 = vld [vmem:[#allocation6 + $0x878] sm:$0xf0]  ;;  %v4277_v17 = vor.u32 %v5123_v11, %v4274_v28  ;;  %v5244_v28 = vld [vmem:[#allocation9 + $0x30] sm:$0xff] }
 0x159   :  { %v4309_v61 = vor.u32 %v5131_v51, %v4306_v53  ;;  %v4530_v14 = vld [vmem:[#allocation6 + $0x978] sm:$0xf0]  ;;  %v4405_v30 = vor.u32 %v5155_v12, %v4402_v33  ;;  %v5151_v21 = vld [vmem:[#allocation6 + $0x84c] sm:$0xf]  ;;  %v5252_v12 = vld [vmem:[#allocation9 + $0x70] sm:$0xff] }
 0x15a   :  { %2808 = vmatpush.bf16.msrb.mxu1 %v3877_v55  ;;  %2821 = vmatpush.bf16.msrb.mxu2 %v4005_v56  ;;  %v5163_v55 = vld [vmem:[#allocation6 + $0x8ac] sm:$0xf]  ;;  %v4709_v56 = vor.u32 %v5231_v41, %v4706_v43  ;;  %v4533_v19 = vor.u32 %v5187_v13, %v4530_v14  ;;  %v4642_v31 = vld [vmem:[#allocation6 + $0xa58] sm:$0xf0]  ;;  %v5242_v13 = vld [vmem:[#allocation9 + $0x20] sm:$0xff] }
 0x15b   :  { %2834 = vmatpush.bf16.msrb.mxu3 %v4133_v59  ;;  %v5227_v59 = vld [vmem:[#allocation6 + $0xaac] sm:$0xf]  ;;  %v4437_v62 = vor.u32 %v5163_v55, %v4434_v57  ;;  %v4370_v51 = vld [vmem:[#allocation6 + $0x838] sm:$0xf0] }
 0x15c   :  { %2796 = vmatpush.bf16.msrb.mxu0 %v3733_v1  ;;  %v4290_v1 = vld [vmem:[#allocation6 + $0x798] sm:$0xf0]  ;;  %v4693_v2 = vor.u32 %v5227_v59, %v4690_v60  ;;  %v5215_v26 = vld [vmem:[#allocation6 + $0xa4c] sm:$0xf] }
 0x15d   :  { %v4293_v9 = vor.u32 %v5127_v0, %v4290_v1  ;;  %v5115_v43 = vld [vmem:[#allocation6 + $0x72c] sm:$0xf]  ;;  %v4498_v55 = vld [vmem:[#allocation6 + $0x938] sm:$0xf0] }
 0x15e   :  { %2809 = vmatpush.bf16.msrb.mxu1 %v3861_v4  ;;  %2822 = vmatpush.bf16.msrb.mxu2 %v3989_v5  ;;  %v5191_v4 = vld [vmem:[#allocation6 + $0x98c] sm:$0xf]  ;;  %v4546_v5 = vld [vmem:[#allocation6 + $0x998] sm:$0xf0] }
 0x15f   :  { %2835 = vmatpush.bf16.msrb.mxu3 %v4117_v35  ;;  %v4549_v35 = vor.u32 %v5191_v4, %v4546_v5  ;;  %v5179_v53 = vld [vmem:[#allocation6 + $0x92c] sm:$0xf]  ;;  %v4626_v57 = vld [vmem:[#allocation6 + $0xa38] sm:$0xf0] }
 0x160   :  { %2797 = vmatpush.bf16.msrb.mxu0 %v3717_v16  ;;  %v5661_v6 = vpop.f32.mrf.mxu0  ;;  %v4658_v16 = vld [vmem:[#allocation6 + $0xa78] sm:$0xf0]  ;;  %v4501_v59 = vor.u32 %v5179_v53, %v4498_v55  ;;  %v5111_v60 = vld [vmem:[#allocation6 + $0x70c] sm:$0xf] }
 0x161   :  { %v4661_v22 = vor.u32 %v5219_v15, %v4658_v16  ;;  %v4354_v0 = vld [vmem:[#allocation6 + $0x818] sm:$0xf0]  ;;  %v5175_v1 = vld [vmem:[#allocation6 + $0x90c] sm:$0xf]  ;;  %v5250_v16 = vld [vmem:[#allocation9 + $0x60] sm:$0xff] }
 0x162   :  { %2810 = vmatpush.bf16.msrb.mxu1 %v3845_v8  ;;  %2823 = vmatpush.bf16.msrb.mxu2 %v3973_v20  ;;  %v5663_v10 = vpop.f32.mrf.mxu1  ;;  %v5119_v8 = vld [vmem:[#allocation6 + $0x74c] sm:$0xf]  ;;  %v4258_v20 = vld [vmem:[#allocation6 + $0x758] sm:$0xf0] }
 0x163   :  { %2836 = vmatpush.bf16.msrb.mxu3 %v4101_v23  ;;  %2798 = vmatmul.bf16.vlgmr.msrb.gmra.mxu0 %v5572_v29  ;;  %v5223_v29 = vld [vmem:[#allocation6 + $0xa8c] sm:$0xf]  ;;  %v4386_v23 = vld [vmem:[#allocation6 + $0x858] sm:$0xf0]  ;;  %v4261_v37 = vor.u32 %v5119_v8, %v4258_v20  ;;  %v5248_v20 = vld [vmem:[#allocation9 + $0x50] sm:$0xff] }
 0x164   :  { %2842 = vmatpush.bf16.msra.mxu0 %v4341_v47  ;;  %v5183_v47 = vld [vmem:[#allocation6 + $0x94c] sm:$0xf]  ;;  %v4389_v40 = vor.u32 %v5151_v21, %v4386_v23  ;;  %v4610_v4 = vld [vmem:[#allocation6 + $0xa18] sm:$0xf0]  ;;  %v2592_v23 = vadd.f32 %v5661_v6, %v5655_v54  ;;  %v5256_v6 = vld [vmem:[#allocation9 + $0x90] sm:$0xff] }
 0x165   :  { %2824 = vmatmul.bf16.vlgmr.msrb.gmra.mxu2 %v5592_v52  ;;  %2811 = vmatmul.bf16.vlgmr.msrb.gmra.mxu1 %v5588_v49  ;;  %v5159_v52 = vld [vmem:[#allocation6 + $0x88c] sm:$0xf]  ;;  %v5253_v11 = vld [vmem:[#allocation9 + $0x78] sm:$0xff] }
 0x166   :  { %2855 = vmatpush.bf16.msra.mxu1 %v4469_v24  ;;  %2868 = vmatpush.bf16.msra.mxu2 %v4597_v25  ;;  %v4421_v49 = vor.u32 %v5159_v52, %v4418_v3  ;;  %v4514_v24 = vld [vmem:[#allocation6 + $0x958] sm:$0xf0]  ;;  %v5207_v3 = vld [vmem:[#allocation6 + $0xa0c] sm:$0xf] }
 0x167   :  { %2881 = vmatpush.bf16.msra.mxu3 %v4725_v36  ;;  %v4517_v41 = vor.u32 %v5183_v47, %v4514_v24  ;;  %v4482_v52 = vld [vmem:[#allocation6 + $0x918] sm:$0xf0]  ;;  %v5251_v33 = vld [vmem:[#allocation9 + $0x68] sm:$0xff] }
 0x168   :  { %2837 = vmatmul.bf16.vlgmr.msrb.gmra.mxu3 %v5586_v46  ;;  %2843 = vmatpush.bf16.msra.mxu0 %v4325_v44  ;;  %v4674_v46 = vld [vmem:[#allocation6 + $0xa98] sm:$0xf0]  ;;  %v5665_v25 = vpop.f32.mrf.mxu2  ;;  %v2593_v36 = vpop.f32.mrf.mxu0  ;;  %v5239_v47 = vld [vmem:[#allocation9 + $0x8] sm:$0xff] }
 0x169   :  { %v4677_v34 = vor.u32 %v5223_v29, %v4674_v46  ;;  %v4242_v44 = vld [vmem:[#allocation6 + $0x738] sm:$0xf0]  ;;  %v5247_v24 = vld [vmem:[#allocation9 + $0x48] sm:$0xff]  ;;  %v2605_v36 = vadd.f32 %v5663_v10, %v2592_v23 }
 0x16a   :  { %2856 = vmatpush.bf16.msra.mxu1 %v4453_v45  ;;  %2869 = vmatpush.bf16.msra.mxu2 %v4581_v48  ;;  %v2606_v39 = vpop.f32.mrf.mxu1  ;;  %v5147_v45 = vld [vmem:[#allocation6 + $0x82c] sm:$0xf]  ;;  %v4645_v48 = vor.u32 %v5215_v26, %v4642_v31  ;;  %v4245_v7 = vor.u32 %v5115_v43, %v4242_v44  ;;  %v5261_v15 = vld [vmem:[#allocation9 + $0xb8] sm:$0xff]  ;;  %v5258_v31 = vld [vmem:[#allocation9 + $0xa0] sm:$0xff] }
 0x16b   :  { %2882 = vmatpush.bf16.msra.mxu3 %v4709_v56  ;;  %v5667_v32 = vpop.f32.mrf.mxu3  ;;  %v5211_v56 = vld [vmem:[#allocation6 + $0xa2c] sm:$0xf]  ;;  %v4373_v58 = vor.u32 %v5147_v45, %v4370_v51  ;;  %v5238_v39 = vld [vmem:[#allocation9] sm:$0xff]  ;;  %v5257_v43 = vld [vmem:[#allocation9 + $0x98] sm:$0xff]  ;;  %v2895_v44 = vmax.f32 %v2605_v36, 0.0 }
 0x16c   :  { %2844 = vmatpush.bf16.msra.mxu0 %v4309_v61  ;;  %v4226_v61 = vld [vmem:[#allocation6 + $0x718] sm:$0xf0]  ;;  %v5255_v53 = vld [vmem:[#allocation9 + $0x88] sm:$0xff] }
 0x16d   :  { %v4229_v29 = vor.u32 %v5111_v60, %v4226_v61  ;;  %v2899_v45 = vpack.c.bf16 %v2895_v44, %v2895_v44 }
 0x16e   :  { %2857 = vmatpush.bf16.msra.mxu1 %v4437_v62  ;;  %2870 = vmatpush.bf16.msra.mxu2 %v4565_v63  ;;  %v5143_v62 = vld [vmem:[#allocation6 + $0x80c] sm:$0xf]  ;;  %v4629_v63 = vor.u32 %v5211_v56, %v4626_v57  ;;  %v5254_v57 = vld [vmem:[#allocation9 + $0x80] sm:$0xff] }
 0x16f   :  { %2883 = vmatpush.bf16.msra.mxu3 %v4693_v2  ;;  %v4357_v46 = vor.u32 %v5143_v62, %v4354_v0 }
 0x170   :  { %2845 = vmatpush.bf16.msra.mxu0 %v4293_v9  ;;  %v2619_v2 = vpop.f32.mrf.mxu2  ;;  %v4485_v9 = vor.u32 %v5175_v1, %v4482_v52 }
 0x172   :  { %2858 = vmatpush.bf16.msra.mxu1 %v4421_v49  ;;  %2871 = vmatpush.bf16.msra.mxu2 %v4549_v35  ;;  %v4613_v49 = vor.u32 %v5207_v3, %v4610_v4  ;;  %v5245_v35 = vld [vmem:[#allocation9 + $0x38] sm:$0xff] }
 0x173   :  { %2884 = vmatpush.bf16.msra.mxu3 %v4677_v34  ;;  %v2632_v5 = vpop.f32.mrf.mxu3  ;;  %v5243_v34 = vld [vmem:[#allocation9 + $0x28] sm:$0xff] }
 0x174   :  { %2846 = vmatpush.bf16.msra.mxu0 %v4277_v17 }
 0x176   :  { %2859 = vmatpush.bf16.msra.mxu1 %v4405_v30  ;;  %2872 = vmatpush.bf16.msra.mxu2 %v4533_v19  ;;  %v5260_v19 = vld [vmem:[#allocation9 + $0xb0] sm:$0xff] }
 0x177   :  { %2885 = vmatpush.bf16.msra.mxu3 %v4661_v22  ;;  %v5259_v22 = vld [vmem:[#allocation9 + $0xa8] sm:$0xff] }
 0x178   :  { %2847 = vmatpush.bf16.msra.mxu0 %v4261_v37 }
 0x17a   :  { %2860 = vmatpush.bf16.msra.mxu1 %v4389_v40  ;;  %2873 = vmatpush.bf16.msra.mxu2 %v4517_v41  ;;  %v2894_v40 = vmax.f32 %v5638_v27, 0.0  ;;  %v5246_v41 = vld [vmem:[#allocation9 + $0x40] sm:$0xff] }
 0x17b   :  { %2886 = vmatpush.bf16.msra.mxu3 %v4645_v48  ;;  %v5293_v48 = vld [vmem:[#allocation8] sm:$0xf] }
 0x17c   :  { %2848 = vmatpush.bf16.msra.mxu0 %v4245_v7  ;;  %v2898_v54 = vpack.c.bf16 %v2894_v40, %v2894_v40  ;;  %v517_v51 = vperm.slane %v5293_v48, 2 }
 0x17e   :  { %2861 = vmatpush.bf16.msra.mxu1 %v4373_v58  ;;  %2874 = vmatpush.bf16.msra.mxu2 %v4501_v59  ;;  %v2618_v10 = vadd.f32 %v5665_v25, %v517_v51 }
 0x17f   :  { %2887 = vmatpush.bf16.msra.mxu3 %v4629_v63 }
 0x180   :  { %2849 = vmatpush.bf16.msra.mxu0 %v4229_v29  ;;  %v2643_v14 = vpop.f32.mrf.mxu0  ;;  %v2631_v55 = vadd.f32 %v5667_v32, %v2618_v10 }
 0x182   :  { %2862 = vmatpush.bf16.msra.mxu1 %v4357_v46  ;;  %2875 = vmatpush.bf16.msra.mxu2 %v4485_v9  ;;  %v2656_v17 = vpop.f32.mrf.mxu1  ;;  %v2644_v7 = vadd.f32 %v2643_v14, %v2631_v55 }
 0x183   :  { %2888 = vmatpush.bf16.msra.mxu3 %v4613_v49  ;;  %2850 = vmatmul.bf16.vlgmr.msra.gmra.mxu0 %v5590_v50  ;;  %v5241_v50 = vld [vmem:[#allocation9 + $0x18] sm:$0xff] }
 0x184   :  { %3162 = vmatpush.bf16.msrb.mxu0 %v5245_v35  ;;  %v2657_v61 = vadd.f32 %v2656_v17, %v2644_v7  ;;  %v5264_v17 = vld [vmem:[#allocation9 + $0xd0] sm:$0xff] }
 0x185   :  { %2863 = vmatmul.bf16.vlgmr.msra.gmra.mxu1 %v5603_v38  ;;  %2876 = vmatmul.bf16.vlgmr.msra.gmra.mxu2 %v5607_v18  ;;  %v5249_v38 = vld [vmem:[#allocation9 + $0x58] sm:$0xff] }
 0x186   :  { %3175 = vmatpush.bf16.msrb.mxu1 %v5253_v11  ;;  %2889 = vmatmul.bf16.vlgmr.msra.gmra.mxu3 %v5605_v42  ;;  %v5240_v42 = vld [vmem:[#allocation9 + $0x10] sm:$0xff]  ;;  %v5269_v11 = vld [vmem:[#allocation9 + $0xf8] sm:$0xff] }
 0x187   :  { %3188 = vmatpush.bf16.msrb.mxu2 %v5261_v15  ;;  %3201 = vmatpush.bf16.msrb.mxu3 %v5269_v11  ;;  %v5266_v15 = vld [vmem:[#allocation9 + $0xe0] sm:$0xff] }
 0x188   :  { %3163 = vmatpush.bf16.msrb.mxu0 %v5244_v28  ;;  %v2669_v30 = vpop.f32.mrf.mxu2  ;;  %v2645_v8 = vpop.f32.mrf.mxu0 }
 0x189   :  { %v2670_v63 = vadd.f32 %v2669_v30, %v2657_v61 }
 0x18a   :  { %3176 = vmatpush.bf16.msrb.mxu1 %v5252_v12  ;;  %v2658_v21 = vpop.f32.mrf.mxu1  ;;  %v5268_v12 = vld [vmem:[#allocation9 + $0xf0] sm:$0xff] }
 0x18b   :  { %v2682_v18 = vpop.f32.mrf.mxu3  ;;  %3189 = vmatpush.bf16.msrb.mxu2 %v5260_v19  ;;  %3202 = vmatpush.bf16.msrb.mxu3 %v5268_v12  ;;  %v5263_v19 = vld [vmem:[#allocation9 + $0xc8] sm:$0xff] }
 0x18c   :  { %3164 = vmatpush.bf16.msrb.mxu0 %v5243_v34  ;;  %v2683_v52 = vadd.f32 %v2682_v18, %v2670_v63  ;;  %v5277_v63 = vld [vmem:[#allocation12 + $0x38] sm:$0xff] }
 0x18e   :  { %3177 = vmatpush.bf16.msrb.mxu1 %v5251_v33  ;;  %v5267_v33 = vld [vmem:[#allocation9 + $0xe8] sm:$0xff] }
 0x18f   :  { %3190 = vmatpush.bf16.msrb.mxu2 %v5259_v22  ;;  %3203 = vmatpush.bf16.msrb.mxu3 %v5267_v33  ;;  %v5262_v22 = vld [vmem:[#allocation9 + $0xc0] sm:$0xff] }
 0x190   :  { %3165 = vmatpush.bf16.msrb.mxu0 %v5242_v13  ;;  %v2671_v26 = vpop.f32.mrf.mxu2 }
 0x192   :  { %3178 = vmatpush.bf16.msrb.mxu1 %v5250_v16  ;;  %v5265_v16 = vld [vmem:[#allocation9 + $0xd8] sm:$0xff] }
 0x193   :  { %v2684_v37 = vpop.f32.mrf.mxu3  ;;  %3191 = vmatpush.bf16.msrb.mxu2 %v5258_v31  ;;  %3204 = vmatpush.bf16.msrb.mxu3 %v5266_v15 }
 0x194   :  { %3166 = vmatpush.bf16.msrb.mxu0 %v5241_v50  ;;  %v518_v50 = vperm.slane %v5293_v48, 3 }
 0x196   :  { %3179 = vmatpush.bf16.msrb.mxu1 %v5249_v38 }
 0x197   :  { %3192 = vmatpush.bf16.msrb.mxu2 %v5257_v43  ;;  %3205 = vmatpush.bf16.msrb.mxu3 %v5265_v16 }
 0x198   :  { %3167 = vmatpush.bf16.msrb.mxu0 %v5240_v42 }
 0x19a   :  { %3180 = vmatpush.bf16.msrb.mxu1 %v5248_v20 }
 0x19b   :  { %3193 = vmatpush.bf16.msrb.mxu2 %v5256_v6  ;;  %3206 = vmatpush.bf16.msrb.mxu3 %v5264_v17 }
 0x19c   :  { %3168 = vmatpush.bf16.msrb.mxu0 %v5239_v47 }
 0x19e   :  { %3181 = vmatpush.bf16.msrb.mxu1 %v5247_v24 }
 0x19f   :  { %3194 = vmatpush.bf16.msrb.mxu2 %v5255_v53  ;;  %3207 = vmatpush.bf16.msrb.mxu3 %v5263_v19 }
 0x1a0   :  { %3169 = vmatpush.bf16.msrb.mxu0 %v5238_v39  ;;  %v2695_v27 = vpop.f32.mrf.mxu0 }
 0x1a1   :  { %v2696_v2 = vadd.f32 %v2695_v27, %v2683_v52  ;;  %v5274_v52 = vld [vmem:[#allocation12 + $0x20] sm:$0xff] }
 0x1a2   :  { %3182 = vmatpush.bf16.msrb.mxu1 %v5246_v41  ;;  %v2708_v56 = vpop.f32.mrf.mxu1 }
 0x1a3   :  { %3170 = vmatmul.bf16.vlgmr.msrb.gmra.mxu0 %v2898_v54  ;;  %3195 = vmatpush.bf16.msrb.mxu2 %v5254_v57  ;;  %v2709_v25 = vadd.f32 %v2708_v56, %v2696_v2  ;;  %v5291_v57 = vld [vmem:[#allocation11] ss:$0 sm:$0xff] }
 0x1a4   :  { %3208 = vmatpush.bf16.msrb.mxu3 %v5262_v22  ;;  %3284 = vmatpush.bf16.msra.mxu0 %v5277_v63  ;;  %v5273_v2 = vld [vmem:[#allocation12 + $0x18] sm:$0xff] }
 0x1a5   :  { %3183 = vmatmul.bf16.vlgmr.msrb.gmra.mxu1 %v2899_v45 }
 0x1a8   :  { %v2721_v58 = vpop.f32.mrf.mxu2  ;;  %v2697_v60 = vpop.f32.mrf.mxu0 }
 0x1a9   :  { %v2722_v3 = vadd.f32 %v2721_v58, %v2709_v25  ;;  %v5272_v25 = vld [vmem:[#allocation12 + $0x10] sm:$0xff] }
 0x1aa   :  { %v2710_v62 = vpop.f32.mrf.mxu1 }
 0x1ab   :  { %v2734_v59 = vpop.f32.mrf.mxu3 }
 0x1ac   :  { %v2735_v4 = vadd.f32 %v2734_v59, %v2722_v3 }
 0x1b0   :  { %v2723_v0 = vpop.f32.mrf.mxu2 }
 0x1b1   :  { %v5276_v0 = vld [vmem:[#allocation12 + $0x30] sm:$0xff] }
 0x1b2   :  { %3285 = vmatpush.bf16.msra.mxu0 %v5276_v0 }
 0x1b3   :  { %v2736_v1 = vpop.f32.mrf.mxu3 }
 0x1b4   :  { %v5275_v1 = vld [vmem:[#allocation12 + $0x28] sm:$0xff] }
 0x1b6   :  { %3286 = vmatpush.bf16.msra.mxu0 %v5275_v1 }
 0x1ba   :  { %3287 = vmatpush.bf16.msra.mxu0 %v5274_v52 }
 0x1be   :  { %3288 = vmatpush.bf16.msra.mxu0 %v5273_v2 }
 0x1c0   :  { %v2747_v5 = vpop.f32.mrf.mxu0 }
 0x1c1   :  { %v2748_v32 = vadd.f32 %v2747_v5, %v2735_v4 }
 0x1c2   :  { %v2760_v29 = vpop.f32.mrf.mxu1  ;;  %3289 = vmatpush.bf16.msra.mxu0 %v5272_v25 }
 0x1c3   :  { %v2896_v46 = vmax.f32 %v2748_v32, 0.0  ;;  %v2761_v18 = vadd.f32 %v2760_v29, %v518_v50  ;;  %v5271_v32 = vld [vmem:[#allocation12 + $0x8] sm:$0xff]  ;;  %v5270_v29 = vld [vmem:[#allocation12] sm:$0xff] }
 0x1c5   :  { %v2900_v9 = vpack.c.bf16 %v2896_v46, %v2896_v46 }
 0x1c6   :  { %3290 = vmatpush.bf16.msra.mxu0 %v5271_v32 }
 0x1c7   :  { %3196 = vmatmul.bf16.vlgmr.msrb.gmra.mxu2 %v2900_v9 }
 0x1c8   :  { %v2773_v49 = vpop.f32.mrf.mxu2  ;;  %v2749_v28 = vpop.f32.mrf.mxu0 }
 0x1c9   :  { %v2774_v20 = vadd.f32 %v2773_v49, %v2761_v18  ;;  %v5292_v28 = vld [vmem:[#allocation14] ss:$0 sm:$0xff] }
 0x1ca   :  { %v2762_v34 = vpop.f32.mrf.mxu1  ;;  %3291 = vmatpush.bf16.msra.mxu0 %v5270_v29 }
 0x1cb   :  { %v2786_v35 = vpop.f32.mrf.mxu3 }
 0x1cc   :  { %v2787_v47 = vadd.f32 %v2786_v35, %v2774_v20 }
 0x1d0   :  { %v2775_v13 = vpop.f32.mrf.mxu2 }
 0x1d3   :  { %v2788_v14 = vpop.f32.mrf.mxu3 }
 0x1e0   :  { %v2799_v38 = vpop.f32.mrf.mxu0 }
 0x1e1   :  { %v2800_v31 = vadd.f32 %v2799_v38, %v2787_v47 }
 0x1e2   :  { %v2812_v30 = vpop.f32.mrf.mxu1 }
 0x1e3   :  { %v2813_v36 = vadd.f32 %v2812_v30, %v2800_v31 }
 0x1e8   :  { %v2825_v42 = vpop.f32.mrf.mxu2  ;;  %v2801_v21 = vpop.f32.mrf.mxu0 }
 0x1e9   :  { %v2826_v37 = vadd.f32 %v2825_v42, %v2813_v36 }
 0x1ea   :  { %v2814_v23 = vpop.f32.mrf.mxu1 }
 0x1eb   :  { %v2838_v8 = vpop.f32.mrf.mxu3 }
 0x1ec   :  { %v2839_v39 = vadd.f32 %v2838_v8, %v2826_v37 }
 0x1f0   :  { %v2827_v24 = vpop.f32.mrf.mxu2 }
 0x1f3   :  { %v2840_v26 = vpop.f32.mrf.mxu3 }
 0x200   :  { %v2851_v40 = vpop.f32.mrf.mxu0 }
 0x201   :  { %v2852_v43 = vadd.f32 %v2851_v40, %v2839_v39 }
 0x202   :  { %v2864_v41 = vpop.f32.mrf.mxu1 }
 0x203   :  { %v2865_v44 = vadd.f32 %v2864_v41, %v2852_v43 }
 0x208   :  { %v2877_v54 = vpop.f32.mrf.mxu2  ;;  %v2853_v48 = vpop.f32.mrf.mxu0 }
 0x209   :  { %v2878_v6 = vadd.f32 %v2877_v54, %v2865_v44  ;;  %v2890_v45 = vpop.f32.mrf.mxu3 }
 0x20a   :  { %v2866_v51 = vpop.f32.mrf.mxu1 }
 0x20b   :  { %v2891_v10 = vadd.f32 %v2890_v45, %v2878_v6 }
 0x20d   :  { %v2897_v53 = vmax.f32 %v2891_v10, 0.0 }
 0x20f   :  { %v2901_v27 = vpack.c.bf16 %v2897_v53, %v2897_v53 }
 0x210   :  { %v2879_v55 = vpop.f32.mrf.mxu2 }
 0x211   :  { %v2892_v56 = vpop.f32.mrf.mxu3  ;;  %3209 = vmatmul.bf16.vlgmr.msrb.gmra.mxu3 %v2901_v27 }
 0x220   :  { %v3171_v7 = vpop.f32.mrf.mxu0 }
 0x221   :  { %v3172_v58 = vadd.f32 %v5291_v57, %v3171_v7 }
 0x222   :  { %v3184_v59 = vpop.f32.mrf.mxu1 }
 0x223   :  { %v3185_v60 = vadd.f32 %v3184_v59, %v3172_v58 }
 0x228   :  { %v3173_v61 = vpop.f32.mrf.mxu0 }
 0x22a   :  { %v3186_v62 = vpop.f32.mrf.mxu1 }
 0x24a   :  { %v3197_v3 = vpop.f32.mrf.mxu2 }
 0x24b   :  { %v3198_v4 = vadd.f32 %v3197_v3, %v3185_v60 }
 0x252   :  { %v3199_v5 = vpop.f32.mrf.mxu2 }
 0x294   :  { %v3210_v46 = vpop.f32.mrf.mxu3 }
 0x295   :  { %v3211_v9 = vadd.f32 %v3210_v46, %v3198_v4 }
 0x297   :  { %v3214_v49 = vmax.f32 %v3211_v9, 0.0 }
 0x299   :  { %v3215_v35 = vpack.c.bf16 %v3214_v49, %v3214_v49 }
 0x29b   :  { %3292 = vmatmul.bf16.vlgmr.msra.gmra.mxu0 %v3215_v35 }
 0x29c   :  { %v3212_v11 = vpop.f32.mrf.mxu3 }
 0x318   :  { %v3293_v12 = vpop.f32.mrf.mxu0 }
 0x319   :  { %v3294_v34 = vadd.f32 %v5292_v28, %v3293_v12 }
 0x31b   :  { %3297 = vst [vmem:[#allocation15] sm:$0xff] %v3294_v34 }
 0x31c   :  { %3308 = dma.vmem_to_hbm [thread:$0]  %s3304_s6, 128, %s3306_s14, [#allocation5]  }
 0x320   :  { %v3295_v33 = vpop.f32.mrf.mxu0 }
 0x321   :  { %5494 = dma.done.wait [#allocation5], 128  }
 0x322   :  { %5495 = vsyncadd [#allocation5], 4294967168 }
 0x323   :  { %3313 = vsyncpa [#allocation4], 1 }
 0x324   :  { %3314 = vsyncpa [#allocation7], 1 }
 0x325   :  { %3315 = vsyncpa [#allocation10], 1 }
 0x326   :  { %3316 = vsyncpa [#allocation13], 1 }
 0x327   :  { %3317 = vsyncpa [#allocation5], 1 }

</bundles_post_ra>
